<compile_context>
chip_gen: v5e
topology: v5e:2x2
jax: 0.10.0
libtpu: 0.0.40
codegen_flags: <defaults>
</compile_context>

<pallas_src>
import functools

import jax
import jax.numpy as jnp
import numpy as np
from jax.experimental import pallas as pl
from jax.experimental.pallas import tpu as pltpu

KSIZE = 4     # every conv in this module is 4x4
LANE = 128    # TPU lane width


# ----------------------------------------------------------------------------
# Pallas kernels
# ----------------------------------------------------------------------------

def _matmul_bias_act_kernel(x_ref, w_ref, b_ref, o_ref, *, activation):
    """Fused act((rows, K) @ (K, N) + bias).  bf16 MXU operands, f32 accumulate."""
    x = x_ref[...].astype(jnp.bfloat16)
    w = w_ref[...].astype(jnp.bfloat16)
    y = jnp.dot(x, w, preferred_element_type=jnp.float32) + b_ref[...]
    if activation == "leaky_relu":
        y = jnp.where(y >= 0.0, y, 0.2 * y)
    elif activation == "relu":
        y = jnp.maximum(y, 0.0)
    elif activation == "tanh":
        y = jnp.tanh(y)
    o_ref[...] = y.astype(o_ref.dtype)


def _self_attention_kernel(gamma_ref, x_ref, w_ref, b_ref, o_ref):
    """SAGAN self-attention for one batch block (channels-last).

    gamma_ref: (1,)  f32 in SMEM       residual gate (scalar)
    x_ref    : (bb, HW, C)             input sequence block
    w_ref    : (C, C + 2*C8P)          fused [V | Qpad | Kpad] 1x1-conv weights
    b_ref    : (1, C + 2*C8P)          fused biases (zero in padded columns)
    """
    bb, hw, c = x_ref.shape
    c8p = (w_ref.shape[1] - c) // 2

    x = x_ref[...]                                                # (bb,HW,C) f32
    xf = x.reshape(bb * hw, c).astype(jnp.bfloat16)

    # Single fused QKV projection across the whole batch block.
    qkv = jnp.dot(xf, w_ref[...].astype(jnp.bfloat16),
                  preferred_element_type=jnp.float32) + b_ref[...]
    qkv = qkv.reshape(bb, hw, c + 2 * c8p)
    v = qkv[:, :, :c]                  # (bb,HW,C)    lane-tile aligned slice
    q = qkv[:, :, c:c + c8p]           # (bb,HW,C8P)  lane-tile aligned slice
    k = qkv[:, :, c + c8p:]            # (bb,HW,C8P)  lane-tile aligned slice

    # scores[b,i,j] = q_i . k_j  (padded q/k columns are exactly zero -> no effect;
    # contraction absorbed by the MXU, no explicit k.T materialization).
    s = jax.lax.dot_general(q.astype(jnp.bfloat16), k.astype(jnp.bfloat16),
                            (((2,), (2,)), ((0,), (0,))),
                            preferred_element_type=jnp.float32)   # (bb,HW,HW)
    s = s - jnp.max(s, axis=-1, keepdims=True)
    e = jnp.exp(s)
    p = e * pl.reciprocal(jnp.sum(e, axis=-1, keepdims=True), approx=True)

    # out_i = sum_j p[i,j] * v_j   (== torch bmm(v, attn^T) in channels-last)
    ctx = jax.lax.dot_general(p.astype(jnp.bfloat16), v.astype(jnp.bfloat16),
                              (((2,), (1,)), ((0,), (0,))),
                              preferred_element_type=jnp.float32)  # (bb,HW,C)

    o_ref[...] = (x + gamma_ref[0] * ctx).astype(o_ref.dtype)


# ----------------------------------------------------------------------------
# Pallas-call wrappers
# ----------------------------------------------------------------------------

def _matmul_bias_act(x2d, w2d, b2d, activation, *, row_block=256):
    """y = act(x2d @ w2d + b2d) via the fused kernel.

    The output dim is zero-padded to a multiple of 128 lanes so stores are
    unmasked / lane-dense; padding is sliced off afterwards.
    """
    m, kdim = x2d.shape
    n = w2d.shape[1]
    n_pad = -(-n // LANE) * LANE
    if n_pad != n:
        w2d = jnp.pad(w2d, ((0, 0), (0, n_pad - n)))
        b2d = jnp.pad(b2d, ((0, 0), (0, n_pad - n)))

    tm = m if m <= row_block else row_block
    grid = (pl.cdiv(m, tm),)

    y = pl.pallas_call(
        functools.partial(_matmul_bias_act_kernel, activation=activation),
        out_shape=jax.ShapeDtypeStruct((m, n_pad), jnp.float32),
        grid_spec=pltpu.PrefetchScalarGridSpec(
            num_scalar_prefetch=0,
            grid=grid,
            in_specs=[
                pl.BlockSpec((tm, kdim), lambda i: (i, 0)),
                pl.BlockSpec((kdim, n_pad), lambda i: (0, 0)),
                pl.BlockSpec((1, n_pad), lambda i: (0, 0)),
            ],
            out_specs=pl.BlockSpec((tm, n_pad), lambda i: (i, 0)),
        ),
        compiler_params=pltpu.CompilerParams(
            dimension_semantics=("parallel",)),
    )(x2d, w2d, b2d)
    return y[:, :n] if n_pad != n else y


def self_attention(x_seq, gamma, w_qkv, b_qkv, *, batch_block=None):
    """x_seq: (B, HW, C) channels-last sequence -> (B, HW, C)."""
    b, hw, c = x_seq.shape
    if batch_block is None:
        # two grid steps when possible -> both TensorCores busy on v7x.
        batch_block = b // 2 if (b >= 2 and b % 2 == 0) else 1
    nb = pl.cdiv(b, batch_block)
    wtot = w_qkv.shape[1]

    return pl.pallas_call(
        _self_attention_kernel,
        out_shape=jax.ShapeDtypeStruct((b, hw, c), x_seq.dtype),
        grid_spec=pltpu.PrefetchScalarGridSpec(
            num_scalar_prefetch=0,
            grid=(nb,),
            in_specs=[
                pl.BlockSpec(memory_space=pltpu.MemorySpace.SMEM),        # gamma
                pl.BlockSpec((batch_block, hw, c), lambda i: (i, 0, 0)),  # x
                pl.BlockSpec((c, wtot), lambda i: (0, 0)),                # w_qkv
                pl.BlockSpec((1, wtot), lambda i: (0, 0)),                # b_qkv
            ],
            out_specs=pl.BlockSpec((batch_block, hw, c), lambda i: (i, 0, 0)),
        ),
        compiler_params=pltpu.CompilerParams(
            dimension_semantics=("parallel",)),
    )(gamma, x_seq, w_qkv, b_qkv)


# ----------------------------------------------------------------------------
# Conv layers = im2col (layout, wrapper) + fused Pallas matmul kernel
# ----------------------------------------------------------------------------

def _extract_patches(xp, k, stride):
    """xp: already-padded NHWC -> (B, OH, OW, k*k*C) with (kh, kw, ci) tap order."""
    _, hp, wp, _ = xp.shape
    oh = (hp - k) // stride + 1
    ow = (wp - k) // stride + 1
    taps = [xp[:, kh:kh + (oh - 1) * stride + 1:stride,
               kw:kw + (ow - 1) * stride + 1:stride, :]
            for kh in range(k) for kw in range(k)]
    return jnp.concatenate(taps, axis=-1), oh, ow


def conv4x4_s2(x_nhwc, w_mat, bias, activation):
    """Conv2d(k=4, s=2, p=1) in NHWC."""
    bsz = x_nhwc.shape[0]
    xp = jnp.pad(x_nhwc, ((0, 0), (1, 1), (1, 1), (0, 0)))
    patches, oh, ow = _extract_patches(xp, KSIZE, 2)
    y = _matmul_bias_act(patches.reshape(bsz * oh * ow, -1), w_mat, bias, activation)
    return y.reshape(bsz, oh, ow, w_mat.shape[1])


def conv_transpose4x4_s2(x_nhwc, w_mat, bias, activation):
    """ConvTranspose2d(k=4, s=2, p=1) == zero-dilate(s=2) + pad(k-1-p=2) + 4x4 s=1
    conv with the spatially flipped kernel (w_mat is pre-flipped, see params)."""
    bsz = x_nhwc.shape[0]
    pad_cfg = ((0, 0, 0), (2, 2, 1), (2, 2, 1), (0, 0, 0))   # (lo, hi, interior)
    xp = jax.lax.pad(x_nhwc, jnp.array(0.0, x_nhwc.dtype), pad_cfg)
    patches, oh, ow = _extract_patches(xp, KSIZE, 1)
    y = _matmul_bias_act(patches.reshape(bsz * oh * ow, -1), w_mat, bias, activation)
    return y.reshape(bsz, oh, ow, w_mat.shape[1])


# ----------------------------------------------------------------------------
# Full forward pass
# ----------------------------------------------------------------------------

def unet_with_attention(x_nchw, kp):
    """Matches UNetWithAttention.forward (NCHW in / NCHW out)."""
    x = jnp.transpose(x_nchw, (0, 2, 3, 1))                  # boundary NCHW -> NHWC
    x1 = conv4x4_s2(x, kp["w_d1"], kp["b_d1"], "leaky_relu")
    x2 = conv4x4_s2(x1, kp["w_d2"], kp["b_d2"], "leaky_relu")
    bsz, oh, ow, c2 = x2.shape
    seq = self_attention(x2.reshape(bsz, oh * ow, c2),
                         kp["gamma"], kp["w_qkv"], kp["b_qkv"])
    x2 = seq.reshape(bsz, oh, ow, c2)
    y = conv_transpose4x4_s2(x2, kp["w_u1"], kp["b_u1"], "relu")
    y = conv_transpose4x4_s2(y, kp["w_u2"], kp["b_u2"], "tanh")
    return jnp.transpose(y, (0, 3, 1, 2))                    # NHWC -> NCHW


# ----------------------------------------------------------------------------
# Parameters
# ----------------------------------------------------------------------------

def _spectral_normalize(w, dim=0, iters=30):
    """Divide w by its largest singular value (power iteration, like
    torch.nn.utils.spectral_norm but run to convergence at init time)."""
    m = jnp.moveaxis(w, dim, 0).reshape(w.shape[dim], -1)
    v = jnp.full((m.shape[1],), 1.0 / np.sqrt(m.shape[1]), w.dtype)
    u = m @ v
    for _ in range(iters):
        u = m @ v
        u = u / (jnp.linalg.norm(u) + 1e-12)
        v = m.T @ u
        v = v / (jnp.linalg.norm(v) + 1e-12)
    sigma = u @ (m @ v)
    return w / sigma


def init_params(key, in_channels=1, num_channels=64):
    """Random parameters in the native PyTorch layouts."""
    c1, c2 = num_channels, num_channels * 2
    c8 = c2 // 8
    ks = jax.random.split(key, 14)
    sn = _spectral_normalize
    return dict(
        # Conv2d weights: (Cout, Cin, 4, 4)
        w_d1=sn(jax.random.normal(ks[0], (c1, in_channels, 4, 4)) * 0.5),
        b_d1=jax.random.normal(ks[1], (c1,)) * 0.1,
        w_d2=sn(jax.random.normal(ks[2], (c2, c1, 4, 4)) * 0.5),
        b_d2=jax.random.normal(ks[3], (c2,)) * 0.1,
        # attention 1x1 convs (Cout, Cin)
        wq=sn(jax.random.normal(ks[4], (c8, c2)) * 0.5),
        wk=sn(jax.random.normal(ks[5], (c8, c2)) * 0.5),
        wv=sn(jax.random.normal(ks[6], (c2, c2)) * 0.5),
        bq=jax.random.normal(ks[7], (c8,)) * 0.1,
        bk=jax.random.normal(ks[8], (c8,)) * 0.1,
        bv=jax.random.normal(ks[9], (c2,)) * 0.1,
        # PyTorch inits gamma to 0; use a nonzero value so the attention path
        # actually contributes and is exercised by the check.
        gamma=jnp.full((1,), 0.5, jnp.float32),
        # ConvTranspose2d weights: (Cin, Cout, 4, 4)   (spectral_norm over dim=1)
        w_u1=sn(jax.random.normal(ks[10], (c2, c1, 4, 4)) * 0.5, dim=1),
        b_u1=jax.random.normal(ks[11], (c1,)) * 0.1,
        w_u2=sn(jax.random.normal(ks[12], (c1, in_channels, 4, 4)) * 0.5, dim=1),
        b_u2=jax.random.normal(ks[13], (in_channels,)) * 0.1,
    )


def prepare_kernel_params(raw):
    """Convert PyTorch-layout params into the matmul-ready forms the kernels use."""
    c8 = raw["wq"].shape[0]
    c8p = -(-c8 // LANE) * LANE            # pad q/k widths to a full lane group

    def conv_w_mat(w):                     # (O,I,k,k) -> (k*k*I, O), (kh,kw,ci) order
        return jnp.transpose(w, (2, 3, 1, 0)).reshape(-1, w.shape[0])

    def convt_w_mat(wt):                   # (I,O,k,k) -> equivalent s=1 conv matrix
        w_conv = jnp.flip(wt, axis=(2, 3)).transpose(1, 0, 2, 3)   # (O,I,k,k)
        return jnp.transpose(w_conv, (2, 3, 1, 0)).reshape(-1, wt.shape[1])

    def pad_cols(a, width):
        return jnp.pad(a, ((0, 0), (0, width - a.shape[1])))

    w_qkv = jnp.concatenate(
        [raw["wv"].T, pad_cols(raw["wq"].T, c8p), pad_cols(raw["wk"].T, c8p)], axis=1)
    b_qkv = jnp.concatenate(
        [raw["bv"], jnp.pad(raw["bq"], (0, c8p - c8)),
         jnp.pad(raw["bk"], (0, c8p - c8))])[None, :]

    return dict(
        w_d1=conv_w_mat(raw["w_d1"]), b_d1=raw["b_d1"][None, :],
        w_d2=conv_w_mat(raw["w_d2"]), b_d2=raw["b_d2"][None, :],
        w_qkv=w_qkv, b_qkv=b_qkv, gamma=raw["gamma"],
        w_u1=convt_w_mat(raw["w_u1"]), b_u1=raw["b_u1"][None, :],
        w_u2=convt_w_mat(raw["w_u2"]), b_u2=raw["b_u2"][None, :],
    )


# ----------------------------------------------------------------------------
# Pure-JAX f32 reference (independent path: XLA convolutions)
# ----------------------------------------------------------------------------

def unet_with_attention_ref(x_nchw, raw):
    x = jnp.transpose(x_nchw, (0, 2, 3, 1)).astype(jnp.float32)

    def conv(h, w, b, stride, pad):
        y = jax.lax.conv_general_dilated(
            h, jnp.transpose(w, (2, 3, 1, 0)), (stride, stride),
            [(pad, pad), (pad, pad)], dimension_numbers=("NHWC", "HWIO", "NHWC"))
        return y + b.reshape(1, 1, 1, -1)

    def conv_t(h, wt, b, stride, pad):
        k = wt.shape[-1]
        w_conv = jnp.flip(wt, axis=(2, 3)).transpose(1, 0, 2, 3)
        y = jax.lax.conv_general_dilated(
            h, jnp.transpose(w_conv, (2, 3, 1, 0)), (1, 1),
            [(k - 1 - pad, k - 1 - pad)] * 2, lhs_dilation=(stride, stride),
            dimension_numbers=("NHWC", "HWIO", "NHWC"))
        return y + b.reshape(1, 1, 1, -1)

    lrelu = lambda v: jnp.where(v >= 0.0, v, 0.2 * v)
    x1 = lrelu(conv(x, raw["w_d1"], raw["b_d1"], 2, 1))
    x2 = lrelu(conv(x1, raw["w_d2"], raw["b_d2"], 2, 1))

    bsz, oh, ow, c2 = x2.shape
    seq = x2.reshape(bsz, oh * ow, c2)
    q = seq @ raw["wq"].T + raw["bq"]
    k = seq @ raw["wk"].T + raw["bk"]
    v = seq @ raw["wv"].T + raw["bv"]
    attn = jax.nn.softmax(jnp.einsum("bic,bjc->bij", q, k), axis=-1)
    seq = seq + raw["gamma"][0] * jnp.einsum("bij,bjc->bic", attn, v)
    x2 = seq.reshape(bsz, oh, ow, c2)

    y = jax.nn.relu(conv_t(x2, raw["w_u1"], raw["b_u1"], 2, 1))
    y = jnp.tanh(conv_t(y, raw["w_u2"], raw["b_u2"], 2, 1))
    return jnp.transpose(y, (0, 3, 1, 2))


# ----------------------------------------------------------------------------
# main
# ----------------------------------------------------------------------------

if __name__ == "__main__":
    key = jax.random.PRNGKey(0)
    kx, kparam = jax.random.split(key)

    # Small shapes consistent with the module: Config.CHANNELS=1 input,
    # num_channels=64 -> attention runs on (B, 4*4, 128).
    B, CIN, H, W = 2, 1, 16, 16
    x = jax.random.normal(kx, (B, CIN, H, W), jnp.float32)

    raw = init_params(kparam, in_channels=CIN, num_channels=64)
    kp = prepare_kernel_params(raw)

    fwd = jax.jit(unet_with_attention)
    out = jax.block_until_ready(fwd(x, kp))
    assert out.shape == (B, CIN, H, W), out.shape

    ref = jax.block_until_ready(unet_with_attention_ref(x, raw))
    # Tolerance covers bf16 MXU operands + approx softmax reciprocal in the
    # kernels vs. the pure-f32 XLA reference.
    np.testing.assert_allclose(np.asarray(out), np.asarray(ref),
                               rtol=2e-2, atol=2e-2)
    print("KERNEL_OK")
</pallas_src>

<mosaic_0001>
module attributes {stable_mosaic.version = 11 : i64} {
  func.func @_matmul_bias_act_kernel(%arg0: i32, %arg1: memref<128x16xf32, #tpu.memory_space<vmem>>, %arg2: memref<16x128xf32, #tpu.memory_space<vmem>>, %arg3: memref<1x128xf32, #tpu.memory_space<vmem>>, %arg4: memref<128x128xf32, #tpu.memory_space<vmem>>) attributes {dimension_semantics = [#tpu.dimension_semantics<parallel>], iteration_bounds = array<i64: 1>, scalar_prefetch = 0 : i64, scratch_operands = 0 : i64, tpu.core_type = #tpu.core_type<tc>, window_params = [{transform_indices = @transform_0, window_bounds = array<i64: 128, 16>}, {pipeline_mode = #tpu.pipeline_mode<synchronous>, transform_indices = @transform_1, window_bounds = array<i64: 16, 128>}, {pipeline_mode = #tpu.pipeline_mode<synchronous>, transform_indices = @transform_2, window_bounds = array<i64: 1, 128>}, {transform_indices = @transform_3, window_bounds = array<i64: 128, 128>}]} {
    %c0 = arith.constant 0 : index
    %c0_0 = arith.constant 0 : index
    %0 = vector.load %arg1[%c0, %c0_0] : memref<128x16xf32, #tpu.memory_space<vmem>>, vector<128x16xf32>
    %1 = arith.truncf %0 : vector<128x16xf32> to vector<128x16xbf16>
    %c0_1 = arith.constant 0 : index
    %c0_2 = arith.constant 0 : index
    %2 = vector.load %arg2[%c0_1, %c0_2] : memref<16x128xf32, #tpu.memory_space<vmem>>, vector<16x128xf32>
    %3 = arith.truncf %2 : vector<16x128xf32> to vector<16x128xbf16>
    %cst = arith.constant dense<0.000000e+00> : vector<128x128xf32>
    %4 = tpu.matmul %1, %3, %cst {dimension_numbers = #tpu.dot_dimension_numbers<[1], [0], [0], [1], [0, 0, 1, 1], [], []>} : vector<128x16xbf16>, vector<16x128xbf16>, vector<128x128xf32> -> vector<128x128xf32>
    %c0_3 = arith.constant 0 : index
    %c0_4 = arith.constant 0 : index
    %5 = vector.load %arg3[%c0_3, %c0_4] : memref<1x128xf32, #tpu.memory_space<vmem>>, vector<1x128xf32>
    %6 = vector.broadcast %5 : vector<1x128xf32> to vector<128x128xf32>
    %7 = arith.addf %4, %6 : vector<128x128xf32>
    %cst_5 = arith.constant 0.000000e+00 : f32
    %8 = vector.broadcast %cst_5 : f32 to vector<128x128xf32>
    %9 = arith.cmpf oge, %7, %8 : vector<128x128xf32>
    %cst_6 = arith.constant 2.000000e-01 : f32
    %10 = vector.broadcast %cst_6 : f32 to vector<128x128xf32>
    %11 = arith.mulf %10, %7 : vector<128x128xf32>
    %12 = arith.select %9, %7, %11 : vector<128x128xi1>, vector<128x128xf32>
    %c0_7 = arith.constant 0 : index
    %c0_8 = arith.constant 0 : index
    %13 = vector.load %arg4[%c0_7, %c0_8] : memref<128x128xf32, #tpu.memory_space<vmem>>, vector<128x128xf32>
    tpu.vector_store %arg4[%c0_7, %c0_8], %12 {strides = array<i32>} : memref<128x128xf32, #tpu.memory_space<vmem>>, vector<128x128xf32>,
    return
  }
  func.func @transform_0(%arg0: i32) -> (i32, i32) {
    %c0_i32 = arith.constant 0 : i32
    %c0_i32_0 = arith.constant 0 : i32
    return %arg0, %c0_i32 : i32, i32
  }
  func.func @transform_1(%arg0: i32) -> (i32, i32) {
    %c0_i32 = arith.constant 0 : i32
    %c0_i32_0 = arith.constant 0 : i32
    %c0_i32_1 = arith.constant 0 : i32
    return %c0_i32, %c0_i32_0 : i32, i32
  }
  func.func @transform_2(%arg0: i32) -> (i32, i32) {
    %c0_i32 = arith.constant 0 : i32
    %c0_i32_0 = arith.constant 0 : i32
    %c0_i32_1 = arith.constant 0 : i32
    return %c0_i32, %c0_i32_0 : i32, i32
  }
  func.func @transform_3(%arg0: i32) -> (i32, i32) {
    %c0_i32 = arith.constant 0 : i32
    %c0_i32_0 = arith.constant 0 : i32
    return %arg0, %c0_i32 : i32, i32
  }
}

module attributes {stable_mosaic.version = 11 : i64} {
  func.func @_matmul_bias_act_kernel(%arg0: i32, %arg1: memref<32x1024xf32, #tpu.memory_space<vmem>>, %arg2: memref<1024x128xf32, #tpu.memory_space<vmem>>, %arg3: memref<1x128xf32, #tpu.memory_space<vmem>>, %arg4: memref<32x128xf32, #tpu.memory_space<vmem>>) attributes {dimension_semantics = [#tpu.dimension_semantics<parallel>], iteration_bounds = array<i64: 1>, scalar_prefetch = 0 : i64, scratch_operands = 0 : i64, tpu.core_type = #tpu.core_type<tc>, window_params = [{transform_indices = @transform_0, window_bounds = array<i64: 32, 1024>}, {pipeline_mode = #tpu.pipeline_mode<synchronous>, transform_indices = @transform_1, window_bounds = array<i64: 1024, 128>}, {pipeline_mode = #tpu.pipeline_mode<synchronous>, transform_indices = @transform_2, window_bounds = array<i64: 1, 128>}, {transform_indices = @transform_3, window_bounds = array<i64: 32, 128>}]} {
    %c0 = arith.constant 0 : index
    %c0_0 = arith.constant 0 : index
    %0 = vector.load %arg1[%c0, %c0_0] : memref<32x1024xf32, #tpu.memory_space<vmem>>, vector<32x1024xf32>
    %1 = arith.truncf %0 : vector<32x1024xf32> to vector<32x1024xbf16>
    %c0_1 = arith.constant 0 : index
    %c0_2 = arith.constant 0 : index
    %2 = vector.load %arg2[%c0_1, %c0_2] : memref<1024x128xf32, #tpu.memory_space<vmem>>, vector<1024x128xf32>
    %3 = arith.truncf %2 : vector<1024x128xf32> to vector<1024x128xbf16>
    %cst = arith.constant dense<0.000000e+00> : vector<32x128xf32>
    %4 = tpu.matmul %1, %3, %cst {dimension_numbers = #tpu.dot_dimension_numbers<[1], [0], [0], [1], [0, 0, 1, 1], [], []>} : vector<32x1024xbf16>, vector<1024x128xbf16>, vector<32x128xf32> -> vector<32x128xf32>
    %c0_3 = arith.constant 0 : index
    %c0_4 = arith.constant 0 : index
    %5 = vector.load %arg3[%c0_3, %c0_4] : memref<1x128xf32, #tpu.memory_space<vmem>>, vector<1x128xf32>
    %6 = vector.broadcast %5 : vector<1x128xf32> to vector<32x128xf32>
    %7 = arith.addf %4, %6 : vector<32x128xf32>
    %cst_5 = arith.constant 0.000000e+00 : f32
    %8 = vector.broadcast %cst_5 : f32 to vector<32x128xf32>
    %9 = arith.cmpf oge, %7, %8 : vector<32x128xf32>
    %cst_6 = arith.constant 2.000000e-01 : f32
    %10 = vector.broadcast %cst_6 : f32 to vector<32x128xf32>
    %11 = arith.mulf %10, %7 : vector<32x128xf32>
    %12 = arith.select %9, %7, %11 : vector<32x128xi1>, vector<32x128xf32>
    %c0_7 = arith.constant 0 : index
    %c0_8 = arith.constant 0 : index
    %13 = vector.load %arg4[%c0_7, %c0_8] : memref<32x128xf32, #tpu.memory_space<vmem>>, vector<32x128xf32>
    tpu.vector_store %arg4[%c0_7, %c0_8], %12 {strides = array<i32>} : memref<32x128xf32, #tpu.memory_space<vmem>>, vector<32x128xf32>,
    return
  }
  func.func @transform_0(%arg0: i32) -> (i32, i32) {
    %c0_i32 = arith.constant 0 : i32
    %c0_i32_0 = arith.constant 0 : i32
    return %arg0, %c0_i32 : i32, i32
  }
  func.func @transform_1(%arg0: i32) -> (i32, i32) {
    %c0_i32 = arith.constant 0 : i32
    %c0_i32_0 = arith.constant 0 : i32
    %c0_i32_1 = arith.constant 0 : i32
    return %c0_i32, %c0_i32_0 : i32, i32
  }
  func.func @transform_2(%arg0: i32) -> (i32, i32) {
    %c0_i32 = arith.constant 0 : i32
    %c0_i32_0 = arith.constant 0 : i32
    %c0_i32_1 = arith.constant 0 : i32
    return %c0_i32, %c0_i32_0 : i32, i32
  }
  func.func @transform_3(%arg0: i32) -> (i32, i32) {
    %c0_i32 = arith.constant 0 : i32
    %c0_i32_0 = arith.constant 0 : i32
    return %arg0, %c0_i32 : i32, i32
  }
}

module attributes {stable_mosaic.version = 11 : i64} {
  func.func @_self_attention_kernel(%arg0: i32, %arg1: memref<1xf32, #tpu.memory_space<smem>>, %arg2: memref<1x16x128xf32, #tpu.memory_space<vmem>>, %arg3: memref<128x384xf32, #tpu.memory_space<vmem>>, %arg4: memref<1x384xf32, #tpu.memory_space<vmem>>, %arg5: memref<1x16x128xf32, #tpu.memory_space<vmem>>) attributes {dimension_semantics = [#tpu.dimension_semantics<parallel>], iteration_bounds = array<i64: 2>, scalar_prefetch = 0 : i64, scratch_operands = 0 : i64, tpu.core_type = #tpu.core_type<tc>, window_params = [{transform_indices = @transform_0, window_bounds = array<i64: 1>}, {transform_indices = @transform_1, window_bounds = array<i64: 1, 16, 128>}, {pipeline_mode = #tpu.pipeline_mode<synchronous>, transform_indices = @transform_2, window_bounds = array<i64: 128, 384>}, {pipeline_mode = #tpu.pipeline_mode<synchronous>, transform_indices = @transform_3, window_bounds = array<i64: 1, 384>}, {transform_indices = @transform_4, window_bounds = array<i64: 1, 16, 128>}]} {
    %c0 = arith.constant 0 : index
    %c0_0 = arith.constant 0 : index
    %c0_1 = arith.constant 0 : index
    %0 = vector.load %arg2[%c0, %c0_0, %c0_1] : memref<1x16x128xf32, #tpu.memory_space<vmem>>, vector<1x16x128xf32>
    %1 = vector.shape_cast %0 : vector<1x16x128xf32> to vector<16x128xf32>
    %2 = arith.truncf %1 : vector<16x128xf32> to vector<16x128xbf16>
    %c0_2 = arith.constant 0 : index
    %c0_3 = arith.constant 0 : index
    %3 = vector.load %arg3[%c0_2, %c0_3] : memref<128x384xf32, #tpu.memory_space<vmem>>, vector<128x384xf32>
    %4 = arith.truncf %3 : vector<128x384xf32> to vector<128x384xbf16>
    %cst = arith.constant dense<0.000000e+00> : vector<16x384xf32>
    %5 = tpu.matmul %2, %4, %cst {dimension_numbers = #tpu.dot_dimension_numbers<[1], [0], [0], [1], [0, 0, 1, 1], [], []>} : vector<16x128xbf16>, vector<128x384xbf16>, vector<16x384xf32> -> vector<16x384xf32>
    %c0_4 = arith.constant 0 : index
    %c0_5 = arith.constant 0 : index
    %6 = vector.load %arg4[%c0_4, %c0_5] : memref<1x384xf32, #tpu.memory_space<vmem>>, vector<1x384xf32>
    %7 = vector.broadcast %6 : vector<1x384xf32> to vector<16x384xf32>
    %8 = arith.addf %5, %7 : vector<16x384xf32>
    %9 = vector.shape_cast %8 : vector<16x384xf32> to vector<1x16x384xf32>
    %10 = vector.extract_strided_slice %9 {offsets = [0, 0, 0], sizes = [1, 16, 128], strides = [1, 1, 1]} : vector<1x16x384xf32> to vector<1x16x128xf32>
    %11 = vector.extract_strided_slice %9 {offsets = [0, 0, 128], sizes = [1, 16, 128], strides = [1, 1, 1]} : vector<1x16x384xf32> to vector<1x16x128xf32>
    %12 = vector.extract_strided_slice %9 {offsets = [0, 0, 256], sizes = [1, 16, 128], strides = [1, 1, 1]} : vector<1x16x384xf32> to vector<1x16x128xf32>
    %13 = arith.truncf %11 : vector<1x16x128xf32> to vector<1x16x128xbf16>
    %14 = arith.truncf %12 : vector<1x16x128xf32> to vector<1x16x128xbf16>
    %cst_6 = arith.constant dense<0.000000e+00> : vector<1x16x16xf32>
    %15 = tpu.matmul %13, %14, %cst_6 {dimension_numbers = #tpu.dot_dimension_numbers<[2], [2], [1], [1], [0, 0, 0, 1, 1, 1], [0], [0]>} : vector<1x16x128xbf16>, vector<1x16x128xbf16>, vector<1x16x16xf32> -> vector<1x16x16xf32>
    %cst_7 = arith.constant dense<0xFF800000> : vector<1x16xf32>
    %16 = vector.multi_reduction <maximumf>, %15, %cst_7 [2] : vector<1x16x16xf32> to vector<1x16xf32>
    %17 = vector.shape_cast %16 : vector<1x16xf32> to vector<1x16x1xf32>
    %18 = vector.broadcast %17 : vector<1x16x1xf32> to vector<1x16x16xf32>
    %19 = arith.subf %15, %18 : vector<1x16x16xf32>
    %20 = math.exp %19 : vector<1x16x16xf32>
    %cst_8 = arith.constant dense<0.000000e+00> : vector<1x16xf32>
    %21 = vector.multi_reduction <add>, %20, %cst_8 [2] : vector<1x16x16xf32> to vector<1x16xf32>
    %22 = vector.shape_cast %21 : vector<1x16xf32> to vector<1x16x1xf32>
    %23 = tpu.reciprocal %22 {approx = true} : vector<1x16x1xf32> -> vector<1x16x1xf32>
    %24 = vector.broadcast %23 : vector<1x16x1xf32> to vector<1x16x16xf32>
    %25 = arith.mulf %20, %24 : vector<1x16x16xf32>
    %26 = arith.truncf %25 : vector<1x16x16xf32> to vector<1x16x16xbf16>
    %27 = arith.truncf %10 : vector<1x16x128xf32> to vector<1x16x128xbf16>
    %cst_9 = arith.constant dense<0.000000e+00> : vector<1x16x128xf32>
    %28 = tpu.matmul %26, %27, %cst_9 {dimension_numbers = #tpu.dot_dimension_numbers<[2], [1], [1], [2], [0, 0, 0, 1, 1, 2], [0], [0]>} : vector<1x16x16xbf16>, vector<1x16x128xbf16>, vector<1x16x128xf32> -> vector<1x16x128xf32>
    %c0_10 = arith.constant 0 : index
    %29 = memref.load %arg1[%c0_10] : memref<1xf32, #tpu.memory_space<smem>>
    %30 = vector.broadcast %29 : f32 to vector<1x16x128xf32>
    %31 = arith.mulf %30, %28 : vector<1x16x128xf32>
    %32 = arith.addf %0, %31 : vector<1x16x128xf32>
    %c0_11 = arith.constant 0 : index
    %c0_12 = arith.constant 0 : index
    %c0_13 = arith.constant 0 : index
    %33 = vector.load %arg5[%c0_11, %c0_12, %c0_13] : memref<1x16x128xf32, #tpu.memory_space<vmem>>, vector<1x16x128xf32>
    tpu.vector_store %arg5[%c0_11, %c0_12, %c0_13], %32 {strides = array<i32>} : memref<1x16x128xf32, #tpu.memory_space<vmem>>, vector<1x16x128xf32>,
    return
  }
  func.func @transform_0(%arg0: i32) -> i32 {
    %c0_i32 = arith.constant 0 : i32
    %c0_i32_0 = arith.constant 0 : i32
    return %c0_i32 : i32
  }
  func.func @transform_1(%arg0: i32) -> (i32, i32, i32) {
    %c0_i32 = arith.constant 0 : i32
    %c0_i32_0 = arith.constant 0 : i32
    %c0_i32_1 = arith.constant 0 : i32
    return %arg0, %c0_i32, %c0_i32_0 : i32, i32, i32
  }
  func.func @transform_2(%arg0: i32) -> (i32, i32) {
    %c0_i32 = arith.constant 0 : i32
    %c0_i32_0 = arith.constant 0 : i32
    %c0_i32_1 = arith.constant 0 : i32
    return %c0_i32, %c0_i32_0 : i32, i32
  }
  func.func @transform_3(%arg0: i32) -> (i32, i32) {
    %c0_i32 = arith.constant 0 : i32
    %c0_i32_0 = arith.constant 0 : i32
    %c0_i32_1 = arith.constant 0 : i32
    return %c0_i32, %c0_i32_0 : i32, i32
  }
  func.func @transform_4(%arg0: i32) -> (i32, i32, i32) {
    %c0_i32 = arith.constant 0 : i32
    %c0_i32_0 = arith.constant 0 : i32
    %c0_i32_1 = arith.constant 0 : i32
    return %arg0, %c0_i32, %c0_i32_0 : i32, i32, i32
  }
}

module attributes {stable_mosaic.version = 11 : i64} {
  func.func @_matmul_bias_act_kernel(%arg0: i32, %arg1: memref<128x2048xf32, #tpu.memory_space<vmem>>, %arg2: memref<2048x128xf32, #tpu.memory_space<vmem>>, %arg3: memref<1x128xf32, #tpu.memory_space<vmem>>, %arg4: memref<128x128xf32, #tpu.memory_space<vmem>>) attributes {dimension_semantics = [#tpu.dimension_semantics<parallel>], iteration_bounds = array<i64: 1>, scalar_prefetch = 0 : i64, scratch_operands = 0 : i64, tpu.core_type = #tpu.core_type<tc>, window_params = [{transform_indices = @transform_0, window_bounds = array<i64: 128, 2048>}, {pipeline_mode = #tpu.pipeline_mode<synchronous>, transform_indices = @transform_1, window_bounds = array<i64: 2048, 128>}, {pipeline_mode = #tpu.pipeline_mode<synchronous>, transform_indices = @transform_2, window_bounds = array<i64: 1, 128>}, {transform_indices = @transform_3, window_bounds = array<i64: 128, 128>}]} {
    %c0 = arith.constant 0 : index
    %c0_0 = arith.constant 0 : index
    %0 = vector.load %arg1[%c0, %c0_0] : memref<128x2048xf32, #tpu.memory_space<vmem>>, vector<128x2048xf32>
    %1 = arith.truncf %0 : vector<128x2048xf32> to vector<128x2048xbf16>
    %c0_1 = arith.constant 0 : index
    %c0_2 = arith.constant 0 : index
    %2 = vector.load %arg2[%c0_1, %c0_2] : memref<2048x128xf32, #tpu.memory_space<vmem>>, vector<2048x128xf32>
    %3 = arith.truncf %2 : vector<2048x128xf32> to vector<2048x128xbf16>
    %cst = arith.constant dense<0.000000e+00> : vector<128x128xf32>
    %4 = tpu.matmul %1, %3, %cst {dimension_numbers = #tpu.dot_dimension_numbers<[1], [0], [0], [1], [0, 0, 1, 1], [], []>} : vector<128x2048xbf16>, vector<2048x128xbf16>, vector<128x128xf32> -> vector<128x128xf32>
    %c0_3 = arith.constant 0 : index
    %c0_4 = arith.constant 0 : index
    %5 = vector.load %arg3[%c0_3, %c0_4] : memref<1x128xf32, #tpu.memory_space<vmem>>, vector<1x128xf32>
    %6 = vector.broadcast %5 : vector<1x128xf32> to vector<128x128xf32>
    %7 = arith.addf %4, %6 : vector<128x128xf32>
    %cst_5 = arith.constant 0.000000e+00 : f32
    %8 = vector.broadcast %cst_5 : f32 to vector<128x128xf32>
    %9 = arith.maximumf %7, %8 : vector<128x128xf32>
    %c0_6 = arith.constant 0 : index
    %c0_7 = arith.constant 0 : index
    %10 = vector.load %arg4[%c0_6, %c0_7] : memref<128x128xf32, #tpu.memory_space<vmem>>, vector<128x128xf32>
    tpu.vector_store %arg4[%c0_6, %c0_7], %9 {strides = array<i32>} : memref<128x128xf32, #tpu.memory_space<vmem>>, vector<128x128xf32>,
    return
  }
  func.func @transform_0(%arg0: i32) -> (i32, i32) {
    %c0_i32 = arith.constant 0 : i32
    %c0_i32_0 = arith.constant 0 : i32
    return %arg0, %c0_i32 : i32, i32
  }
  func.func @transform_1(%arg0: i32) -> (i32, i32) {
    %c0_i32 = arith.constant 0 : i32
    %c0_i32_0 = arith.constant 0 : i32
    %c0_i32_1 = arith.constant 0 : i32
    return %c0_i32, %c0_i32_0 : i32, i32
  }
  func.func @transform_2(%arg0: i32) -> (i32, i32) {
    %c0_i32 = arith.constant 0 : i32
    %c0_i32_0 = arith.constant 0 : i32
    %c0_i32_1 = arith.constant 0 : i32
    return %c0_i32, %c0_i32_0 : i32, i32
  }
  func.func @transform_3(%arg0: i32) -> (i32, i32) {
    %c0_i32 = arith.constant 0 : i32
    %c0_i32_0 = arith.constant 0 : i32
    return %arg0, %c0_i32 : i32, i32
  }
}

module attributes {stable_mosaic.version = 11 : i64} {
  func.func @_matmul_bias_act_kernel(%arg0: i32, %arg1: memref<256x1024xf32, #tpu.memory_space<vmem>>, %arg2: memref<1024x128xf32, #tpu.memory_space<vmem>>, %arg3: memref<1x128xf32, #tpu.memory_space<vmem>>, %arg4: memref<256x128xf32, #tpu.memory_space<vmem>>) attributes {dimension_semantics = [#tpu.dimension_semantics<parallel>], iteration_bounds = array<i64: 2>, scalar_prefetch = 0 : i64, scratch_operands = 0 : i64, tpu.core_type = #tpu.core_type<tc>, window_params = [{transform_indices = @transform_0, window_bounds = array<i64: 256, 1024>}, {pipeline_mode = #tpu.pipeline_mode<synchronous>, transform_indices = @transform_1, window_bounds = array<i64: 1024, 128>}, {pipeline_mode = #tpu.pipeline_mode<synchronous>, transform_indices = @transform_2, window_bounds = array<i64: 1, 128>}, {transform_indices = @transform_3, window_bounds = array<i64: 256, 128>}]} {
    %c0 = arith.constant 0 : index
    %c0_0 = arith.constant 0 : index
    %0 = vector.load %arg1[%c0, %c0_0] : memref<256x1024xf32, #tpu.memory_space<vmem>>, vector<256x1024xf32>
    %1 = arith.truncf %0 : vector<256x1024xf32> to vector<256x1024xbf16>
    %c0_1 = arith.constant 0 : index
    %c0_2 = arith.constant 0 : index
    %2 = vector.load %arg2[%c0_1, %c0_2] : memref<1024x128xf32, #tpu.memory_space<vmem>>, vector<1024x128xf32>
    %3 = arith.truncf %2 : vector<1024x128xf32> to vector<1024x128xbf16>
    %cst = arith.constant dense<0.000000e+00> : vector<256x128xf32>
    %4 = tpu.matmul %1, %3, %cst {dimension_numbers = #tpu.dot_dimension_numbers<[1], [0], [0], [1], [0, 0, 1, 1], [], []>} : vector<256x1024xbf16>, vector<1024x128xbf16>, vector<256x128xf32> -> vector<256x128xf32>
    %c0_3 = arith.constant 0 : index
    %c0_4 = arith.constant 0 : index
    %5 = vector.load %arg3[%c0_3, %c0_4] : memref<1x128xf32, #tpu.memory_space<vmem>>, vector<1x128xf32>
    %6 = vector.broadcast %5 : vector<1x128xf32> to vector<256x128xf32>
    %7 = arith.addf %4, %6 : vector<256x128xf32>
    %8 = math.tanh %7 : vector<256x128xf32>
    %c0_5 = arith.constant 0 : index
    %c0_6 = arith.constant 0 : index
    %9 = vector.load %arg4[%c0_5, %c0_6] : memref<256x128xf32, #tpu.memory_space<vmem>>, vector<256x128xf32>
    tpu.vector_store %arg4[%c0_5, %c0_6], %8 {strides = array<i32>} : memref<256x128xf32, #tpu.memory_space<vmem>>, vector<256x128xf32>,
    return
  }
  func.func @transform_0(%arg0: i32) -> (i32, i32) {
    %c0_i32 = arith.constant 0 : i32
    %c0_i32_0 = arith.constant 0 : i32
    return %arg0, %c0_i32 : i32, i32
  }
  func.func @transform_1(%arg0: i32) -> (i32, i32) {
    %c0_i32 = arith.constant 0 : i32
    %c0_i32_0 = arith.constant 0 : i32
    %c0_i32_1 = arith.constant 0 : i32
    return %c0_i32, %c0_i32_0 : i32, i32
  }
  func.func @transform_2(%arg0: i32) -> (i32, i32) {
    %c0_i32 = arith.constant 0 : i32
    %c0_i32_0 = arith.constant 0 : i32
    %c0_i32_1 = arith.constant 0 : i32
    return %c0_i32, %c0_i32_0 : i32, i32
  }
  func.func @transform_3(%arg0: i32) -> (i32, i32) {
    %c0_i32 = arith.constant 0 : i32
    %c0_i32_0 = arith.constant 0 : i32
    return %arg0, %c0_i32 : i32, i32
  }
}

</mosaic_0001>

<bundles_post_ra>
// kernel: unet_with_attention.5
= control target key start
LH: loop header
LB: loop body
LE: loop exit
PB: predicated region body
PF: predicated region fallthrough
CT: control target
= control target key end

     0   :  { %vm46_vm0 = vcmask 130048   ;;  %s351_s1 = inlined_call_operand.vmem [shape: f32[16,128], index: 1, kind: input, shape index: {}]   ;;  %s352_s0 = inlined_call_operand.vmem [shape: f32[128,16], index: 0, kind: input, shape index: {}]   ;;  %s353_s2 = inlined_call_operand.vmem [shape: f32[1,128], index: 2, kind: input, shape index: {}]   ;;  %s354_s3 = inlined_call_operand.vmem [shape: f32[128,128], index: 3, kind: output, shape index: {}]  }
   0x1   :  { %v39_v0 = vld [vmem:[%s351_s1] sm:$0xff]  ;;  %v40_v1 = vld [vmem:[%s351_s1 + $0x8] sm:$0xff]  ;;  %v17_v15 = vld [vmem:[%s352_s0 + $0x10] sm:$0xff] }
   0x2   :  { %v15_v2 = vld [vmem:[%s352_s0] sm:$0xff]  ;;  %v41_v3 = vpack.c.bf16 %v40_v1, %v39_v0  ;;  %v16_v4 = vld [vmem:[%s352_s0 + $0x8] sm:$0xff]  ;;  %v18_v16 = vld [vmem:[%s352_s0 + $0x18] sm:$0xff] }
   0x3   :  { %v19_v5 = vld [vmem:[%s352_s0 + $0x20] sm:$0xff]  ;;  %v20_v6 = vld [vmem:[%s352_s0 + $0x28] sm:$0xff]  ;;  %v31_v7 = vpack.c.bf16 %v16_v4, %v15_v2  ;;  %v21_v17 = vld [vmem:[%s352_s0 + $0x30] sm:$0xff]  ;;  %v32_v23 = vpack.c.bf16 %v18_v16, %v17_v15 }
   0x4   :  { %v33_v8 = vpack.c.bf16 %v20_v6, %v19_v5  ;;  %v23_v9 = vld [vmem:[%s352_s0 + $0x40] sm:$0xff]  ;;  %v24_v10 = vld [vmem:[%s352_s0 + $0x48] sm:$0xff]  ;;  %78 = vmatpush.bf16.msra.mxu0 %v41_v3  ;;  %196 = vmatpush.bf16.msra.mxu1 %v41_v3  ;;  %v22_v18 = vld [vmem:[%s352_s0 + $0x38] sm:$0xff] }
   0x5   :  { %v27_v11 = vld [vmem:[%s352_s0 + $0x60] sm:$0xff]  ;;  %v35_v12 = vpack.c.bf16 %v24_v10, %v23_v9  ;;  %v28_v13 = vld [vmem:[%s352_s0 + $0x68] sm:$0xff]  ;;  %197 = vmatpush.bf16.msra.mxu2 %v41_v3  ;;  %198 = vmatpush.bf16.msra.mxu3 %v41_v3  ;;  %v25_v19 = vld [vmem:[%s352_s0 + $0x50] sm:$0xff]  ;;  %v34_v24 = vpack.c.bf16 %v22_v18, %v21_v17 }
   0x6   :  { %v37_v14 = vpack.c.bf16 %v28_v13, %v27_v11  ;;  %v26_v20 = vld [vmem:[%s352_s0 + $0x58] sm:$0xff]  ;;  %v29_v21 = vld [vmem:[%s352_s0 + $0x70] sm:$0xff]  ;;  %v285_v27 = vld [vmem:[%s353_s2] ss:$0 sm:$0xff] }
   0x7   :  { %188 = vmatmul.msk.bf16.vlgmr.msra.gmra.mxu0 %vm46_vm0, %v31_v7  ;;  %190 = vmatmul.msk.bf16.vlgmr.msra.gmra.mxu1 %vm46_vm0, %v33_v8  ;;  %v30_v22 = vld [vmem:[%s352_s0 + $0x78] sm:$0xff]  ;;  %v36_v25 = vpack.c.bf16 %v26_v20, %v25_v19 }
   0x8   :  { %192 = vmatmul.msk.bf16.vlgmr.msra.gmra.mxu2 %vm46_vm0, %v35_v12  ;;  %194 = vmatmul.msk.bf16.vlgmr.msra.gmra.mxu3 %vm46_vm0, %v37_v14  ;;  %v38_v26 = vpack.c.bf16 %v30_v22, %v29_v21 }
  0x17   :  { %189 = vmatmul.msk.bf16.gmra.mxu0 %vm46_vm0, %v32_v23  ;;  %191 = vmatmul.msk.bf16.gmra.mxu1 %vm46_vm0, %v34_v24 }
  0x18   :  { %193 = vmatmul.msk.bf16.gmra.mxu2 %vm46_vm0, %v36_v25  ;;  %195 = vmatmul.msk.bf16.gmra.mxu3 %vm46_vm0, %v38_v26 }
  0x84   :  { %v80_v28 = vpop.f32.mrf.mxu0  ;;  %v90_v29 = vpop.f32.mrf.mxu1 }
  0x85   :  { %v81_v30 = vadd.f32 %v285_v27, %v80_v28  ;;  %v91_v31 = vadd.f32 %v285_v27, %v90_v29 }
  0x87   :  { %vm120_vm1 = vcmp.ge.f32.partialorder %v81_v30, 0.0  ;;  %v136_v32 = vmul.f32 0.2, %v81_v30  ;;  %vm124_vm2 = vcmp.ge.f32.partialorder %v91_v31, 0.0  ;;  %v140_v33 = vmul.f32 0.2, %v91_v31 }
  0x89   :  { %v152_v34 = vsel %vm120_vm1, %v81_v30, %v136_v32  ;;  %v156_v35 = vsel %vm124_vm2, %v91_v31, %v140_v33 }
  0x8a   :  { %168 = vst [vmem:[%s354_s3] sm:$0xff] %v152_v34 }
  0x8b   :  { %172 = vst [vmem:[%s354_s3 + $0x20] sm:$0xff] %v156_v35  ;;  %v100_v36 = vpop.f32.mrf.mxu2  ;;  %v110_v37 = vpop.f32.mrf.mxu3 }
  0x8c   :  { %v101_v38 = vadd.f32 %v285_v27, %v100_v36  ;;  %v111_v39 = vadd.f32 %v285_v27, %v110_v37  ;;  %v82_v40 = vpop.f32.mrf.mxu0  ;;  %v92_v41 = vpop.f32.mrf.mxu1 }
  0x8d   :  { %v83_v42 = vadd.f32 %v285_v27, %v82_v40  ;;  %v93_v43 = vadd.f32 %v285_v27, %v92_v41 }
  0x8e   :  { %vm128_vm3 = vcmp.ge.f32.partialorder %v101_v38, 0.0  ;;  %v144_v44 = vmul.f32 0.2, %v101_v38  ;;  %vm132_vm4 = vcmp.ge.f32.partialorder %v111_v39, 0.0  ;;  %v148_v45 = vmul.f32 0.2, %v111_v39 }
  0x8f   :  { %vm121_vm5 = vcmp.ge.f32.partialorder %v83_v42, 0.0  ;;  %v137_v46 = vmul.f32 0.2, %v83_v42  ;;  %vm125_vm6 = vcmp.ge.f32.partialorder %v93_v43, 0.0  ;;  %v141_v47 = vmul.f32 0.2, %v93_v43 }
  0x90   :  { %v160_v48 = vsel %vm128_vm3, %v101_v38, %v144_v44  ;;  %v164_v49 = vsel %vm132_vm4, %v111_v39, %v148_v45 }
  0x91   :  { %176 = vst [vmem:[%s354_s3 + $0x40] sm:$0xff] %v160_v48  ;;  %v153_v50 = vsel %vm121_vm5, %v83_v42, %v137_v46  ;;  %v157_v51 = vsel %vm125_vm6, %v93_v43, %v141_v47 }
  0x92   :  { %180 = vst [vmem:[%s354_s3 + $0x60] sm:$0xff] %v164_v49 }
  0x93   :  { %169 = vst [vmem:[%s354_s3 + $0x8] sm:$0xff] %v153_v50  ;;  %v102_v52 = vpop.f32.mrf.mxu2  ;;  %v112_v53 = vpop.f32.mrf.mxu3 }
  0x94   :  { %173 = vst [vmem:[%s354_s3 + $0x28] sm:$0xff] %v157_v51  ;;  %v103_v54 = vadd.f32 %v285_v27, %v102_v52  ;;  %v113_v55 = vadd.f32 %v285_v27, %v112_v53  ;;  %v85_v56 = vpop.f32.mrf.mxu0  ;;  %v95_v57 = vpop.f32.mrf.mxu1 }
  0x95   :  { %v86_v58 = vadd.f32 %v285_v27, %v85_v56  ;;  %v96_v59 = vadd.f32 %v285_v27, %v95_v57 }
  0x96   :  { %vm129_vm7 = vcmp.ge.f32.partialorder %v103_v54, 0.0  ;;  %v145_v60 = vmul.f32 0.2, %v103_v54  ;;  %vm133_vm8 = vcmp.ge.f32.partialorder %v113_v55, 0.0  ;;  %v149_v61 = vmul.f32 0.2, %v113_v55 }
  0x97   :  { %vm122_vm9 = vcmp.ge.f32.partialorder %v86_v58, 0.0  ;;  %v138_v62 = vmul.f32 0.2, %v86_v58  ;;  %vm126_vm10 = vcmp.ge.f32.partialorder %v96_v59, 0.0  ;;  %v142_v63 = vmul.f32 0.2, %v96_v59 }
  0x98   :  { %v161_v0 = vsel %vm129_vm7, %v103_v54, %v145_v60  ;;  %v165_v1 = vsel %vm133_vm8, %v113_v55, %v149_v61 }
  0x99   :  { %177 = vst [vmem:[%s354_s3 + $0x48] sm:$0xff] %v161_v0  ;;  %v154_v2 = vsel %vm122_vm9, %v86_v58, %v138_v62  ;;  %v158_v3 = vsel %vm126_vm10, %v96_v59, %v142_v63 }
  0x9a   :  { %181 = vst [vmem:[%s354_s3 + $0x68] sm:$0xff] %v165_v1 }
  0x9b   :  { %170 = vst [vmem:[%s354_s3 + $0x10] sm:$0xff] %v154_v2  ;;  %v105_v4 = vpop.f32.mrf.mxu2  ;;  %v115_v5 = vpop.f32.mrf.mxu3 }
  0x9c   :  { %174 = vst [vmem:[%s354_s3 + $0x30] sm:$0xff] %v158_v3  ;;  %v106_v6 = vadd.f32 %v285_v27, %v105_v4  ;;  %v116_v7 = vadd.f32 %v285_v27, %v115_v5  ;;  %v87_v8 = vpop.f32.mrf.mxu0  ;;  %v97_v9 = vpop.f32.mrf.mxu1 }
  0x9d   :  { %v88_v10 = vadd.f32 %v285_v27, %v87_v8  ;;  %v98_v11 = vadd.f32 %v285_v27, %v97_v9 }
  0x9e   :  { %vm130_vm11 = vcmp.ge.f32.partialorder %v106_v6, 0.0  ;;  %v146_v12 = vmul.f32 0.2, %v106_v6  ;;  %vm134_vm12 = vcmp.ge.f32.partialorder %v116_v7, 0.0  ;;  %v150_v13 = vmul.f32 0.2, %v116_v7 }
  0x9f   :  { %vm123_vm13 = vcmp.ge.f32.partialorder %v88_v10, 0.0  ;;  %v139_v14 = vmul.f32 0.2, %v88_v10  ;;  %vm127_vm14 = vcmp.ge.f32.partialorder %v98_v11, 0.0  ;;  %v143_v15 = vmul.f32 0.2, %v98_v11 }
  0xa0   :  { %v162_v16 = vsel %vm130_vm11, %v106_v6, %v146_v12  ;;  %v166_v17 = vsel %vm134_vm12, %v116_v7, %v150_v13 }
  0xa1   :  { %178 = vst [vmem:[%s354_s3 + $0x50] sm:$0xff] %v162_v16  ;;  %v155_v18 = vsel %vm123_vm13, %v88_v10, %v139_v14  ;;  %v159_v19 = vsel %vm127_vm14, %v98_v11, %v143_v15 }
  0xa2   :  { %182 = vst [vmem:[%s354_s3 + $0x70] sm:$0xff] %v166_v17 }
  0xa3   :  { %171 = vst [vmem:[%s354_s3 + $0x18] sm:$0xff] %v155_v18  ;;  %v107_v20 = vpop.f32.mrf.mxu2  ;;  %v117_v21 = vpop.f32.mrf.mxu3 }
  0xa4   :  { %175 = vst [vmem:[%s354_s3 + $0x38] sm:$0xff] %v159_v19  ;;  %v108_v22 = vadd.f32 %v285_v27, %v107_v20  ;;  %v118_v23 = vadd.f32 %v285_v27, %v117_v21 }
  0xa6   :  { %vm131_vm15 = vcmp.ge.f32.partialorder %v108_v22, 0.0  ;;  %v147_v24 = vmul.f32 0.2, %v108_v22  ;;  %vm135_vm0 = vcmp.ge.f32.partialorder %v118_v23, 0.0  ;;  %v151_v25 = vmul.f32 0.2, %v118_v23 }
  0xa8   :  { %v163_v26 = vsel %vm131_vm15, %v108_v22, %v147_v24  ;;  %v167_v28 = vsel %vm135_vm0, %v118_v23, %v151_v25 }
  0xa9   :  { %179 = vst [vmem:[%s354_s3 + $0x58] sm:$0xff] %v163_v26 }
  0xaa   :  { %183 = vst [vmem:[%s354_s3 + $0x78] sm:$0xff] %v167_v28 }

// kernel: unet_with_attention.6
= control target key start
LH: loop header
LB: loop body
LE: loop exit
PB: predicated region body
PF: predicated region fallthrough
CT: control target
= control target key end

     0   :  { %s946_s1 = inlined_call_operand.vmem [shape: f32[1024,128], index: 1, kind: input, shape index: {}]   ;;  %s947_s0 = inlined_call_operand.vmem [shape: f32[32,1024], index: 0, kind: input, shape index: {}]   ;;  %s948_s2 = inlined_call_operand.vmem [shape: f32[1,128], index: 2, kind: input, shape index: {}]   ;;  %s949_s3 = inlined_call_operand.vmem [shape: f32[32,128], index: 3, kind: output, shape index: {}]  }
   0x1   :  { %v76_v0 = vld [vmem:[%s946_s1 + $0x70] sm:$0xff]  ;;  %v77_v1 = vld [vmem:[%s946_s1 + $0x78] sm:$0xff]  ;;  %v74_v11 = vld [vmem:[%s946_s1 + $0x60] sm:$0xff] }
   0x2   :  { %v92_v2 = vld [vmem:[%s946_s1 + $0xf0] sm:$0xff]  ;;  %v197_v3 = vpack.c.bf16 %v77_v1, %v76_v0  ;;  %v93_v4 = vld [vmem:[%s946_s1 + $0xf8] sm:$0xff]  ;;  %v75_v13 = vld [vmem:[%s946_s1 + $0x68] sm:$0xff] }
   0x3   :  { %v108_v5 = vld [vmem:[%s946_s1 + $0x170] sm:$0xff]  ;;  %v109_v6 = vld [vmem:[%s946_s1 + $0x178] sm:$0xff]  ;;  %v205_v7 = vpack.c.bf16 %v93_v4, %v92_v2  ;;  %v90_v14 = vld [vmem:[%s946_s1 + $0xe0] sm:$0xff]  ;;  %v196_v16 = vpack.c.bf16 %v75_v13, %v74_v11 }
   0x4   :  { %v213_v8 = vpack.c.bf16 %v109_v6, %v108_v5  ;;  %v124_v9 = vld [vmem:[%s946_s1 + $0x1f0] sm:$0xff]  ;;  %v125_v10 = vld [vmem:[%s946_s1 + $0x1f8] sm:$0xff]  ;;  %258 = vmatpush.bf16.msra.mxu0 %v197_v3  ;;  %v91_v15 = vld [vmem:[%s946_s1 + $0xe8] sm:$0xff] }
   0x5   :  { %v221_v12 = vpack.c.bf16 %v125_v10, %v124_v9  ;;  %277 = vmatpush.bf16.msra.mxu1 %v205_v7  ;;  %v204_v17 = vpack.c.bf16 %v91_v15, %v90_v14  ;;  %v106_v18 = vld [vmem:[%s946_s1 + $0x160] sm:$0xff]  ;;  %v107_v19 = vld [vmem:[%s946_s1 + $0x168] sm:$0xff]  ;;  %v72_v23 = vld [vmem:[%s946_s1 + $0x50] sm:$0xff] }
   0x6   :  { %296 = vmatpush.bf16.msra.mxu2 %v213_v8  ;;  %v122_v20 = vld [vmem:[%s946_s1 + $0x1e0] sm:$0xff]  ;;  %v212_v21 = vpack.c.bf16 %v107_v19, %v106_v18  ;;  %v123_v22 = vld [vmem:[%s946_s1 + $0x1e8] sm:$0xff]  ;;  %v73_v24 = vld [vmem:[%s946_s1 + $0x58] sm:$0xff] }
   0x7   :  { %315 = vmatpush.bf16.msra.mxu3 %v221_v12  ;;  %v220_v25 = vpack.c.bf16 %v123_v22, %v122_v20  ;;  %v88_v26 = vld [vmem:[%s946_s1 + $0xd0] sm:$0xff]  ;;  %v89_v27 = vld [vmem:[%s946_s1 + $0xd8] sm:$0xff]  ;;  %v195_v29 = vpack.c.bf16 %v73_v24, %v72_v23  ;;  %v70_v35 = vld [vmem:[%s946_s1 + $0x40] sm:$0xff] }
   0x8   :  { %v104_v28 = vld [vmem:[%s946_s1 + $0x150] sm:$0xff]  ;;  %259 = vmatpush.bf16.msra.mxu0 %v196_v16  ;;  %v105_v30 = vld [vmem:[%s946_s1 + $0x158] sm:$0xff]  ;;  %v203_v33 = vpack.c.bf16 %v89_v27, %v88_v26  ;;  %v71_v36 = vld [vmem:[%s946_s1 + $0x48] sm:$0xff] }
   0x9   :  { %v120_v31 = vld [vmem:[%s946_s1 + $0x1d0] sm:$0xff]  ;;  %v121_v32 = vld [vmem:[%s946_s1 + $0x1d8] sm:$0xff]  ;;  %278 = vmatpush.bf16.msra.mxu1 %v204_v17  ;;  %v211_v34 = vpack.c.bf16 %v105_v30, %v104_v28  ;;  %v86_v37 = vld [vmem:[%s946_s1 + $0xc0] sm:$0xff]  ;;  %v194_v44 = vpack.c.bf16 %v71_v36, %v70_v35 }
   0xa   :  { %297 = vmatpush.bf16.msra.mxu2 %v212_v21  ;;  %v219_v38 = vpack.c.bf16 %v121_v32, %v120_v31  ;;  %v87_v39 = vld [vmem:[%s946_s1 + $0xc8] sm:$0xff]  ;;  %v102_v40 = vld [vmem:[%s946_s1 + $0x140] sm:$0xff]  ;;  %v68_v47 = vld [vmem:[%s946_s1 + $0x30] sm:$0xff] }
   0xb   :  { %316 = vmatpush.bf16.msra.mxu3 %v220_v25  ;;  %v103_v41 = vld [vmem:[%s946_s1 + $0x148] sm:$0xff]  ;;  %v118_v42 = vld [vmem:[%s946_s1 + $0x1c0] sm:$0xff]  ;;  %v202_v45 = vpack.c.bf16 %v87_v39, %v86_v37  ;;  %v69_v48 = vld [vmem:[%s946_s1 + $0x38] sm:$0xff] }
   0xc   :  { %v119_v43 = vld [vmem:[%s946_s1 + $0x1c8] sm:$0xff]  ;;  %260 = vmatpush.bf16.msra.mxu0 %v195_v29  ;;  %v210_v46 = vpack.c.bf16 %v103_v41, %v102_v40  ;;  %v84_v49 = vld [vmem:[%s946_s1 + $0xb0] sm:$0xff]  ;;  %v85_v51 = vld [vmem:[%s946_s1 + $0xb8] sm:$0xff]  ;;  %v193_v56 = vpack.c.bf16 %v69_v48, %v68_v47 }
   0xd   :  { %279 = vmatpush.bf16.msra.mxu1 %v203_v33  ;;  %v218_v50 = vpack.c.bf16 %v119_v43, %v118_v42  ;;  %v100_v52 = vld [vmem:[%s946_s1 + $0x130] sm:$0xff]  ;;  %v101_v53 = vld [vmem:[%s946_s1 + $0x138] sm:$0xff]  ;;  %v201_v57 = vpack.c.bf16 %v85_v51, %v84_v49  ;;  %v66_v59 = vld [vmem:[%s946_s1 + $0x20] sm:$0xff] }
   0xe   :  { %298 = vmatpush.bf16.msra.mxu2 %v211_v34  ;;  %v116_v54 = vld [vmem:[%s946_s1 + $0x1b0] sm:$0xff]  ;;  %v117_v55 = vld [vmem:[%s946_s1 + $0x1b8] sm:$0xff]  ;;  %v209_v58 = vpack.c.bf16 %v101_v53, %v100_v52  ;;  %v67_v60 = vld [vmem:[%s946_s1 + $0x28] sm:$0xff] }
   0xf   :  { %317 = vmatpush.bf16.msra.mxu3 %v219_v38  ;;  %v82_v61 = vld [vmem:[%s946_s1 + $0xa0] sm:$0xff]  ;;  %v217_v62 = vpack.c.bf16 %v117_v55, %v116_v54  ;;  %v83_v63 = vld [vmem:[%s946_s1 + $0xa8] sm:$0xff]  ;;  %v192_v4 = vpack.c.bf16 %v67_v60, %v66_v59  ;;  %v64_v7 = vld [vmem:[%s946_s1 + $0x10] sm:$0xff] }
  0x10   :  { %261 = vmatpush.bf16.msra.mxu0 %v194_v44  ;;  %v98_v0 = vld [vmem:[%s946_s1 + $0x120] sm:$0xff]  ;;  %v99_v1 = vld [vmem:[%s946_s1 + $0x128] sm:$0xff]  ;;  %v200_v5 = vpack.c.bf16 %v83_v63, %v82_v61  ;;  %v65_v8 = vld [vmem:[%s946_s1 + $0x18] sm:$0xff] }
  0x11   :  { %280 = vmatpush.bf16.msra.mxu1 %v202_v45  ;;  %v114_v2 = vld [vmem:[%s946_s1 + $0x1a0] sm:$0xff]  ;;  %v115_v3 = vld [vmem:[%s946_s1 + $0x1a8] sm:$0xff]  ;;  %v208_v6 = vpack.c.bf16 %v99_v1, %v98_v0  ;;  %v80_v9 = vld [vmem:[%s946_s1 + $0x90] sm:$0xff]  ;;  %v191_v17 = vpack.c.bf16 %v65_v8, %v64_v7 }
  0x12   :  { %299 = vmatpush.bf16.msra.mxu2 %v210_v46  ;;  %v216_v10 = vpack.c.bf16 %v115_v3, %v114_v2  ;;  %v81_v11 = vld [vmem:[%s946_s1 + $0x98] sm:$0xff]  ;;  %v96_v12 = vld [vmem:[%s946_s1 + $0x110] sm:$0xff]  ;;  %v62_v16 = vld [vmem:[%s946_s1] sm:$0xff] }
  0x13   :  { %318 = vmatpush.bf16.msra.mxu3 %v218_v50  ;;  %v97_v13 = vld [vmem:[%s946_s1 + $0x118] sm:$0xff]  ;;  %v112_v14 = vld [vmem:[%s946_s1 + $0x190] sm:$0xff]  ;;  %v63_v18 = vld [vmem:[%s946_s1 + $0x8] sm:$0xff]  ;;  %v199_v21 = vpack.c.bf16 %v81_v11, %v80_v9 }
  0x14   :  { %262 = vmatpush.bf16.msra.mxu0 %v193_v56  ;;  %v113_v15 = vld [vmem:[%s946_s1 + $0x198] sm:$0xff]  ;;  %v78_v19 = vld [vmem:[%s946_s1 + $0x80] sm:$0xff]  ;;  %v79_v20 = vld [vmem:[%s946_s1 + $0x88] sm:$0xff]  ;;  %v207_v22 = vpack.c.bf16 %v97_v13, %v96_v12  ;;  %v190_v34 = vpack.c.bf16 %v63_v18, %v62_v16 }
  0x15   :  { %281 = vmatpush.bf16.msra.mxu1 %v201_v57  ;;  %v94_v23 = vld [vmem:[%s946_s1 + $0x100] sm:$0xff]  ;;  %v95_v24 = vld [vmem:[%s946_s1 + $0x108] sm:$0xff]  ;;  %v215_v26 = vpack.c.bf16 %v113_v15, %v112_v14  ;;  %v172_v32 = vld [vmem:[%s946_s1 + $0x370] sm:$0xff]  ;;  %v198_v38 = vpack.c.bf16 %v79_v20, %v78_v19 }
  0x16   :  { %300 = vmatpush.bf16.msra.mxu2 %v209_v58  ;;  %v110_v25 = vld [vmem:[%s946_s1 + $0x180] sm:$0xff]  ;;  %v111_v27 = vld [vmem:[%s946_s1 + $0x188] sm:$0xff]  ;;  %v173_v33 = vld [vmem:[%s946_s1 + $0x378] sm:$0xff]  ;;  %v206_v39 = vpack.c.bf16 %v95_v24, %v94_v23 }
  0x17   :  { %319 = vmatpush.bf16.msra.mxu3 %v217_v62  ;;  %v14_v28 = vld [vmem:[%s947_s0] sm:$0xff]  ;;  %v15_v30 = vld [vmem:[%s947_s0 + $0x8] sm:$0xff]  ;;  %v16_v35 = vld [vmem:[%s947_s0 + $0x10] sm:$0xff]  ;;  %v214_v43 = vpack.c.bf16 %v111_v27, %v110_v25  ;;  %v245_v44 = vpack.c.bf16 %v173_v33, %v172_v32 }
  0x18   :  { %263 = vmatpush.bf16.msra.mxu0 %v192_v4  ;;  %v22_v29 = vld [vmem:[%s947_s0 + $0x40] sm:$0xff]  ;;  %v23_v31 = vld [vmem:[%s947_s0 + $0x48] sm:$0xff]  ;;  %v156_v36 = vld [vmem:[%s946_s1 + $0x2f0] sm:$0xff] }
  0x19   :  { %282 = vmatpush.bf16.msra.mxu1 %v200_v5  ;;  %v157_v37 = vld [vmem:[%s946_s1 + $0x2f8] sm:$0xff]  ;;  %v24_v40 = vld [vmem:[%s947_s0 + $0x50] sm:$0xff]  ;;  %v46_v48 = vpack.c.bf16 %v22_v29, %v14_v28  ;;  %v170_v51 = vld [vmem:[%s946_s1 + $0x360] sm:$0xff]  ;;  %v47_v53 = vpack.c.bf16 %v23_v31, %v15_v30 }
  0x1a   :  { %301 = vmatpush.bf16.msra.mxu2 %v208_v6  ;;  %v17_v41 = vld [vmem:[%s947_s0 + $0x18] sm:$0xff]  ;;  %v140_v45 = vld [vmem:[%s946_s1 + $0x270] sm:$0xff]  ;;  %v237_v49 = vpack.c.bf16 %v157_v37, %v156_v36  ;;  %v171_v52 = vld [vmem:[%s946_s1 + $0x368] sm:$0xff]  ;;  %v48_v54 = vpack.c.bf16 %v24_v40, %v16_v35 }
  0x1b   :  { %320 = vmatpush.bf16.msra.mxu3 %v216_v10  ;;  %v25_v42 = vld [vmem:[%s947_s0 + $0x58] sm:$0xff]  ;;  %v188_v47 = vld [vmem:[%s946_s1 + $0x3f0] sm:$0xff]  ;;  %v154_v55 = vld [vmem:[%s946_s1 + $0x2e0] sm:$0xff]  ;;  %v244_v60 = vpack.c.bf16 %v171_v52, %v170_v51 }
  0x1c   :  { %264 = vmatpush.bf16.msra.mxu0 %v191_v17  ;;  %v141_v46 = vld [vmem:[%s946_s1 + $0x278] sm:$0xff]  ;;  %v155_v56 = vld [vmem:[%s946_s1 + $0x2e8] sm:$0xff]  ;;  %v49_v57 = vpack.c.bf16 %v25_v42, %v17_v41  ;;  %v138_v61 = vld [vmem:[%s946_s1 + $0x260] sm:$0xff] }
  0x1d   :  { %283 = vmatpush.bf16.msra.mxu1 %v199_v21  ;;  %v189_v50 = vld [vmem:[%s946_s1 + $0x3f8] sm:$0xff]  ;;  %v229_v58 = vpack.c.bf16 %v141_v46, %v140_v45  ;;  %v139_v62 = vld [vmem:[%s946_s1 + $0x268] sm:$0xff]  ;;  %v186_v63 = vld [vmem:[%s946_s1 + $0x3e0] sm:$0xff]  ;;  %v236_v0 = vpack.c.bf16 %v155_v56, %v154_v55 }
  0x1e   :  { %302 = vmatpush.bf16.msra.mxu2 %v207_v22  ;;  %v253_v59 = vpack.c.bf16 %v189_v50, %v188_v47  ;;  %v187_v1 = vld [vmem:[%s946_s1 + $0x3e8] sm:$0xff]  ;;  %v168_v2 = vld [vmem:[%s946_s1 + $0x350] sm:$0xff]  ;;  %v169_v3 = vld [vmem:[%s946_s1 + $0x358] sm:$0xff]  ;;  %v228_v6 = vpack.c.bf16 %v139_v62, %v138_v61 }
  0x1f   :  { %321 = vmatpush.bf16.msra.mxu3 %v215_v26  ;;  %v152_v4 = vld [vmem:[%s946_s1 + $0x2d0] sm:$0xff]  ;;  %v153_v5 = vld [vmem:[%s946_s1 + $0x2d8] sm:$0xff]  ;;  %v252_v7 = vpack.c.bf16 %v187_v1, %v186_v63  ;;  %v243_v8 = vpack.c.bf16 %v169_v3, %v168_v2  ;;  %v166_v14 = vld [vmem:[%s946_s1 + $0x340] sm:$0xff] }
  0x20   :  { %265 = vmatpush.bf16.msra.mxu0 %v190_v34  ;;  %v136_v9 = vld [vmem:[%s946_s1 + $0x250] sm:$0xff]  ;;  %v137_v10 = vld [vmem:[%s946_s1 + $0x258] sm:$0xff]  ;;  %v235_v12 = vpack.c.bf16 %v153_v5, %v152_v4  ;;  %v167_v15 = vld [vmem:[%s946_s1 + $0x348] sm:$0xff] }
  0x21   :  { %284 = vmatpush.bf16.msra.mxu1 %v198_v38  ;;  %v184_v11 = vld [vmem:[%s946_s1 + $0x3d0] sm:$0xff]  ;;  %v185_v13 = vld [vmem:[%s946_s1 + $0x3d8] sm:$0xff]  ;;  %v150_v16 = vld [vmem:[%s946_s1 + $0x2c0] sm:$0xff]  ;;  %v227_v18 = vpack.c.bf16 %v137_v10, %v136_v9  ;;  %v242_v23 = vpack.c.bf16 %v167_v15, %v166_v14 }
  0x22   :  { %303 = vmatpush.bf16.msra.mxu2 %v206_v39  ;;  %v151_v17 = vld [vmem:[%s946_s1 + $0x2c8] sm:$0xff]  ;;  %v134_v19 = vld [vmem:[%s946_s1 + $0x240] sm:$0xff]  ;;  %v251_v22 = vpack.c.bf16 %v185_v13, %v184_v11  ;;  %v164_v30 = vld [vmem:[%s946_s1 + $0x330] sm:$0xff] }
  0x23   :  { %322 = vmatpush.bf16.msra.mxu3 %v214_v43  ;;  %266 = vmatmul.bf16.vlgmr.msra.gmra.mxu0 %v46_v48  ;;  %v135_v20 = vld [vmem:[%s946_s1 + $0x248] sm:$0xff]  ;;  %v182_v21 = vld [vmem:[%s946_s1 + $0x3c0] sm:$0xff]  ;;  %v234_v27 = vpack.c.bf16 %v151_v17, %v150_v16  ;;  %v165_v31 = vld [vmem:[%s946_s1 + $0x338] sm:$0xff] }
  0x24   :  { %285 = vmatmul.bf16.vlgmr.msra.gmra.mxu1 %v47_v53  ;;  %334 = vmatpush.bf16.msrb.mxu0 %v229_v58  ;;  %v183_v24 = vld [vmem:[%s946_s1 + $0x3c8] sm:$0xff]  ;;  %v30_v25 = vld [vmem:[%s947_s0 + $0x80] sm:$0xff]  ;;  %v32_v32 = vld [vmem:[%s947_s0 + $0x90] sm:$0xff]  ;;  %v226_v35 = vpack.c.bf16 %v135_v20, %v134_v19  ;;  %v241_v40 = vpack.c.bf16 %v165_v31, %v164_v30 }
  0x25   :  { %353 = vmatpush.bf16.msrb.mxu1 %v237_v49  ;;  %304 = vmatmul.bf16.vlgmr.msra.gmra.mxu2 %v48_v54  ;;  %v38_v26 = vld [vmem:[%s947_s0 + $0xc0] sm:$0xff]  ;;  %v31_v28 = vld [vmem:[%s947_s0 + $0x88] sm:$0xff]  ;;  %v148_v33 = vld [vmem:[%s946_s1 + $0x2b0] sm:$0xff]  ;;  %v250_v39 = vpack.c.bf16 %v183_v24, %v182_v21 }
  0x26   :  { %372 = vmatpush.bf16.msrb.mxu2 %v245_v44  ;;  %323 = vmatmul.bf16.vlgmr.msra.gmra.mxu3 %v49_v57  ;;  %v39_v29 = vld [vmem:[%s947_s0 + $0xc8] sm:$0xff]  ;;  %v149_v34 = vld [vmem:[%s946_s1 + $0x2b8] sm:$0xff]  ;;  %v40_v36 = vld [vmem:[%s947_s0 + $0xd0] sm:$0xff]  ;;  %v54_v44 = vpack.c.bf16 %v38_v26, %v30_v25 }
  0x27   :  { %391 = vmatpush.bf16.msrb.mxu3 %v253_v59  ;;  %v33_v37 = vld [vmem:[%s947_s0 + $0x98] sm:$0xff]  ;;  %v132_v41 = vld [vmem:[%s946_s1 + $0x230] sm:$0xff]  ;;  %v233_v45 = vpack.c.bf16 %v149_v34, %v148_v33  ;;  %v162_v47 = vld [vmem:[%s946_s1 + $0x320] sm:$0xff]  ;;  %v55_v49 = vpack.c.bf16 %v39_v29, %v31_v28  ;;  %v56_v50 = vpack.c.bf16 %v40_v36, %v32_v32 }
  0x28   :  { %335 = vmatpush.bf16.msrb.mxu0 %v228_v6  ;;  %v41_v38 = vld [vmem:[%s947_s0 + $0xd8] sm:$0xff]  ;;  %v180_v43 = vld [vmem:[%s946_s1 + $0x3b0] sm:$0xff]  ;;  %v163_v48 = vld [vmem:[%s946_s1 + $0x328] sm:$0xff] }
  0x29   :  { %354 = vmatpush.bf16.msrb.mxu1 %v236_v0  ;;  %v133_v42 = vld [vmem:[%s946_s1 + $0x238] sm:$0xff]  ;;  %v146_v51 = vld [vmem:[%s946_s1 + $0x2a0] sm:$0xff]  ;;  %v147_v52 = vld [vmem:[%s946_s1 + $0x2a8] sm:$0xff]  ;;  %v57_v53 = vpack.c.bf16 %v41_v38, %v33_v37  ;;  %v240_v56 = vpack.c.bf16 %v163_v48, %v162_v47 }
  0x2a   :  { %373 = vmatpush.bf16.msrb.mxu2 %v244_v60  ;;  %v181_v46 = vld [vmem:[%s946_s1 + $0x3b8] sm:$0xff]  ;;  %v225_v54 = vpack.c.bf16 %v133_v42, %v132_v41  ;;  %v130_v57 = vld [vmem:[%s946_s1 + $0x220] sm:$0xff]  ;;  %v131_v58 = vld [vmem:[%s946_s1 + $0x228] sm:$0xff]  ;;  %v232_v60 = vpack.c.bf16 %v147_v52, %v146_v51 }
  0x2b   :  { %392 = vmatpush.bf16.msrb.mxu3 %v252_v7  ;;  %v249_v55 = vpack.c.bf16 %v181_v46, %v180_v43  ;;  %v178_v59 = vld [vmem:[%s946_s1 + $0x3a0] sm:$0xff]  ;;  %v179_v61 = vld [vmem:[%s946_s1 + $0x3a8] sm:$0xff]  ;;  %v160_v62 = vld [vmem:[%s946_s1 + $0x310] sm:$0xff]  ;;  %v224_v2 = vpack.c.bf16 %v131_v58, %v130_v57 }
  0x2c   :  { %336 = vmatpush.bf16.msrb.mxu0 %v227_v18  ;;  %v161_v63 = vld [vmem:[%s946_s1 + $0x318] sm:$0xff]  ;;  %v144_v0 = vld [vmem:[%s946_s1 + $0x290] sm:$0xff]  ;;  %v248_v4 = vpack.c.bf16 %v179_v61, %v178_v59  ;;  %v158_v10 = vld [vmem:[%s946_s1 + $0x300] sm:$0xff] }
  0x2d   :  { %355 = vmatpush.bf16.msrb.mxu1 %v235_v12  ;;  %v145_v1 = vld [vmem:[%s946_s1 + $0x298] sm:$0xff]  ;;  %v128_v3 = vld [vmem:[%s946_s1 + $0x210] sm:$0xff]  ;;  %v239_v5 = vpack.c.bf16 %v161_v63, %v160_v62  ;;  %v159_v11 = vld [vmem:[%s946_s1 + $0x308] sm:$0xff] }
  0x2e   :  { %374 = vmatpush.bf16.msrb.mxu2 %v243_v8  ;;  %v129_v6 = vld [vmem:[%s946_s1 + $0x218] sm:$0xff]  ;;  %v176_v7 = vld [vmem:[%s946_s1 + $0x390] sm:$0xff]  ;;  %v231_v8 = vpack.c.bf16 %v145_v1, %v144_v0  ;;  %v142_v12 = vld [vmem:[%s946_s1 + $0x280] sm:$0xff]  ;;  %v238_v16 = vpack.c.bf16 %v159_v11, %v158_v10 }
  0x2f   :  { %393 = vmatpush.bf16.msrb.mxu3 %v251_v22  ;;  %v177_v9 = vld [vmem:[%s946_s1 + $0x398] sm:$0xff]  ;;  %v143_v13 = vld [vmem:[%s946_s1 + $0x288] sm:$0xff]  ;;  %v223_v14 = vpack.c.bf16 %v129_v6, %v128_v3  ;;  %v126_v17 = vld [vmem:[%s946_s1 + $0x200] sm:$0xff] }
  0x30   :  { %337 = vmatpush.bf16.msrb.mxu0 %v226_v35  ;;  %v247_v15 = vpack.c.bf16 %v177_v9, %v176_v7  ;;  %v127_v18 = vld [vmem:[%s946_s1 + $0x208] sm:$0xff]  ;;  %v230_v19 = vpack.c.bf16 %v143_v13, %v142_v12  ;;  %v174_v20 = vld [vmem:[%s946_s1 + $0x380] sm:$0xff]  ;;  %v28_v29 = vld [vmem:[%s947_s0 + $0x70] sm:$0xff] }
  0x31   :  { %356 = vmatpush.bf16.msrb.mxu1 %v234_v27  ;;  %v175_v21 = vld [vmem:[%s946_s1 + $0x388] sm:$0xff]  ;;  %v18_v22 = vld [vmem:[%s947_s0 + $0x20] sm:$0xff]  ;;  %v222_v24 = vpack.c.bf16 %v127_v18, %v126_v17  ;;  %v20_v27 = vld [vmem:[%s947_s0 + $0x30] sm:$0xff] }
  0x32   :  { %375 = vmatpush.bf16.msrb.mxu2 %v242_v23  ;;  %v26_v23 = vld [vmem:[%s947_s0 + $0x60] sm:$0xff]  ;;  %v19_v25 = vld [vmem:[%s947_s0 + $0x28] sm:$0xff]  ;;  %v246_v28 = vpack.c.bf16 %v175_v21, %v174_v20  ;;  %v21_v30 = vld [vmem:[%s947_s0 + $0x38] sm:$0xff]  ;;  %v52_v34 = vpack.c.bf16 %v28_v29, %v20_v27 }
  0x33   :  { %394 = vmatpush.bf16.msrb.mxu3 %v250_v39  ;;  %271 = vmatmul.bf16.gmra.mxu0 %v54_v44  ;;  %v27_v26 = vld [vmem:[%s947_s0 + $0x68] sm:$0xff]  ;;  %v29_v31 = vld [vmem:[%s947_s0 + $0x78] sm:$0xff]  ;;  %v50_v32 = vpack.c.bf16 %v26_v23, %v18_v22  ;;  %v34_v36 = vld [vmem:[%s947_s0 + $0xa0] sm:$0xff] }
  0x34   :  { %290 = vmatmul.bf16.gmra.mxu1 %v55_v49  ;;  %338 = vmatpush.bf16.msrb.mxu0 %v225_v54  ;;  %v51_v33 = vpack.c.bf16 %v27_v26, %v19_v25  ;;  %v53_v35 = vpack.c.bf16 %v29_v31, %v21_v30  ;;  %v42_v37 = vld [vmem:[%s947_s0 + $0xe0] sm:$0xff]  ;;  %v35_v38 = vld [vmem:[%s947_s0 + $0xa8] sm:$0xff]  ;;  %v44_v41 = vld [vmem:[%s947_s0 + $0xf0] sm:$0xff] }
  0x35   :  { %357 = vmatpush.bf16.msrb.mxu1 %v233_v45  ;;  %309 = vmatmul.bf16.gmra.mxu2 %v56_v50  ;;  %v43_v39 = vld [vmem:[%s947_s0 + $0xe8] sm:$0xff]  ;;  %v37_v42 = vld [vmem:[%s947_s0 + $0xb8] sm:$0xff]  ;;  %v58_v44 = vpack.c.bf16 %v42_v37, %v34_v36  ;;  %v430_v57 = vld [vmem:[%s948_s2] ss:$0 sm:$0xff] }
  0x36   :  { %376 = vmatpush.bf16.msrb.mxu2 %v241_v40  ;;  %328 = vmatmul.bf16.gmra.mxu3 %v57_v53  ;;  %v36_v40 = vld [vmem:[%s947_s0 + $0xb0] sm:$0xff]  ;;  %v45_v43 = vld [vmem:[%s947_s0 + $0xf8] sm:$0xff]  ;;  %v59_v45 = vpack.c.bf16 %v43_v39, %v35_v38 }
  0x37   :  { %395 = vmatpush.bf16.msrb.mxu3 %v249_v55  ;;  %v60_v46 = vpack.c.bf16 %v44_v41, %v36_v40  ;;  %v61_v47 = vpack.c.bf16 %v45_v43, %v37_v42 }
  0x38   :  { %339 = vmatpush.bf16.msrb.mxu0 %v224_v2 }
  0x39   :  { %358 = vmatpush.bf16.msrb.mxu1 %v232_v60 }
  0x3a   :  { %377 = vmatpush.bf16.msrb.mxu2 %v240_v56 }
  0x3b   :  { %396 = vmatpush.bf16.msrb.mxu3 %v248_v4 }
  0x3c   :  { %340 = vmatpush.bf16.msrb.mxu0 %v223_v14 }
  0x3d   :  { %359 = vmatpush.bf16.msrb.mxu1 %v231_v8 }
  0x3e   :  { %378 = vmatpush.bf16.msrb.mxu2 %v239_v5 }
  0x3f   :  { %397 = vmatpush.bf16.msrb.mxu3 %v247_v15 }
  0x40   :  { %341 = vmatpush.bf16.msrb.mxu0 %v222_v24 }
  0x41   :  { %360 = vmatpush.bf16.msrb.mxu1 %v230_v19 }
  0x42   :  { %379 = vmatpush.bf16.msrb.mxu2 %v238_v16 }
  0x43   :  { %398 = vmatpush.bf16.msrb.mxu3 %v246_v28  ;;  %342 = vmatmul.bf16.vlgmr.msrb.gmra.mxu0 %v50_v32 }
  0x44   :  { %361 = vmatmul.bf16.vlgmr.msrb.gmra.mxu1 %v51_v33 }
  0x45   :  { %380 = vmatmul.bf16.vlgmr.msrb.gmra.mxu2 %v52_v34 }
  0x46   :  { %399 = vmatmul.bf16.vlgmr.msrb.gmra.mxu3 %v53_v35 }
  0x53   :  { %347 = vmatmul.bf16.gmra.mxu0 %v58_v44 }
  0x54   :  { %366 = vmatmul.bf16.gmra.mxu1 %v59_v45 }
  0x55   :  { %385 = vmatmul.bf16.gmra.mxu2 %v60_v46 }
  0x56   :  { %404 = vmatmul.bf16.gmra.mxu3 %v61_v47 }
  0xa0   :  { %v267_v48 = vpop.f32.mrf.mxu0 }
  0xa1   :  { %v286_v49 = vpop.f32.mrf.mxu1  ;;  %v268_v59 = vadd.f32 %v430_v57, %v267_v48 }
  0xa3   :  { %v287_v63 = vadd.f32 %v286_v49, %v268_v59 }
  0xa8   :  { %v305_v50 = vpop.f32.mrf.mxu2  ;;  %v269_v52 = vpop.f32.mrf.mxu0 }
  0xa9   :  { %v324_v51 = vpop.f32.mrf.mxu3  ;;  %v288_v53 = vpop.f32.mrf.mxu1  ;;  %v306_v1 = vadd.f32 %v305_v50, %v287_v63  ;;  %v270_v2 = vadd.f32 %v430_v57, %v269_v52 }
  0xab   :  { %v325_v5 = vadd.f32 %v324_v51, %v306_v1  ;;  %v289_v8 = vadd.f32 %v288_v53, %v270_v2 }
  0xb0   :  { %v307_v54 = vpop.f32.mrf.mxu2  ;;  %v272_v56 = vpop.f32.mrf.mxu0 }
  0xb1   :  { %v326_v55 = vpop.f32.mrf.mxu3  ;;  %v291_v58 = vpop.f32.mrf.mxu1  ;;  %v308_v10 = vadd.f32 %v307_v54, %v289_v8  ;;  %v273_v11 = vadd.f32 %v430_v57, %v272_v56 }
  0xb3   :  { %v327_v15 = vadd.f32 %v326_v55, %v308_v10  ;;  %v292_v16 = vadd.f32 %v291_v58, %v273_v11 }
  0xb8   :  { %v310_v60 = vpop.f32.mrf.mxu2  ;;  %v274_v62 = vpop.f32.mrf.mxu0 }
  0xb9   :  { %v329_v61 = vpop.f32.mrf.mxu3  ;;  %v293_v0 = vpop.f32.mrf.mxu1  ;;  %v311_v22 = vadd.f32 %v310_v60, %v292_v16  ;;  %v275_v24 = vadd.f32 %v430_v57, %v274_v62 }
  0xbb   :  { %v330_v29 = vadd.f32 %v329_v61, %v311_v22  ;;  %v294_v32 = vadd.f32 %v293_v0, %v275_v24 }
  0xc0   :  { %v312_v3 = vpop.f32.mrf.mxu2  ;;  %v343_v6 = vpop.f32.mrf.mxu0 }
  0xc1   :  { %v331_v4 = vpop.f32.mrf.mxu3  ;;  %v362_v7 = vpop.f32.mrf.mxu1  ;;  %v344_v9 = vadd.f32 %v343_v6, %v325_v5  ;;  %v313_v36 = vadd.f32 %v312_v3, %v294_v32 }
  0xc3   :  { %v363_v12 = vadd.f32 %v362_v7, %v344_v9  ;;  %v332_v42 = vadd.f32 %v331_v4, %v313_v36 }
  0xc8   :  { %v381_v13 = vpop.f32.mrf.mxu2  ;;  %v345_v18 = vpop.f32.mrf.mxu0 }
  0xc9   :  { %v400_v14 = vpop.f32.mrf.mxu3  ;;  %v382_v17 = vadd.f32 %v381_v13, %v363_v12  ;;  %v364_v19 = vpop.f32.mrf.mxu1  ;;  %v346_v21 = vadd.f32 %v345_v18, %v327_v15 }
  0xcb   :  { %v401_v20 = vadd.f32 %v400_v14, %v382_v17  ;;  %v365_v26 = vadd.f32 %v364_v19, %v346_v21 }
  0xcd   :  { %vm410_vm0 = vcmp.ge.f32.partialorder %v401_v20, 0.0  ;;  %v414_v23 = vmul.f32 0.2, %v401_v20 }
  0xcf   :  { %v418_v25 = vsel %vm410_vm0, %v401_v20, %v414_v23 }
  0xd0   :  { %422 = vst [vmem:[%s949_s3] sm:$0xff] %v418_v25  ;;  %v383_v27 = vpop.f32.mrf.mxu2  ;;  %v348_v31 = vpop.f32.mrf.mxu0 }
  0xd1   :  { %v402_v28 = vpop.f32.mrf.mxu3  ;;  %v384_v30 = vadd.f32 %v383_v27, %v365_v26  ;;  %v349_v34 = vadd.f32 %v348_v31, %v330_v29  ;;  %v367_v35 = vpop.f32.mrf.mxu1 }
  0xd3   :  { %v403_v33 = vadd.f32 %v402_v28, %v384_v30  ;;  %v368_v39 = vadd.f32 %v367_v35, %v349_v34 }
  0xd5   :  { %vm411_vm1 = vcmp.ge.f32.partialorder %v403_v33, 0.0  ;;  %v415_v37 = vmul.f32 0.2, %v403_v33 }
  0xd7   :  { %v419_v38 = vsel %vm411_vm1, %v403_v33, %v415_v37 }
  0xd8   :  { %423 = vst [vmem:[%s949_s3 + $0x8] sm:$0xff] %v419_v38  ;;  %v386_v40 = vpop.f32.mrf.mxu2  ;;  %v350_v44 = vpop.f32.mrf.mxu0 }
  0xd9   :  { %v405_v41 = vpop.f32.mrf.mxu3  ;;  %v387_v43 = vadd.f32 %v386_v40, %v368_v39  ;;  %v351_v46 = vadd.f32 %v350_v44, %v332_v42  ;;  %v369_v48 = vpop.f32.mrf.mxu1 }
  0xdb   :  { %v406_v45 = vadd.f32 %v405_v41, %v387_v43  ;;  %v370_v50 = vadd.f32 %v369_v48, %v351_v46 }
  0xdd   :  { %vm412_vm2 = vcmp.ge.f32.partialorder %v406_v45, 0.0  ;;  %v416_v47 = vmul.f32 0.2, %v406_v45 }
  0xdf   :  { %v420_v49 = vsel %vm412_vm2, %v406_v45, %v416_v47 }
  0xe0   :  { %424 = vst [vmem:[%s949_s3 + $0x10] sm:$0xff] %v420_v49  ;;  %v388_v51 = vpop.f32.mrf.mxu2 }
  0xe1   :  { %v389_v52 = vadd.f32 %v388_v51, %v370_v50  ;;  %v407_v53 = vpop.f32.mrf.mxu3 }
  0xe3   :  { %v408_v54 = vadd.f32 %v407_v53, %v389_v52 }
  0xe5   :  { %vm413_vm3 = vcmp.ge.f32.partialorder %v408_v54, 0.0  ;;  %v417_v55 = vmul.f32 0.2, %v408_v54 }
  0xe7   :  { %v421_v56 = vsel %vm413_vm3, %v408_v54, %v417_v55 }
  0xe8   :  { %425 = vst [vmem:[%s949_s3 + $0x18] sm:$0xff] %v421_v56 }

// kernel: unet_with_attention.7
= control target key start
LH: loop header
LB: loop body
LE: loop exit
PB: predicated region body
PF: predicated region fallthrough
CT: control target
= control target key end

     0   :  { %s539_s17 = smov 0   ;;  %s737_s0 = inlined_call_operand.<no memory space> [shape: f32[1], index: 0, kind: input, shape index: {}]   ;;  %s738_s1 = inlined_call_operand.vmem [shape: f32[2,16,128], index: 1, kind: input, shape index: {}]   ;;  %s739_s2 = inlined_call_operand.vmem [shape: f32[128,384], index: 2, kind: input, shape index: {}]   ;;  %s740_s3 = inlined_call_operand.vmem [shape: f32[1,384], index: 3, kind: input, shape index: {}]   ;;  %s741_s4 = inlined_call_operand.vmem [shape: f32[2,16,128], index: 4, kind: output, shape index: {}]  }
   0x1   :  { %9 = sst [smem:[#allocation2]] %s737_s0 }
   0x2 LB: > { %s473_s18 = sadd.s32 4294967295, %s509_s17   ;;  %p477_p0 = scmp.ge.s32.totalorder %s509_s17, 1  ;;  %s509_s17 = sphi %s539_s17, %s15_s17  }
   0x3   : > { %p163_p1 = scmp.lt.s32.totalorder %s509_s17, 3 }
   0x5   : > { %p164_p2 = pnand %p477_p0, %p163_p1 }
   0x6   : > { %p189_p3 = scmp.lt.s32.totalorder (!%p164_p2), %s473_s18, 1  ;;  %s410_s21 = sld [smem:[#allocation2]] (!%p164_p2) }
   0x7   : > { %167 = sbr.rel (%p164_p2) target bundleno = 746 (0x2ea), region = 36 }
   0xc   : > { %v247_v0 = vld [vmem:[%s739_s2 + $0x160] sm:$0xff]  ;;  %v250_v1 = vld [vmem:[%s739_s2 + $0x178] sm:$0xff]  ;;  %v241_v2 = vld [vmem:[%s739_s2 + $0x130] sm:$0xff]  ;;  %s743_s18 = smov (!%p189_p3, %s473_s18), 1  ;;  %vm355_vm0 = vcmask 130048  }
   0xd   : > { %v274_v3 = vpack.c.bf16 %v250_v1, %v247_v0  ;;  %v244_v4 = vld [vmem:[%s739_s2 + $0x148] sm:$0xff]  ;;  %v246_v5 = vld [vmem:[%s739_s2 + $0x158] sm:$0xff]  ;;  %v249_v6 = vld [vmem:[%s739_s2 + $0x170] sm:$0xff]  ;;  %s485_s24 = sshll.u32 %s743_s18, 4 }
   0xe   : > { %v273_v7 = vpack.c.bf16 %v249_v6, %v246_v5  ;;  %v240_v8 = vld [vmem:[%s739_s2 + $0x128] sm:$0xff]  ;;  %v271_v9 = vpack.c.bf16 %v244_v4, %v241_v2  ;;  %v243_v10 = vld [vmem:[%s739_s2 + $0x140] sm:$0xff]  ;;  %v238_v12 = vld [vmem:[%s739_s2 + $0x118] sm:$0xff]  ;;  %s193_s5 = scalar_lea.vmem %s738_s1, %s485_s24  ;;  %s198_s25 = scalar_lea.vmem %s741_s4, %s485_s24 }
   0xf   : > { %311 = vmatpush.bf16.msra.mxu2 %v274_v3  ;;  %v235_v11 = vld [vmem:[%s739_s2 + $0x100] sm:$0xff]  ;;  %v270_v13 = vpack.c.bf16 %v243_v10, %v240_v8  ;;  %v234_v14 = vld [vmem:[%s739_s2 + $0xf8] sm:$0xff]  ;;  %v237_v15 = vld [vmem:[%s739_s2 + $0x110] sm:$0xff] }
  0x10   : > { %297 = vmatpush.bf16.msra.mxu1 %v273_v7  ;;  %v268_v16 = vpack.c.bf16 %v238_v12, %v235_v11  ;;  %v229_v17 = vld [vmem:[%s739_s2 + $0xd0] sm:$0xff]  ;;  %v232_v18 = vld [vmem:[%s739_s2 + $0xe8] sm:$0xff]  ;;  %v267_v19 = vpack.c.bf16 %v237_v15, %v234_v14  ;;  %v231_v21 = vld [vmem:[%s739_s2 + $0xe0] sm:$0xff] }
  0x11   : > { %v228_v20 = vld [vmem:[%s739_s2 + $0xc8] sm:$0xff]  ;;  %v265_v22 = vpack.c.bf16 %v232_v18, %v229_v17  ;;  %v223_v23 = vld [vmem:[%s739_s2 + $0xa0] sm:$0xff]  ;;  %v226_v24 = vld [vmem:[%s739_s2 + $0xb8] sm:$0xff] }
  0x12   : > { %v264_v25 = vpack.c.bf16 %v231_v21, %v228_v20  ;;  %v222_v26 = vld [vmem:[%s739_s2 + $0x98] sm:$0xff]  ;;  %v225_v27 = vld [vmem:[%s739_s2 + $0xb0] sm:$0xff]  ;;  %v262_v28 = vpack.c.bf16 %v226_v24, %v223_v23  ;;  %v220_v30 = vld [vmem:[%s739_s2 + $0x88] sm:$0xff] }
  0x13   : > { %312 = vmatpush.bf16.msra.mxu2 %v271_v9  ;;  %v217_v29 = vld [vmem:[%s739_s2 + $0x70] sm:$0xff]  ;;  %v261_v31 = vpack.c.bf16 %v225_v27, %v222_v26  ;;  %v216_v32 = vld [vmem:[%s739_s2 + $0x68] sm:$0xff]  ;;  %v219_v33 = vld [vmem:[%s739_s2 + $0x80] sm:$0xff] }
  0x14   : > { %298 = vmatpush.bf16.msra.mxu1 %v270_v13  ;;  %v259_v34 = vpack.c.bf16 %v220_v30, %v217_v29  ;;  %v211_v35 = vld [vmem:[%s739_s2 + $0x40] sm:$0xff]  ;;  %v214_v36 = vld [vmem:[%s739_s2 + $0x58] sm:$0xff]  ;;  %v258_v37 = vpack.c.bf16 %v219_v33, %v216_v32  ;;  %v213_v39 = vld [vmem:[%s739_s2 + $0x50] sm:$0xff] }
  0x15   : > { %v210_v38 = vld [vmem:[%s739_s2 + $0x38] sm:$0xff]  ;;  %v256_v40 = vpack.c.bf16 %v214_v36, %v211_v35  ;;  %v205_v41 = vld [vmem:[%s739_s2 + $0x10] sm:$0xff]  ;;  %v208_v42 = vld [vmem:[%s739_s2 + $0x28] sm:$0xff] }
  0x16   : > { %v255_v43 = vpack.c.bf16 %v213_v39, %v210_v38  ;;  %v204_v44 = vld [vmem:[%s739_s2 + $0x8] sm:$0xff]  ;;  %v207_v45 = vld [vmem:[%s739_s2 + $0x20] sm:$0xff]  ;;  %v253_v46 = vpack.c.bf16 %v208_v42, %v205_v41  ;;  %v245_v8 = vld [vmem:[%s739_s2 + $0x150] sm:$0xff] }
  0x17   : > { %313 = vmatpush.bf16.msra.mxu2 %v268_v16  ;;  %v655_v47 = vld [vmem:[%s193_s5] sm:$0xff]  ;;  %v657_v48 = vld [vmem:[%s193_s5 + $0x8] sm:$0xff]  ;;  %v252_v49 = vpack.c.bf16 %v207_v45, %v204_v44  ;;  %v242_v12 = vld [vmem:[%s739_s2 + $0x138] sm:$0xff] }
  0x18   : > { %299 = vmatpush.bf16.msra.mxu1 %v267_v19  ;;  %v661_v50 = vpack.c.bf16 %v657_v48, %v655_v47  ;;  %v668_v52 = vld [vmem:[%s740_s3] sm:$0x7]  ;;  %v248_v9 = vld [vmem:[%s739_s2 + $0x168] sm:$0xff]  ;;  %v233_v14 = vld [vmem:[%s739_s2 + $0xf0] sm:$0xff] }
  0x19   : > { %v279_v54 = vperm.slane %v668_v52, 2  ;;  %v278_v56 = vperm.slane %v668_v52, 1  ;;  %v239_v10 = vld [vmem:[%s739_s2 + $0x120] sm:$0xff]  ;;  %v272_v11 = vpack.c.bf16 %v248_v9, %v245_v8  ;;  %v236_v15 = vld [vmem:[%s739_s2 + $0x108] sm:$0xff]  ;;  %v230_v18 = vld [vmem:[%s739_s2 + $0xd8] sm:$0xff] }
  0x1a   : > { %v269_v13 = vpack.c.bf16 %v242_v12, %v239_v10  ;;  %v266_v16 = vpack.c.bf16 %v236_v15, %v233_v14  ;;  %v227_v17 = vld [vmem:[%s739_s2 + $0xc0] sm:$0xff]  ;;  %v221_v20 = vld [vmem:[%s739_s2 + $0x90] sm:$0xff]  ;;  %v224_v21 = vld [vmem:[%s739_s2 + $0xa8] sm:$0xff] }
  0x1b   : > { %314 = vmatpush.bf16.msra.mxu2 %v265_v22  ;;  %283 = vmatpush.bf16.msra.mxu0 %v272_v11  ;;  %v263_v19 = vpack.c.bf16 %v230_v18, %v227_v17  ;;  %v260_v22 = vpack.c.bf16 %v224_v21, %v221_v20  ;;  %v215_v23 = vld [vmem:[%s739_s2 + $0x60] sm:$0xff]  ;;  %v218_v24 = vld [vmem:[%s739_s2 + $0x78] sm:$0xff]  ;;  %v209_v26 = vld [vmem:[%s739_s2 + $0x30] sm:$0xff] }
  0x1c   : > { %300 = vmatpush.bf16.msra.mxu1 %v264_v25  ;;  %v257_v25 = vpack.c.bf16 %v218_v24, %v215_v23  ;;  %v212_v27 = vld [vmem:[%s739_s2 + $0x48] sm:$0xff]  ;;  %v206_v32 = vld [vmem:[%s739_s2 + $0x18] sm:$0xff] }
  0x1d   : > { %v254_v30 = vpack.c.bf16 %v212_v27, %v209_v26 }
  0x1f   : > { %315 = vmatpush.bf16.msra.mxu2 %v262_v28  ;;  %284 = vmatpush.bf16.msra.mxu0 %v269_v13 }
  0x20   : > { %301 = vmatpush.bf16.msra.mxu1 %v261_v31  ;;  %v203_v31 = vld [vmem:[%s739_s2] sm:$0xff] }
  0x21   : > { %v251_v33 = vpack.c.bf16 %v206_v32, %v203_v31 }
  0x23   : > { %316 = vmatpush.bf16.msra.mxu2 %v259_v34  ;;  %285 = vmatpush.bf16.msra.mxu0 %v266_v16 }
  0x24   : > { %302 = vmatpush.bf16.msra.mxu1 %v258_v37 }
  0x27   : > { %317 = vmatpush.bf16.msra.mxu2 %v256_v40  ;;  %286 = vmatpush.bf16.msra.mxu0 %v263_v19 }
  0x28   : > { %303 = vmatpush.bf16.msra.mxu1 %v255_v43 }
  0x2b   : > { %318 = vmatpush.bf16.msra.mxu2 %v253_v46  ;;  %287 = vmatpush.bf16.msra.mxu0 %v260_v22 }
  0x2c   : > { %304 = vmatpush.bf16.msra.mxu1 %v252_v49  ;;  %v277_v49 = vperm.slane %v668_v52, 0 }
  0x2e   : > { %319 = vmatmul.bf16.vlgmr.msra.gmra.mxu2 %v661_v50 }
  0x2f   : > { %305 = vmatmul.bf16.vlgmr.msra.gmra.mxu1 %v661_v50  ;;  %288 = vmatpush.bf16.msra.mxu0 %v257_v25 }
  0x33   : > { %289 = vmatpush.bf16.msra.mxu0 %v254_v30 }
  0x37   : > { %290 = vmatpush.bf16.msra.mxu0 %v251_v33 }
  0x3a   : > { %291 = vmatmul.bf16.vlgmr.msra.gmra.mxu0 %v661_v50 }
  0xac   : > { %v306_v51 = vpop.f32.mrf.mxu1 }
  0xad   : > { %v307_v61 = vadd.f32 %v306_v51, %v278_v56 }
  0xaf   : > { %v325_v2 = vpack.c.bf16 %v307_v61, %v307_v61 }
  0xb1   : > { %v320_v53 = vpop.f32.mrf.mxu2  ;;  %v331_v5 = vunpack.c.l.b16 %v325_v2 }
  0xb2   : > { %v321_v55 = vadd.f32 %v320_v53, %v279_v54 }
  0xb4   : > { %v308_v57 = vpop.f32.mrf.mxu1  ;;  %v327_v59 = vpack.c.bf16 %v321_v55, %v321_v55 }
  0xb5   : > { %v309_v62 = vadd.f32 %v308_v57, %v278_v56 }
  0xb6   : > { %v337_v0 = vunpack.c.l.b16 %v327_v59 }
  0xb7   : > { %v326_v3 = vpack.c.bf16 %v309_v62, %v309_v62  ;;  %v292_v46 = vpop.f32.mrf.mxu0 }
  0xb8   : > { %v293_v51 = vadd.f32 %v292_v46, %v277_v49 }
  0xb9   : > { %v322_v58 = vpop.f32.mrf.mxu2  ;;  %v332_v6 = vunpack.c.l.b16 %v326_v3 }
  0xba   : > { %v323_v60 = vadd.f32 %v322_v58, %v279_v54  ;;  %v380_v54 = vpack.c.bf16 %v293_v51, %v293_v51 }
  0xbb   : > { %v333_v7 = vpack.c.b16 %v332_v6, %v331_v5  ;;  %v411_v5 = vstv %s410_s21 }
  0xbc   : > { %v328_v63 = vpack.c.bf16 %v323_v60, %v323_v60  ;;  %v389_v56 = vunpack.c.l.b16 %v380_v54 }
  0xbe   : > { %v338_v1 = vunpack.c.l.b16 %v328_v63 }
  0xbf   : > { %v294_v50 = vpop.f32.mrf.mxu0 }
  0xc0   : > { %v339_v4 = vpack.c.b16 %v338_v1, %v337_v0  ;;  %v295_v53 = vadd.f32 %v294_v50, %v277_v49 }
  0xc2   : > { %348 = vmatpush.bf16.xpose.msra.mxu3 %v339_v4  ;;  %v381_v55 = vpack.c.bf16 %v295_v53, %v295_v53 }
  0xc4   : > { %v390_v57 = vunpack.c.l.b16 %v381_v55 }
  0xc6   : > { %v391_v58 = vpack.c.b16 %v390_v57, %v389_v56 }
  0xc9   : > { %349 = vmatmul.bf16.vlgmr.msra.gmra.mxu3 %v333_v7 }
  0xca   : > { %403 = vmatpush.bf16.msrb.mxu3 %v391_v58 }
 0x14c   : > { %v350_v28 = vpop.f32.mrf.mxu3 }
 0x14d   : > { %v356_v29 = vsel %vm355_vm0, %v350_v28, -inf }
 0x14e   : > { %357 = vmax.xlane.f32.xlu0 %v356_v29 }
 0x154   : > { %v352_v34 = vpop.f32.mrf.mxu3 }
 0x155   : > { %v359_v35 = vsel %vm355_vm0, %v352_v34, -inf }
 0x156   : > { %360 = vmax.xlane.f32.xlu0 %v359_v35 }
 0x1c1   : > { %v358_v36 = vpop.xlane.xlu0 %357 }
 0x1c2   : > { %v362_v37 = vsub.f32 %v350_v28, %v358_v36 }
 0x1c4   : > { %v364_v38 = vmul.f32 1.442695, %v362_v37 }
 0x1c6   : > { %495 = vpow2.f32 %v364_v38 }
 0x1c9   : > { %v361_v39 = vpop.xlane.xlu0 %360 }
 0x1ca   : > { %v363_v40 = vsub.f32 %v352_v34, %v361_v39 }
 0x1cc   : > { %v496_v41 = vpop.eup %495  ;;  %v366_v42 = vmul.f32 1.442695, %v363_v40 }
 0x1cd   : > { %v368_v43 = vsel %vm355_vm0, %v496_v41, 0.0 }
 0x1ce   : > { %497 = vpow2.f32 %v366_v42  ;;  %369 = vadd.xlane.f32.xlu1 %v368_v43 }
 0x1d4   : > { %v498_v44 = vpop.eup %497 }
 0x1d5   : > { %v371_v45 = vsel %vm355_vm0, %v498_v44, 0.0 }
 0x1d6   : > { %372 = vadd.xlane.f32.xlu1 %v371_v45 }
 0x241   : > { %v370_v59 = vpop.xlane.xlu1 %369 }
 0x242   : > { %499 = vrcp.f32 %v370_v59 }
 0x248   : > { %v500_v61 = vpop.eup %499 }
 0x249   : > { %v373_v60 = vpop.xlane.xlu1 %372  ;;  %v376_v62 = vmul.f32 %v500_v61, %v496_v41 }
 0x24a   : > { %501 = vrcp.f32 %v373_v60 }
 0x24b   : > { %v378_v0 = vpack.c.bf16 %v376_v62, %v376_v62 }
 0x24d   : > { %v384_v2 = vunpack.c.l.b16 %v378_v0 }
 0x250   : > { %v502_v63 = vpop.eup %501 }
 0x251   : > { %v377_v1 = vmul.f32 %v502_v63, %v498_v44 }
 0x253   : > { %v379_v52 = vpack.c.bf16 %v377_v1, %v377_v1 }
 0x255   : > { %v385_v3 = vunpack.c.l.b16 %v379_v52 }
 0x257   : > { %v386_v4 = vpack.c.b16 %v385_v3, %v384_v2 }
 0x259   : > { %482 = vmatmul.msk.bf16.vlgmr.msrb.gmra.mxu3 %vm355_vm0, %v386_v4 }
 0x2dc   : > { %v405_v6 = vpop.f32.mrf.mxu3 }
 0x2dd   : > { %v412_v7 = vmul.f32 %v411_v5, %v405_v6 }
 0x2df   : > { %v414_v8 = vadd.f32 %v412_v7, %v655_v47 }
 0x2e1   : > { %416 = vst [vmem:[%s198_s25] sm:$0xff] %v414_v8 }
 0x2e4   : > { %v407_v9 = vpop.f32.mrf.mxu3 }
 0x2e5   : > { %v413_v10 = vmul.f32 %v411_v5, %v407_v9 }
 0x2e7   : > { %v415_v11 = vadd.f32 %v413_v10, %v657_v48 }
 0x2e9   : > { %417 = vst [vmem:[%s198_s25 + $0x8] sm:$0xff] %v415_v11 }
 0x2ea PF: > { %s15_s17 = sadd.s32 1, %s509_s17  }
 0x2eb   : > { %p12_p4 = scmp.ge.s32.totalorder %s15_s17, 4  }
 0x2ed   :  { %14 = sbr.rel (!%p12_p4) target bundleno = 2 (0x2), region = 66 }

// kernel: unet_with_attention.8
= control target key start
LH: loop header
LB: loop body
LE: loop exit
PB: predicated region body
PF: predicated region fallthrough
CT: control target
= control target key end

     0   :  { %s3376_s1 = inlined_call_operand.vmem [shape: f32[2048,128], index: 1, kind: input, shape index: {}]   ;;  %s3377_s0 = inlined_call_operand.vmem [shape: f32[128,2048], index: 0, kind: input, shape index: {}]   ;;  %s3378_s2 = inlined_call_operand.vmem [shape: f32[1,128], index: 2, kind: input, shape index: {}]   ;;  %s3379_s3 = inlined_call_operand.vmem [shape: f32[128,128], index: 3, kind: output, shape index: {}]  }
   0x1   :  { %v412_v0 = vld [vmem:[%s3376_s1 + $0x70] sm:$0xff]  ;;  %v413_v1 = vld [vmem:[%s3376_s1 + $0x78] sm:$0xff]  ;;  %v410_v11 = vld [vmem:[%s3376_s1 + $0x60] sm:$0xff] }
   0x2   :  { %v428_v2 = vld [vmem:[%s3376_s1 + $0xf0] sm:$0xff]  ;;  %v661_v3 = vpack.c.bf16 %v413_v1, %v412_v0  ;;  %v429_v4 = vld [vmem:[%s3376_s1 + $0xf8] sm:$0xff]  ;;  %v411_v13 = vld [vmem:[%s3376_s1 + $0x68] sm:$0xff] }
   0x3   :  { %v444_v5 = vld [vmem:[%s3376_s1 + $0x170] sm:$0xff]  ;;  %v445_v6 = vld [vmem:[%s3376_s1 + $0x178] sm:$0xff]  ;;  %v669_v7 = vpack.c.bf16 %v429_v4, %v428_v2  ;;  %v426_v14 = vld [vmem:[%s3376_s1 + $0xe0] sm:$0xff]  ;;  %v660_v16 = vpack.c.bf16 %v411_v13, %v410_v11 }
   0x4   :  { %v677_v8 = vpack.c.bf16 %v445_v6, %v444_v5  ;;  %v460_v9 = vld [vmem:[%s3376_s1 + $0x1f0] sm:$0xff]  ;;  %v461_v10 = vld [vmem:[%s3376_s1 + $0x1f8] sm:$0xff]  ;;  %786 = vmatpush.bf16.msra.mxu0 %v661_v3  ;;  %v427_v15 = vld [vmem:[%s3376_s1 + $0xe8] sm:$0xff] }
   0x5   :  { %v685_v12 = vpack.c.bf16 %v461_v10, %v460_v9  ;;  %835 = vmatpush.bf16.msra.mxu1 %v669_v7  ;;  %v668_v17 = vpack.c.bf16 %v427_v15, %v426_v14  ;;  %v442_v18 = vld [vmem:[%s3376_s1 + $0x160] sm:$0xff]  ;;  %v443_v19 = vld [vmem:[%s3376_s1 + $0x168] sm:$0xff]  ;;  %v408_v23 = vld [vmem:[%s3376_s1 + $0x50] sm:$0xff] }
   0x6   :  { %884 = vmatpush.bf16.msra.mxu2 %v677_v8  ;;  %v458_v20 = vld [vmem:[%s3376_s1 + $0x1e0] sm:$0xff]  ;;  %v676_v21 = vpack.c.bf16 %v443_v19, %v442_v18  ;;  %v459_v22 = vld [vmem:[%s3376_s1 + $0x1e8] sm:$0xff]  ;;  %v409_v24 = vld [vmem:[%s3376_s1 + $0x58] sm:$0xff] }
   0x7   :  { %933 = vmatpush.bf16.msra.mxu3 %v685_v12  ;;  %v684_v25 = vpack.c.bf16 %v459_v22, %v458_v20  ;;  %v424_v26 = vld [vmem:[%s3376_s1 + $0xd0] sm:$0xff]  ;;  %v425_v27 = vld [vmem:[%s3376_s1 + $0xd8] sm:$0xff]  ;;  %v659_v29 = vpack.c.bf16 %v409_v24, %v408_v23  ;;  %v406_v35 = vld [vmem:[%s3376_s1 + $0x40] sm:$0xff] }
   0x8   :  { %v440_v28 = vld [vmem:[%s3376_s1 + $0x150] sm:$0xff]  ;;  %787 = vmatpush.bf16.msra.mxu0 %v660_v16  ;;  %v441_v30 = vld [vmem:[%s3376_s1 + $0x158] sm:$0xff]  ;;  %v667_v33 = vpack.c.bf16 %v425_v27, %v424_v26  ;;  %v407_v36 = vld [vmem:[%s3376_s1 + $0x48] sm:$0xff] }
   0x9   :  { %v456_v31 = vld [vmem:[%s3376_s1 + $0x1d0] sm:$0xff]  ;;  %v457_v32 = vld [vmem:[%s3376_s1 + $0x1d8] sm:$0xff]  ;;  %836 = vmatpush.bf16.msra.mxu1 %v668_v17  ;;  %v675_v34 = vpack.c.bf16 %v441_v30, %v440_v28  ;;  %v422_v37 = vld [vmem:[%s3376_s1 + $0xc0] sm:$0xff]  ;;  %v658_v44 = vpack.c.bf16 %v407_v36, %v406_v35 }
   0xa   :  { %885 = vmatpush.bf16.msra.mxu2 %v676_v21  ;;  %v683_v38 = vpack.c.bf16 %v457_v32, %v456_v31  ;;  %v423_v39 = vld [vmem:[%s3376_s1 + $0xc8] sm:$0xff]  ;;  %v438_v40 = vld [vmem:[%s3376_s1 + $0x140] sm:$0xff]  ;;  %v404_v47 = vld [vmem:[%s3376_s1 + $0x30] sm:$0xff] }
   0xb   :  { %934 = vmatpush.bf16.msra.mxu3 %v684_v25  ;;  %v439_v41 = vld [vmem:[%s3376_s1 + $0x148] sm:$0xff]  ;;  %v454_v42 = vld [vmem:[%s3376_s1 + $0x1c0] sm:$0xff]  ;;  %v666_v45 = vpack.c.bf16 %v423_v39, %v422_v37  ;;  %v405_v48 = vld [vmem:[%s3376_s1 + $0x38] sm:$0xff] }
   0xc   :  { %v455_v43 = vld [vmem:[%s3376_s1 + $0x1c8] sm:$0xff]  ;;  %788 = vmatpush.bf16.msra.mxu0 %v659_v29  ;;  %v674_v46 = vpack.c.bf16 %v439_v41, %v438_v40  ;;  %v420_v49 = vld [vmem:[%s3376_s1 + $0xb0] sm:$0xff]  ;;  %v421_v51 = vld [vmem:[%s3376_s1 + $0xb8] sm:$0xff]  ;;  %v657_v56 = vpack.c.bf16 %v405_v48, %v404_v47 }
   0xd   :  { %837 = vmatpush.bf16.msra.mxu1 %v667_v33  ;;  %v682_v50 = vpack.c.bf16 %v455_v43, %v454_v42  ;;  %v436_v52 = vld [vmem:[%s3376_s1 + $0x130] sm:$0xff]  ;;  %v437_v53 = vld [vmem:[%s3376_s1 + $0x138] sm:$0xff]  ;;  %v665_v57 = vpack.c.bf16 %v421_v51, %v420_v49  ;;  %v402_v59 = vld [vmem:[%s3376_s1 + $0x20] sm:$0xff] }
   0xe   :  { %886 = vmatpush.bf16.msra.mxu2 %v675_v34  ;;  %v452_v54 = vld [vmem:[%s3376_s1 + $0x1b0] sm:$0xff]  ;;  %v453_v55 = vld [vmem:[%s3376_s1 + $0x1b8] sm:$0xff]  ;;  %v673_v58 = vpack.c.bf16 %v437_v53, %v436_v52  ;;  %v403_v60 = vld [vmem:[%s3376_s1 + $0x28] sm:$0xff] }
   0xf   :  { %935 = vmatpush.bf16.msra.mxu3 %v683_v38  ;;  %v418_v61 = vld [vmem:[%s3376_s1 + $0xa0] sm:$0xff]  ;;  %v681_v62 = vpack.c.bf16 %v453_v55, %v452_v54  ;;  %v419_v63 = vld [vmem:[%s3376_s1 + $0xa8] sm:$0xff]  ;;  %v656_v4 = vpack.c.bf16 %v403_v60, %v402_v59  ;;  %v400_v7 = vld [vmem:[%s3376_s1 + $0x10] sm:$0xff] }
  0x10   :  { %789 = vmatpush.bf16.msra.mxu0 %v658_v44  ;;  %v434_v0 = vld [vmem:[%s3376_s1 + $0x120] sm:$0xff]  ;;  %v435_v1 = vld [vmem:[%s3376_s1 + $0x128] sm:$0xff]  ;;  %v664_v5 = vpack.c.bf16 %v419_v63, %v418_v61  ;;  %v401_v8 = vld [vmem:[%s3376_s1 + $0x18] sm:$0xff] }
  0x11   :  { %838 = vmatpush.bf16.msra.mxu1 %v666_v45  ;;  %v450_v2 = vld [vmem:[%s3376_s1 + $0x1a0] sm:$0xff]  ;;  %v451_v3 = vld [vmem:[%s3376_s1 + $0x1a8] sm:$0xff]  ;;  %v672_v6 = vpack.c.bf16 %v435_v1, %v434_v0  ;;  %v416_v9 = vld [vmem:[%s3376_s1 + $0x90] sm:$0xff]  ;;  %v655_v17 = vpack.c.bf16 %v401_v8, %v400_v7 }
  0x12   :  { %887 = vmatpush.bf16.msra.mxu2 %v674_v46  ;;  %v680_v10 = vpack.c.bf16 %v451_v3, %v450_v2  ;;  %v417_v11 = vld [vmem:[%s3376_s1 + $0x98] sm:$0xff]  ;;  %v432_v12 = vld [vmem:[%s3376_s1 + $0x110] sm:$0xff]  ;;  %v398_v16 = vld [vmem:[%s3376_s1] sm:$0xff] }
  0x13   :  { %936 = vmatpush.bf16.msra.mxu3 %v682_v50  ;;  %v433_v13 = vld [vmem:[%s3376_s1 + $0x118] sm:$0xff]  ;;  %v448_v14 = vld [vmem:[%s3376_s1 + $0x190] sm:$0xff]  ;;  %v399_v18 = vld [vmem:[%s3376_s1 + $0x8] sm:$0xff]  ;;  %v663_v21 = vpack.c.bf16 %v417_v11, %v416_v9 }
  0x14   :  { %790 = vmatpush.bf16.msra.mxu0 %v657_v56  ;;  %v449_v15 = vld [vmem:[%s3376_s1 + $0x198] sm:$0xff]  ;;  %v414_v19 = vld [vmem:[%s3376_s1 + $0x80] sm:$0xff]  ;;  %v415_v20 = vld [vmem:[%s3376_s1 + $0x88] sm:$0xff]  ;;  %v671_v22 = vpack.c.bf16 %v433_v13, %v432_v12  ;;  %v654_v34 = vpack.c.bf16 %v399_v18, %v398_v16 }
  0x15   :  { %839 = vmatpush.bf16.msra.mxu1 %v665_v57  ;;  %v430_v23 = vld [vmem:[%s3376_s1 + $0x100] sm:$0xff]  ;;  %v431_v24 = vld [vmem:[%s3376_s1 + $0x108] sm:$0xff]  ;;  %v679_v26 = vpack.c.bf16 %v449_v15, %v448_v14  ;;  %v508_v32 = vld [vmem:[%s3376_s1 + $0x370] sm:$0xff]  ;;  %v662_v38 = vpack.c.bf16 %v415_v20, %v414_v19 }
  0x16   :  { %888 = vmatpush.bf16.msra.mxu2 %v673_v58  ;;  %v446_v25 = vld [vmem:[%s3376_s1 + $0x180] sm:$0xff]  ;;  %v447_v27 = vld [vmem:[%s3376_s1 + $0x188] sm:$0xff]  ;;  %v509_v33 = vld [vmem:[%s3376_s1 + $0x378] sm:$0xff]  ;;  %v670_v39 = vpack.c.bf16 %v431_v24, %v430_v23 }
  0x17   :  { %937 = vmatpush.bf16.msra.mxu3 %v681_v62  ;;  %v14_v28 = vld [vmem:[%s3377_s0] sm:$0xff]  ;;  %v15_v30 = vld [vmem:[%s3377_s0 + $0x8] sm:$0xff]  ;;  %v16_v35 = vld [vmem:[%s3377_s0 + $0x10] sm:$0xff]  ;;  %v678_v43 = vpack.c.bf16 %v447_v27, %v446_v25  ;;  %v709_v44 = vpack.c.bf16 %v509_v33, %v508_v32 }
  0x18   :  { %791 = vmatpush.bf16.msra.mxu0 %v656_v4  ;;  %v30_v29 = vld [vmem:[%s3377_s0 + $0x80] sm:$0xff]  ;;  %v31_v31 = vld [vmem:[%s3377_s0 + $0x88] sm:$0xff]  ;;  %v524_v36 = vld [vmem:[%s3376_s1 + $0x3f0] sm:$0xff] }
  0x19   :  { %840 = vmatpush.bf16.msra.mxu1 %v664_v5  ;;  %v525_v37 = vld [vmem:[%s3376_s1 + $0x3f8] sm:$0xff]  ;;  %v32_v40 = vld [vmem:[%s3377_s0 + $0x90] sm:$0xff]  ;;  %v270_v48 = vpack.c.bf16 %v30_v29, %v14_v28  ;;  %v506_v51 = vld [vmem:[%s3376_s1 + $0x360] sm:$0xff]  ;;  %v271_v53 = vpack.c.bf16 %v31_v31, %v15_v30 }
  0x1a   :  { %889 = vmatpush.bf16.msra.mxu2 %v672_v6  ;;  %v17_v41 = vld [vmem:[%s3377_s0 + $0x18] sm:$0xff]  ;;  %v476_v45 = vld [vmem:[%s3376_s1 + $0x270] sm:$0xff]  ;;  %v717_v49 = vpack.c.bf16 %v525_v37, %v524_v36  ;;  %v507_v52 = vld [vmem:[%s3376_s1 + $0x368] sm:$0xff]  ;;  %v272_v54 = vpack.c.bf16 %v32_v40, %v16_v35 }
  0x1b   :  { %938 = vmatpush.bf16.msra.mxu3 %v680_v10  ;;  %v33_v42 = vld [vmem:[%s3377_s0 + $0x98] sm:$0xff]  ;;  %v492_v47 = vld [vmem:[%s3376_s1 + $0x2f0] sm:$0xff]  ;;  %v522_v55 = vld [vmem:[%s3376_s1 + $0x3e0] sm:$0xff]  ;;  %v708_v60 = vpack.c.bf16 %v507_v52, %v506_v51 }
  0x1c   :  { %792 = vmatpush.bf16.msra.mxu0 %v655_v17  ;;  %v477_v46 = vld [vmem:[%s3376_s1 + $0x278] sm:$0xff]  ;;  %v523_v56 = vld [vmem:[%s3376_s1 + $0x3e8] sm:$0xff]  ;;  %v273_v57 = vpack.c.bf16 %v33_v42, %v17_v41  ;;  %v474_v61 = vld [vmem:[%s3376_s1 + $0x260] sm:$0xff] }
  0x1d   :  { %841 = vmatpush.bf16.msra.mxu1 %v663_v21  ;;  %v493_v50 = vld [vmem:[%s3376_s1 + $0x2f8] sm:$0xff]  ;;  %v693_v58 = vpack.c.bf16 %v477_v46, %v476_v45  ;;  %v475_v62 = vld [vmem:[%s3376_s1 + $0x268] sm:$0xff]  ;;  %v716_v63 = vpack.c.bf16 %v523_v56, %v522_v55  ;;  %v490_v0 = vld [vmem:[%s3376_s1 + $0x2e0] sm:$0xff] }
  0x1e   :  { %890 = vmatpush.bf16.msra.mxu2 %v671_v22  ;;  %v701_v59 = vpack.c.bf16 %v493_v50, %v492_v47  ;;  %v491_v1 = vld [vmem:[%s3376_s1 + $0x2e8] sm:$0xff]  ;;  %v692_v2 = vpack.c.bf16 %v475_v62, %v474_v61  ;;  %v504_v3 = vld [vmem:[%s3376_s1 + $0x350] sm:$0xff]  ;;  %v505_v4 = vld [vmem:[%s3376_s1 + $0x358] sm:$0xff] }
  0x1f   :  { %939 = vmatpush.bf16.msra.mxu3 %v679_v26  ;;  %v472_v5 = vld [vmem:[%s3376_s1 + $0x250] sm:$0xff]  ;;  %v700_v6 = vpack.c.bf16 %v491_v1, %v490_v0  ;;  %v707_v7 = vpack.c.bf16 %v505_v4, %v504_v3  ;;  %v473_v8 = vld [vmem:[%s3376_s1 + $0x258] sm:$0xff]  ;;  %v46_v16 = vld [vmem:[%s3377_s0 + $0x100] sm:$0xff] }
  0x20   :  { %793 = vmatpush.bf16.msra.mxu0 %v654_v34  ;;  %v520_v9 = vld [vmem:[%s3376_s1 + $0x3d0] sm:$0xff]  ;;  %v521_v10 = vld [vmem:[%s3376_s1 + $0x3d8] sm:$0xff]  ;;  %v691_v14 = vpack.c.bf16 %v473_v8, %v472_v5  ;;  %v62_v17 = vld [vmem:[%s3377_s0 + $0x180] sm:$0xff] }
  0x21   :  { %842 = vmatpush.bf16.msra.mxu1 %v662_v38  ;;  %v715_v11 = vpack.c.bf16 %v521_v10, %v520_v9  ;;  %v488_v12 = vld [vmem:[%s3376_s1 + $0x2d0] sm:$0xff]  ;;  %v489_v13 = vld [vmem:[%s3376_s1 + $0x2d8] sm:$0xff]  ;;  %v47_v18 = vld [vmem:[%s3377_s0 + $0x108] sm:$0xff]  ;;  %v286_v24 = vpack.c.bf16 %v62_v17, %v46_v16 }
  0x22   :  { %891 = vmatpush.bf16.msra.mxu2 %v670_v39  ;;  %v699_v15 = vpack.c.bf16 %v489_v13, %v488_v12  ;;  %v63_v19 = vld [vmem:[%s3377_s0 + $0x188] sm:$0xff]  ;;  %v48_v20 = vld [vmem:[%s3377_s0 + $0x110] sm:$0xff]  ;;  %v49_v22 = vld [vmem:[%s3377_s0 + $0x118] sm:$0xff] }
  0x23   :  { %940 = vmatpush.bf16.msra.mxu3 %v678_v43  ;;  %794 = vmatmul.bf16.vlgmr.msra.gmra.mxu0 %v270_v48  ;;  %v64_v21 = vld [vmem:[%s3377_s0 + $0x190] sm:$0xff]  ;;  %v65_v23 = vld [vmem:[%s3377_s0 + $0x198] sm:$0xff]  ;;  %v287_v25 = vpack.c.bf16 %v63_v19, %v47_v18  ;;  %v502_v28 = vld [vmem:[%s3376_s1 + $0x340] sm:$0xff] }
  0x24   :  { %843 = vmatmul.bf16.vlgmr.msra.gmra.mxu1 %v271_v53  ;;  %982 = vmatpush.bf16.msrb.mxu0 %v693_v58  ;;  %v288_v26 = vpack.c.bf16 %v64_v21, %v48_v20  ;;  %v289_v27 = vpack.c.bf16 %v65_v23, %v49_v22  ;;  %v503_v29 = vld [vmem:[%s3376_s1 + $0x348] sm:$0xff]  ;;  %v470_v30 = vld [vmem:[%s3376_s1 + $0x240] sm:$0xff]  ;;  %v96_v45 = vld [vmem:[%s3377_s0 + $0x290] sm:$0xff] }
  0x25   :  { %892 = vmatmul.bf16.vlgmr.msra.gmra.mxu2 %v272_v54  ;;  %1031 = vmatpush.bf16.msrb.mxu1 %v701_v59  ;;  %v706_v31 = vpack.c.bf16 %v503_v29, %v502_v28  ;;  %v471_v32 = vld [vmem:[%s3376_s1 + $0x248] sm:$0xff]  ;;  %v518_v33 = vld [vmem:[%s3376_s1 + $0x3c0] sm:$0xff]  ;;  %v81_v46 = vld [vmem:[%s3377_s0 + $0x218] sm:$0xff] }
  0x26   :  { %1080 = vmatpush.bf16.msrb.mxu2 %v709_v44  ;;  %941 = vmatmul.bf16.vlgmr.msra.gmra.mxu3 %v273_v57  ;;  %v519_v34 = vld [vmem:[%s3376_s1 + $0x3c8] sm:$0xff]  ;;  %v690_v35 = vpack.c.bf16 %v471_v32, %v470_v30  ;;  %v486_v37 = vld [vmem:[%s3376_s1 + $0x2c0] sm:$0xff]  ;;  %v80_v44 = vld [vmem:[%s3377_s0 + $0x210] sm:$0xff] }
  0x27   :  { %1129 = vmatpush.bf16.msrb.mxu3 %v717_v49  ;;  %v714_v36 = vpack.c.bf16 %v519_v34, %v518_v33  ;;  %v487_v38 = vld [vmem:[%s3376_s1 + $0x2c8] sm:$0xff]  ;;  %v78_v40 = vld [vmem:[%s3377_s0 + $0x200] sm:$0xff]  ;;  %v97_v47 = vld [vmem:[%s3377_s0 + $0x298] sm:$0xff]  ;;  %v304_v50 = vpack.c.bf16 %v96_v45, %v80_v44 }
  0x28   :  { %983 = vmatpush.bf16.msrb.mxu0 %v692_v2  ;;  %v698_v39 = vpack.c.bf16 %v487_v38, %v486_v37  ;;  %v94_v41 = vld [vmem:[%s3377_s0 + $0x280] sm:$0xff]  ;;  %v79_v42 = vld [vmem:[%s3377_s0 + $0x208] sm:$0xff]  ;;  %v305_v51 = vpack.c.bf16 %v97_v47, %v81_v46  ;;  %v500_v52 = vld [vmem:[%s3376_s1 + $0x330] sm:$0xff] }
  0x29   :  { %1032 = vmatpush.bf16.msrb.mxu1 %v700_v6  ;;  %v95_v43 = vld [vmem:[%s3377_s0 + $0x288] sm:$0xff]  ;;  %v302_v48 = vpack.c.bf16 %v94_v41, %v78_v40  ;;  %v501_v53 = vld [vmem:[%s3376_s1 + $0x338] sm:$0xff]  ;;  %v468_v54 = vld [vmem:[%s3376_s1 + $0x230] sm:$0xff] }
  0x2a   :  { %1081 = vmatpush.bf16.msrb.mxu2 %v708_v60  ;;  %v303_v49 = vpack.c.bf16 %v95_v43, %v79_v42  ;;  %v705_v55 = vpack.c.bf16 %v501_v53, %v500_v52  ;;  %v469_v56 = vld [vmem:[%s3376_s1 + $0x238] sm:$0xff]  ;;  %v516_v57 = vld [vmem:[%s3376_s1 + $0x3b0] sm:$0xff]  ;;  %v110_v0 = vld [vmem:[%s3377_s0 + $0x300] sm:$0xff] }
  0x2b   :  { %1130 = vmatpush.bf16.msrb.mxu3 %v716_v63  ;;  %v517_v58 = vld [vmem:[%s3376_s1 + $0x3b8] sm:$0xff]  ;;  %v689_v59 = vpack.c.bf16 %v469_v56, %v468_v54  ;;  %v484_v61 = vld [vmem:[%s3376_s1 + $0x2b0] sm:$0xff]  ;;  %v126_v1 = vld [vmem:[%s3377_s0 + $0x380] sm:$0xff] }
  0x2c   :  { %984 = vmatpush.bf16.msrb.mxu0 %v691_v14  ;;  %v713_v60 = vpack.c.bf16 %v517_v58, %v516_v57  ;;  %v485_v62 = vld [vmem:[%s3376_s1 + $0x2b8] sm:$0xff]  ;;  %v111_v2 = vld [vmem:[%s3377_s0 + $0x308] sm:$0xff]  ;;  %v112_v4 = vld [vmem:[%s3377_s0 + $0x310] sm:$0xff]  ;;  %v318_v8 = vpack.c.bf16 %v126_v1, %v110_v0 }
  0x2d   :  { %1033 = vmatpush.bf16.msrb.mxu1 %v699_v15  ;;  %v697_v63 = vpack.c.bf16 %v485_v62, %v484_v61  ;;  %v127_v3 = vld [vmem:[%s3377_s0 + $0x388] sm:$0xff]  ;;  %v128_v5 = vld [vmem:[%s3377_s0 + $0x390] sm:$0xff]  ;;  %v113_v6 = vld [vmem:[%s3377_s0 + $0x318] sm:$0xff] }
  0x2e   :  { %1082 = vmatpush.bf16.msrb.mxu2 %v707_v7  ;;  %v129_v7 = vld [vmem:[%s3377_s0 + $0x398] sm:$0xff]  ;;  %v319_v9 = vpack.c.bf16 %v127_v3, %v111_v2  ;;  %v320_v10 = vpack.c.bf16 %v128_v5, %v112_v4  ;;  %v498_v12 = vld [vmem:[%s3376_s1 + $0x320] sm:$0xff]  ;;  %v499_v13 = vld [vmem:[%s3376_s1 + $0x328] sm:$0xff] }
  0x2f   :  { %1131 = vmatpush.bf16.msrb.mxu3 %v715_v11  ;;  %v321_v11 = vpack.c.bf16 %v129_v7, %v113_v6  ;;  %v466_v14 = vld [vmem:[%s3376_s1 + $0x220] sm:$0xff]  ;;  %v704_v15 = vpack.c.bf16 %v499_v13, %v498_v12  ;;  %v467_v16 = vld [vmem:[%s3376_s1 + $0x228] sm:$0xff]  ;;  %v144_v28 = vld [vmem:[%s3377_s0 + $0x410] sm:$0xff] }
  0x30   :  { %985 = vmatpush.bf16.msrb.mxu0 %v690_v35  ;;  %v514_v17 = vld [vmem:[%s3376_s1 + $0x3a0] sm:$0xff]  ;;  %v515_v18 = vld [vmem:[%s3376_s1 + $0x3a8] sm:$0xff]  ;;  %v688_v19 = vpack.c.bf16 %v467_v16, %v466_v14  ;;  %v160_v29 = vld [vmem:[%s3377_s0 + $0x490] sm:$0xff] }
  0x31   :  { %1034 = vmatpush.bf16.msrb.mxu1 %v698_v39  ;;  %v712_v20 = vpack.c.bf16 %v515_v18, %v514_v17  ;;  %v482_v21 = vld [vmem:[%s3376_s1 + $0x2a0] sm:$0xff]  ;;  %v483_v22 = vld [vmem:[%s3376_s1 + $0x2a8] sm:$0xff]  ;;  %v145_v30 = vld [vmem:[%s3377_s0 + $0x418] sm:$0xff]  ;;  %v336_v34 = vpack.c.bf16 %v160_v29, %v144_v28 }
  0x32   :  { %1083 = vmatpush.bf16.msrb.mxu2 %v706_v31  ;;  %v696_v23 = vpack.c.bf16 %v483_v22, %v482_v21  ;;  %v161_v31 = vld [vmem:[%s3377_s0 + $0x498] sm:$0xff]  ;;  %v464_v38 = vld [vmem:[%s3376_s1 + $0x210] sm:$0xff]  ;;  %v495_v61 = vld [vmem:[%s3376_s1 + $0x308] sm:$0xff] }
  0x33   :  { %799 = vmatmul.bf16.gmra.mxu0 %v286_v24  ;;  %1132 = vmatpush.bf16.msrb.mxu3 %v714_v36  ;;  %v142_v24 = vld [vmem:[%s3377_s0 + $0x400] sm:$0xff]  ;;  %v337_v35 = vpack.c.bf16 %v161_v31, %v145_v30  ;;  %v496_v36 = vld [vmem:[%s3376_s1 + $0x310] sm:$0xff]  ;;  %v497_v37 = vld [vmem:[%s3376_s1 + $0x318] sm:$0xff] }
  0x34   :  { %848 = vmatmul.bf16.gmra.mxu1 %v287_v25  ;;  %986 = vmatpush.bf16.msrb.mxu0 %v689_v59  ;;  %v158_v25 = vld [vmem:[%s3377_s0 + $0x480] sm:$0xff]  ;;  %v703_v39 = vpack.c.bf16 %v497_v37, %v496_v36  ;;  %v465_v40 = vld [vmem:[%s3376_s1 + $0x218] sm:$0xff]  ;;  %v512_v41 = vld [vmem:[%s3376_s1 + $0x390] sm:$0xff] }
  0x35   :  { %897 = vmatmul.bf16.gmra.mxu2 %v288_v26  ;;  %1035 = vmatpush.bf16.msrb.mxu1 %v697_v63  ;;  %v143_v26 = vld [vmem:[%s3377_s0 + $0x408] sm:$0xff]  ;;  %v334_v32 = vpack.c.bf16 %v158_v25, %v142_v24  ;;  %v513_v42 = vld [vmem:[%s3376_s1 + $0x398] sm:$0xff]  ;;  %v687_v43 = vpack.c.bf16 %v465_v40, %v464_v38  ;;  %v480_v45 = vld [vmem:[%s3376_s1 + $0x290] sm:$0xff] }
  0x36   :  { %946 = vmatmul.bf16.gmra.mxu3 %v289_v27  ;;  %1084 = vmatpush.bf16.msrb.mxu2 %v705_v55  ;;  %v159_v27 = vld [vmem:[%s3377_s0 + $0x488] sm:$0xff]  ;;  %v711_v44 = vpack.c.bf16 %v513_v42, %v512_v41  ;;  %v481_v46 = vld [vmem:[%s3376_s1 + $0x298] sm:$0xff]  ;;  %v176_v52 = vld [vmem:[%s3377_s0 + $0x510] sm:$0xff] }
  0x37   :  { %1133 = vmatpush.bf16.msrb.mxu3 %v713_v60  ;;  %v335_v33 = vpack.c.bf16 %v159_v27, %v143_v26  ;;  %v695_v47 = vpack.c.bf16 %v481_v46, %v480_v45  ;;  %v192_v53 = vld [vmem:[%s3377_s0 + $0x590] sm:$0xff]  ;;  %v177_v54 = vld [vmem:[%s3377_s0 + $0x518] sm:$0xff]  ;;  %v494_v60 = vld [vmem:[%s3376_s1 + $0x300] sm:$0xff] }
  0x38   :  { %987 = vmatpush.bf16.msrb.mxu0 %v688_v19  ;;  %v193_v55 = vld [vmem:[%s3377_s0 + $0x598] sm:$0xff]  ;;  %v352_v58 = vpack.c.bf16 %v192_v53, %v176_v52  ;;  %v462_v62 = vld [vmem:[%s3376_s1 + $0x200] sm:$0xff]  ;;  %v702_v63 = vpack.c.bf16 %v495_v61, %v494_v60  ;;  %v463_v0 = vld [vmem:[%s3376_s1 + $0x208] sm:$0xff] }
  0x39   :  { %1036 = vmatpush.bf16.msrb.mxu1 %v696_v23  ;;  %v353_v59 = vpack.c.bf16 %v193_v55, %v177_v54  ;;  %v510_v1 = vld [vmem:[%s3376_s1 + $0x380] sm:$0xff]  ;;  %v511_v2 = vld [vmem:[%s3376_s1 + $0x388] sm:$0xff]  ;;  %v686_v3 = vpack.c.bf16 %v463_v0, %v462_v62  ;;  %v208_v12 = vld [vmem:[%s3377_s0 + $0x610] sm:$0xff] }
  0x3a   :  { %1085 = vmatpush.bf16.msrb.mxu2 %v704_v15  ;;  %v710_v4 = vpack.c.bf16 %v511_v2, %v510_v1  ;;  %v478_v5 = vld [vmem:[%s3376_s1 + $0x280] sm:$0xff]  ;;  %v479_v6 = vld [vmem:[%s3376_s1 + $0x288] sm:$0xff]  ;;  %v224_v13 = vld [vmem:[%s3377_s0 + $0x690] sm:$0xff] }
  0x3b   :  { %1134 = vmatpush.bf16.msrb.mxu3 %v712_v20  ;;  %v694_v7 = vpack.c.bf16 %v479_v6, %v478_v5  ;;  %v209_v14 = vld [vmem:[%s3377_s0 + $0x618] sm:$0xff]  ;;  %v368_v18 = vpack.c.bf16 %v224_v13, %v208_v12  ;;  %v572_v20 = vld [vmem:[%s3376_s1 + $0x570] sm:$0xff]  ;;  %v571_v45 = vld [vmem:[%s3376_s1 + $0x568] sm:$0xff] }
  0x3c   :  { %988 = vmatpush.bf16.msrb.mxu0 %v687_v43  ;;  %v225_v15 = vld [vmem:[%s3377_s0 + $0x698] sm:$0xff]  ;;  %v540_v22 = vld [vmem:[%s3376_s1 + $0x470] sm:$0xff]  ;;  %v538_v46 = vld [vmem:[%s3376_s1 + $0x460] sm:$0xff] }
  0x3d   :  { %1037 = vmatpush.bf16.msrb.mxu1 %v695_v47  ;;  %v369_v19 = vpack.c.bf16 %v225_v15, %v209_v14  ;;  %v573_v21 = vld [vmem:[%s3376_s1 + $0x578] sm:$0xff]  ;;  %v588_v25 = vld [vmem:[%s3376_s1 + $0x5f0] sm:$0xff]  ;;  %v554_v53 = vld [vmem:[%s3376_s1 + $0x4e0] sm:$0xff] }
  0x3e   :  { %1086 = vmatpush.bf16.msrb.mxu2 %v703_v39  ;;  %v741_v23 = vpack.c.bf16 %v573_v21, %v572_v20  ;;  %v541_v24 = vld [vmem:[%s3376_s1 + $0x478] sm:$0xff]  ;;  %v556_v29 = vld [vmem:[%s3376_s1 + $0x4f0] sm:$0xff]  ;;  %v555_v54 = vld [vmem:[%s3376_s1 + $0x4e8] sm:$0xff] }
  0x3f   :  { %1135 = vmatpush.bf16.msrb.mxu3 %v711_v44  ;;  %v589_v26 = vld [vmem:[%s3376_s1 + $0x5f8] sm:$0xff]  ;;  %v725_v27 = vpack.c.bf16 %v541_v24, %v540_v22  ;;  %v240_v36 = vld [vmem:[%s3377_s0 + $0x710] sm:$0xff]  ;;  %v570_v44 = vld [vmem:[%s3376_s1 + $0x560] sm:$0xff] }
  0x40   :  { %989 = vmatpush.bf16.msrb.mxu0 %v686_v3  ;;  %v749_v28 = vpack.c.bf16 %v589_v26, %v588_v25  ;;  %v557_v30 = vld [vmem:[%s3376_s1 + $0x4f8] sm:$0xff]  ;;  %v256_v37 = vld [vmem:[%s3377_s0 + $0x790] sm:$0xff]  ;;  %v740_v47 = vpack.c.bf16 %v571_v45, %v570_v44  ;;  %v2254_v55 = vld [vmem:[%s3378_s2] ss:$0 sm:$0xff] }
  0x41   :  { %1038 = vmatpush.bf16.msrb.mxu1 %v694_v7  ;;  %v733_v31 = vpack.c.bf16 %v557_v30, %v556_v29  ;;  %v241_v38 = vld [vmem:[%s3377_s0 + $0x718] sm:$0xff]  ;;  %v384_v42 = vpack.c.bf16 %v256_v37, %v240_v36  ;;  %v35_v60 = vld [vmem:[%s3377_s0 + $0xa8] sm:$0xff]  ;;  %v20_v61 = vld [vmem:[%s3377_s0 + $0x30] sm:$0xff] }
  0x42   :  { %1087 = vmatpush.bf16.msrb.mxu2 %v702_v63  ;;  %v257_v39 = vld [vmem:[%s3377_s0 + $0x798] sm:$0xff]  ;;  %v36_v62 = vld [vmem:[%s3377_s0 + $0xb0] sm:$0xff]  ;;  %v50_v29 = vld [vmem:[%s3377_s0 + $0x120] sm:$0xff] }
  0x43   :  { %804 = vmatmul.bf16.gmra.mxu0 %v302_v48  ;;  %v174_v48 = vld [vmem:[%s3377_s0 + $0x500] sm:$0xff]  ;;  %1136 = vmatpush.bf16.msrb.mxu3 %v710_v4  ;;  %v385_v43 = vpack.c.bf16 %v257_v39, %v241_v38  ;;  %v21_v63 = vld [vmem:[%s3377_s0 + $0x38] sm:$0xff]  ;;  %v276_v4 = vpack.c.bf16 %v36_v62, %v20_v61  ;;  %v584_v14 = vld [vmem:[%s3376_s1 + $0x5d0] sm:$0xff] }
  0x44   :  { %853 = vmatmul.bf16.gmra.mxu1 %v303_v49  ;;  %v190_v49 = vld [vmem:[%s3377_s0 + $0x580] sm:$0xff]  ;;  %1178 = vmatpush.bf16.msra.mxu0 %v725_v27  ;;  %v37_v0 = vld [vmem:[%s3377_s0 + $0xb8] sm:$0xff]  ;;  %v552_v25 = vld [vmem:[%s3376_s1 + $0x4d0] sm:$0xff] }
  0x45   :  { %902 = vmatmul.bf16.gmra.mxu2 %v304_v50  ;;  %v175_v50 = vld [vmem:[%s3377_s0 + $0x508] sm:$0xff]  ;;  %v350_v56 = vpack.c.bf16 %v190_v49, %v174_v48  ;;  %1227 = vmatpush.bf16.msra.mxu1 %v733_v31  ;;  %v586_v49 = vld [vmem:[%s3376_s1 + $0x5e0] sm:$0xff]  ;;  %v277_v7 = vpack.c.bf16 %v37_v0, %v21_v63  ;;  %v537_v13 = vld [vmem:[%s3376_s1 + $0x458] sm:$0xff] }
  0x46   :  { %951 = vmatmul.bf16.gmra.mxu3 %v305_v51  ;;  %v191_v51 = vld [vmem:[%s3377_s0 + $0x588] sm:$0xff]  ;;  %1276 = vmatpush.bf16.msra.mxu2 %v741_v23  ;;  %v585_v15 = vld [vmem:[%s3376_s1 + $0x5d8] sm:$0xff]  ;;  %v66_v30 = vld [vmem:[%s3377_s0 + $0x1a0] sm:$0xff] }
  0x47   :  { %v351_v57 = vpack.c.bf16 %v191_v51, %v175_v50  ;;  %1325 = vmatpush.bf16.msra.mxu3 %v749_v28  ;;  %v539_v48 = vld [vmem:[%s3376_s1 + $0x468] sm:$0xff]  ;;  %v553_v26 = vld [vmem:[%s3376_s1 + $0x4d8] sm:$0xff]  ;;  %v290_v38 = vpack.c.bf16 %v66_v30, %v50_v29  ;;  %v532_v29 = vld [vmem:[%s3376_s1 + $0x430] sm:$0xff] }
  0x48   :  { %v587_v50 = vld [vmem:[%s3376_s1 + $0x5e8] sm:$0xff]  ;;  %v724_v51 = vpack.c.bf16 %v539_v48, %v538_v46  ;;  %v731_v28 = vpack.c.bf16 %v553_v26, %v552_v25  ;;  %v69_v36 = vld [vmem:[%s3377_s0 + $0x1b8] sm:$0xff] }
  0x49   :  { %v748_v52 = vpack.c.bf16 %v587_v50, %v586_v49  ;;  %v51_v31 = vld [vmem:[%s3377_s0 + $0x128] sm:$0xff]  ;;  %v566_v49 = vld [vmem:[%s3376_s1 + $0x540] sm:$0xff] }
  0x4a   :  { %1277 = vmatpush.bf16.msra.mxu2 %v740_v47  ;;  %1179 = vmatpush.bf16.msra.mxu0 %v724_v51  ;;  %v567_v50 = vld [vmem:[%s3376_s1 + $0x548] sm:$0xff]  ;;  %v534_v51 = vld [vmem:[%s3376_s1 + $0x440] sm:$0xff] }
  0x4b   :  { %1326 = vmatpush.bf16.msra.mxu3 %v748_v52  ;;  %v738_v52 = vpack.c.bf16 %v567_v50, %v566_v49  ;;  %v130_v49 = vld [vmem:[%s3377_s0 + $0x3a0] sm:$0xff]  ;;  %v115_v50 = vld [vmem:[%s3377_s0 + $0x328] sm:$0xff] }
  0x53   :  { %809 = vmatmul.bf16.gmra.mxu0 %v318_v8  ;;  %v206_v8 = vld [vmem:[%s3377_s0 + $0x600] sm:$0xff] }
  0x54   :  { %858 = vmatmul.bf16.gmra.mxu1 %v319_v9  ;;  %v222_v9 = vld [vmem:[%s3377_s0 + $0x680] sm:$0xff] }
  0x55   :  { %907 = vmatmul.bf16.gmra.mxu2 %v320_v10  ;;  %v207_v10 = vld [vmem:[%s3377_s0 + $0x608] sm:$0xff]  ;;  %v366_v16 = vpack.c.bf16 %v222_v9, %v206_v8  ;;  %v568_v9 = vld [vmem:[%s3376_s1 + $0x550] sm:$0xff] }
  0x56   :  { %956 = vmatmul.bf16.gmra.mxu3 %v321_v11  ;;  %v223_v11 = vld [vmem:[%s3377_s0 + $0x688] sm:$0xff] }
  0x57   :  { %v367_v17 = vpack.c.bf16 %v223_v11, %v207_v10  ;;  %v569_v10 = vld [vmem:[%s3376_s1 + $0x558] sm:$0xff]  ;;  %v536_v11 = vld [vmem:[%s3376_s1 + $0x450] sm:$0xff] }
  0x58   :  { %v739_v12 = vpack.c.bf16 %v569_v10, %v568_v9  ;;  %v99_v9 = vld [vmem:[%s3377_s0 + $0x2a8] sm:$0xff]  ;;  %v84_v10 = vld [vmem:[%s3377_s0 + $0x230] sm:$0xff] }
  0x5a   :  { %1278 = vmatpush.bf16.msra.mxu2 %v739_v12  ;;  %v85_v12 = vld [vmem:[%s3377_s0 + $0x238] sm:$0xff] }
  0x5e   :  { %1279 = vmatpush.bf16.msra.mxu2 %v738_v52  ;;  %v116_v52 = vld [vmem:[%s3377_s0 + $0x330] sm:$0xff] }
  0x63   :  { %814 = vmatmul.bf16.gmra.mxu0 %v334_v32  ;;  %v238_v32 = vld [vmem:[%s3377_s0 + $0x700] sm:$0xff] }
  0x64   :  { %863 = vmatmul.bf16.gmra.mxu1 %v335_v33  ;;  %v254_v33 = vld [vmem:[%s3377_s0 + $0x780] sm:$0xff] }
  0x65   :  { %912 = vmatmul.bf16.gmra.mxu2 %v336_v34  ;;  %v239_v34 = vld [vmem:[%s3377_s0 + $0x708] sm:$0xff]  ;;  %v382_v40 = vpack.c.bf16 %v254_v33, %v238_v32  ;;  %v52_v33 = vld [vmem:[%s3377_s0 + $0x130] sm:$0xff] }
  0x66   :  { %961 = vmatmul.bf16.gmra.mxu3 %v337_v35  ;;  %v255_v35 = vld [vmem:[%s3377_s0 + $0x788] sm:$0xff] }
  0x67   :  { %v383_v41 = vpack.c.bf16 %v255_v35, %v239_v34  ;;  %v67_v32 = vld [vmem:[%s3377_s0 + $0x1a8] sm:$0xff]  ;;  %v68_v34 = vld [vmem:[%s3377_s0 + $0x1b0] sm:$0xff]  ;;  %v53_v35 = vld [vmem:[%s3377_s0 + $0x138] sm:$0xff] }
  0x68   :  { %v293_v46 = vpack.c.bf16 %v69_v36, %v53_v35 }
  0x73   :  { %819 = vmatmul.bf16.gmra.mxu0 %v350_v56  ;;  %v732_v56 = vpack.c.bf16 %v555_v54, %v554_v53  ;;  %v535_v53 = vld [vmem:[%s3376_s1 + $0x448] sm:$0xff]  ;;  %v582_v54 = vld [vmem:[%s3376_s1 + $0x5c0] sm:$0xff] }
  0x74   :  { %868 = vmatmul.bf16.gmra.mxu1 %v351_v57  ;;  %v18_v57 = vld [vmem:[%s3377_s0 + $0x20] sm:$0xff] }
  0x75   :  { %917 = vmatmul.bf16.gmra.mxu2 %v352_v58  ;;  %v34_v58 = vld [vmem:[%s3377_s0 + $0xa0] sm:$0xff]  ;;  %1228 = vmatpush.bf16.msra.mxu1 %v732_v56  ;;  %v583_v56 = vld [vmem:[%s3376_s1 + $0x5c8] sm:$0xff] }
  0x76   :  { %966 = vmatmul.bf16.gmra.mxu3 %v353_v59  ;;  %v19_v59 = vld [vmem:[%s3377_s0 + $0x28] sm:$0xff]  ;;  %v274_v1 = vpack.c.bf16 %v34_v58, %v18_v57  ;;  %v722_v58 = vpack.c.bf16 %v535_v53, %v534_v51  ;;  %v132_v53 = vld [vmem:[%s3377_s0 + $0x3b0] sm:$0xff] }
  0x77   :  { %v275_v3 = vpack.c.bf16 %v35_v60, %v19_v59  ;;  %v746_v59 = vpack.c.bf16 %v583_v56, %v582_v54  ;;  %v131_v51 = vld [vmem:[%s3377_s0 + $0x3a8] sm:$0xff]  ;;  %v117_v54 = vld [vmem:[%s3377_s0 + $0x338] sm:$0xff] }
  0x78   :  { %v133_v56 = vld [vmem:[%s3377_s0 + $0x3b8] sm:$0xff] }
  0x79   :  { %1229 = vmatpush.bf16.msra.mxu1 %v731_v28  ;;  %v565_v28 = vld [vmem:[%s3376_s1 + $0x538] sm:$0xff] }
  0x83   :  { %824 = vmatmul.bf16.gmra.mxu0 %v366_v16 }
  0x84   :  { %873 = vmatmul.bf16.gmra.mxu1 %v367_v17  ;;  %v723_v17 = vpack.c.bf16 %v537_v13, %v536_v11  ;;  %v100_v11 = vld [vmem:[%s3377_s0 + $0x2b0] sm:$0xff]  ;;  %v101_v13 = vld [vmem:[%s3377_s0 + $0x2b8] sm:$0xff] }
  0x85   :  { %922 = vmatmul.bf16.gmra.mxu2 %v368_v18  ;;  %v747_v18 = vpack.c.bf16 %v585_v15, %v584_v14 }
  0x86   :  { %971 = vmatmul.bf16.gmra.mxu3 %v369_v19  ;;  %1180 = vmatpush.bf16.msra.mxu0 %v723_v17 }
  0x87   :  { %1327 = vmatpush.bf16.msra.mxu3 %v747_v18 }
  0x8a   :  { %1181 = vmatpush.bf16.msra.mxu0 %v722_v58 }
  0x8b   :  { %1328 = vmatpush.bf16.msra.mxu3 %v746_v59 }
  0x93   :  { %829 = vmatmul.bf16.gmra.mxu0 %v382_v40 }
  0x94   :  { %878 = vmatmul.bf16.gmra.mxu1 %v383_v41 }
  0x95   :  { %927 = vmatmul.bf16.gmra.mxu2 %v384_v42  ;;  %v291_v42 = vpack.c.bf16 %v67_v32, %v51_v31  ;;  %v533_v31 = vld [vmem:[%s3376_s1 + $0x438] sm:$0xff]  ;;  %v580_v32 = vld [vmem:[%s3376_s1 + $0x5b0] sm:$0xff] }
  0x96   :  { %976 = vmatmul.bf16.gmra.mxu3 %v385_v43  ;;  %v292_v43 = vpack.c.bf16 %v68_v34, %v52_v33  ;;  %v581_v33 = vld [vmem:[%s3376_s1 + $0x5b8] sm:$0xff]  ;;  %v721_v35 = vpack.c.bf16 %v533_v31, %v532_v29  ;;  %v162_v29 = vld [vmem:[%s3377_s0 + $0x4a0] sm:$0xff]  ;;  %v163_v31 = vld [vmem:[%s3377_s0 + $0x4a8] sm:$0xff] }
  0x97   :  { %v745_v36 = vpack.c.bf16 %v581_v33, %v580_v32  ;;  %v148_v32 = vld [vmem:[%s3377_s0 + $0x430] sm:$0xff] }
  0x98   :  { %1182 = vmatpush.bf16.msra.mxu0 %v721_v35  ;;  %v164_v33 = vld [vmem:[%s3377_s0 + $0x4b0] sm:$0xff]  ;;  %v165_v35 = vld [vmem:[%s3377_s0 + $0x4b8] sm:$0xff] }
  0x99   :  { %1329 = vmatpush.bf16.msra.mxu3 %v745_v36 }
  0xa0   :  { %v795_v2 = vpop.f32.mrf.mxu0 }
  0xa1   :  { %v796_v5 = vadd.f32 %v2254_v55, %v795_v2  ;;  %v844_v6 = vpop.f32.mrf.mxu1  ;;  %v550_v2 = vld [vmem:[%s3376_s1 + $0x4c0] sm:$0xff] }
  0xa3   :  { %v845_v8 = vadd.f32 %v844_v6, %v796_v5  ;;  %990 = vmatmul.bf16.vlgmr.msrb.gmra.mxu0 %v274_v1  ;;  %v82_v6 = vld [vmem:[%s3377_s0 + $0x220] sm:$0xff] }
  0xa4   :  { %1039 = vmatmul.bf16.vlgmr.msrb.gmra.mxu1 %v275_v3  ;;  %v551_v3 = vld [vmem:[%s3376_s1 + $0x4c8] sm:$0xff] }
  0xa5   :  { %1088 = vmatmul.bf16.vlgmr.msrb.gmra.mxu2 %v276_v4  ;;  %v730_v5 = vpack.c.bf16 %v551_v3, %v550_v2  ;;  %v325_v3 = vpack.c.bf16 %v133_v56, %v117_v54  ;;  %v529_v54 = vld [vmem:[%s3376_s1 + $0x418] sm:$0xff]  ;;  %v576_v56 = vld [vmem:[%s3376_s1 + $0x590] sm:$0xff] }
  0xa6   :  { %1137 = vmatmul.bf16.vlgmr.msrb.gmra.mxu3 %v277_v7  ;;  %v98_v7 = vld [vmem:[%s3377_s0 + $0x2a0] sm:$0xff] }
  0xa7   :  { %1230 = vmatpush.bf16.msra.mxu1 %v730_v5  ;;  %v306_v15 = vpack.c.bf16 %v98_v7, %v82_v6  ;;  %v562_v6 = vld [vmem:[%s3376_s1 + $0x520] sm:$0xff]  ;;  %v563_v7 = vld [vmem:[%s3376_s1 + $0x528] sm:$0xff] }
  0xa8   :  { %v893_v16 = vpop.f32.mrf.mxu2  ;;  %v797_v21 = vpop.f32.mrf.mxu0 }
  0xa9   :  { %v894_v19 = vadd.f32 %v893_v16, %v845_v8  ;;  %v942_v20 = vpop.f32.mrf.mxu3  ;;  %v798_v22 = vadd.f32 %v2254_v55, %v797_v21  ;;  %v846_v23 = vpop.f32.mrf.mxu1  ;;  %v83_v8 = vld [vmem:[%s3377_s0 + $0x228] sm:$0xff] }
  0xab   :  { %v2300_v24 = vadd.f32 %v942_v20, %v894_v19  ;;  %v847_v27 = vadd.f32 %v846_v23, %v798_v22  ;;  %v307_v19 = vpack.c.bf16 %v99_v9, %v83_v8  ;;  %v308_v20 = vpack.c.bf16 %v100_v11, %v84_v10  ;;  %v530_v8 = vld [vmem:[%s3376_s1 + $0x420] sm:$0xff]  ;;  %v531_v10 = vld [vmem:[%s3376_s1 + $0x428] sm:$0xff] }
  0xac   :  { %v309_v23 = vpack.c.bf16 %v101_v13, %v85_v12  ;;  %v736_v9 = vpack.c.bf16 %v563_v7, %v562_v6  ;;  %v578_v11 = vld [vmem:[%s3376_s1 + $0x5a0] sm:$0xff]  ;;  %v579_v12 = vld [vmem:[%s3376_s1 + $0x5a8] sm:$0xff]  ;;  %v545_v6 = vld [vmem:[%s3376_s1 + $0x498] sm:$0xff] }
  0xb0   :  { %v895_v37 = vpop.f32.mrf.mxu2  ;;  %v800_v41 = vpop.f32.mrf.mxu0 }
  0xb1   :  { %v896_v39 = vadd.f32 %v895_v37, %v847_v27  ;;  %v944_v40 = vpop.f32.mrf.mxu3  ;;  %v801_v44 = vadd.f32 %v2254_v55, %v800_v41  ;;  %v849_v45 = vpop.f32.mrf.mxu1  ;;  %v564_v27 = vld [vmem:[%s3376_s1 + $0x530] sm:$0xff] }
  0xb2   :  { %v737_v30 = vpack.c.bf16 %v565_v28, %v564_v27  ;;  %v146_v28 = vld [vmem:[%s3377_s0 + $0x420] sm:$0xff] }
  0xb3   :  { %v2333_v47 = vadd.f32 %v944_v40, %v896_v39  ;;  %v850_v48 = vadd.f32 %v849_v45, %v801_v44  ;;  %995 = vmatmul.bf16.gmra.mxu0 %v290_v38  ;;  %v549_v44 = vld [vmem:[%s3376_s1 + $0x4b8] sm:$0xff] }
  0xb4   :  { %1044 = vmatmul.bf16.gmra.mxu1 %v291_v42  ;;  %1280 = vmatpush.bf16.msra.mxu2 %v737_v30  ;;  %v147_v30 = vld [vmem:[%s3377_s0 + $0x428] sm:$0xff] }
  0xb5   :  { %1093 = vmatmul.bf16.gmra.mxu2 %v292_v43  ;;  %v548_v43 = vld [vmem:[%s3376_s1 + $0x4b0] sm:$0xff] }
  0xb6   :  { %1142 = vmatmul.bf16.gmra.mxu3 %v293_v46  ;;  %v729_v46 = vpack.c.bf16 %v549_v44, %v548_v43  ;;  %v340_v43 = vpack.c.bf16 %v164_v33, %v148_v32  ;;  %v558_v32 = vld [vmem:[%s3376_s1 + $0x500] sm:$0xff]  ;;  %v559_v33 = vld [vmem:[%s3376_s1 + $0x508] sm:$0xff] }
  0xb8   :  { %v898_v57 = vpop.f32.mrf.mxu2  ;;  %v802_v62 = vpop.f32.mrf.mxu0  ;;  %1231 = vmatpush.bf16.msra.mxu1 %v729_v46  ;;  %1281 = vmatpush.bf16.msra.mxu2 %v736_v9  ;;  %v178_v9 = vld [vmem:[%s3377_s0 + $0x520] sm:$0xff] }
  0xb9   :  { %v899_v60 = vadd.f32 %v898_v57, %v850_v48  ;;  %v947_v61 = vpop.f32.mrf.mxu3  ;;  %v803_v63 = vadd.f32 %v2254_v55, %v802_v62  ;;  %v851_v0 = vpop.f32.mrf.mxu1  ;;  %v114_v48 = vld [vmem:[%s3377_s0 + $0x320] sm:$0xff]  ;;  %v323_v62 = vpack.c.bf16 %v131_v51, %v115_v50  ;;  %v560_v50 = vld [vmem:[%s3376_s1 + $0x510] sm:$0xff]  ;;  %v561_v51 = vld [vmem:[%s3376_s1 + $0x518] sm:$0xff] }
  0xba   :  { %v322_v58 = vpack.c.bf16 %v130_v49, %v114_v48 }
  0xbb   :  { %v2354_v1 = vadd.f32 %v947_v61, %v899_v60  ;;  %v852_v4 = vadd.f32 %v851_v0, %v803_v63  ;;  %v324_v63 = vpack.c.bf16 %v132_v53, %v116_v52  ;;  %v528_v52 = vld [vmem:[%s3376_s1 + $0x410] sm:$0xff]  ;;  %v735_v53 = vpack.c.bf16 %v561_v51, %v560_v50  ;;  %v542_v51 = vld [vmem:[%s3376_s1 + $0x480] sm:$0xff] }
  0xbd   :  { %1282 = vmatpush.bf16.msra.mxu2 %v735_v53 }
  0xc0   :  { %v900_v14 = vpop.f32.mrf.mxu2  ;;  %v805_v18 = vpop.f32.mrf.mxu0 }
  0xc1   :  { %v901_v16 = vadd.f32 %v900_v14, %v852_v4  ;;  %v949_v17 = vpop.f32.mrf.mxu3  ;;  %v806_v21 = vadd.f32 %v2254_v55, %v805_v18  ;;  %v854_v22 = vpop.f32.mrf.mxu1  ;;  %v720_v14 = vpack.c.bf16 %v531_v10, %v530_v8  ;;  %v194_v10 = vld [vmem:[%s3377_s0 + $0x5a0] sm:$0xff] }
  0xc3   :  { %v2387_v25 = vadd.f32 %v949_v17, %v901_v16  ;;  %v855_v26 = vadd.f32 %v854_v22, %v806_v21  ;;  %1000 = vmatmul.bf16.gmra.mxu0 %v306_v15  ;;  %v744_v15 = vpack.c.bf16 %v579_v12, %v578_v11  ;;  %v546_v22 = vld [vmem:[%s3376_s1 + $0x4a0] sm:$0xff]  ;;  %v179_v11 = vld [vmem:[%s3377_s0 + $0x528] sm:$0xff] }
  0xc4   :  { %1049 = vmatmul.bf16.gmra.mxu1 %v307_v19  ;;  %1183 = vmatpush.bf16.msra.mxu0 %v720_v14  ;;  %v195_v12 = vld [vmem:[%s3377_s0 + $0x5a8] sm:$0xff]  ;;  %v196_v14 = vld [vmem:[%s3377_s0 + $0x5b0] sm:$0xff] }
  0xc5   :  { %1098 = vmatmul.bf16.gmra.mxu2 %v308_v20  ;;  %1330 = vmatpush.bf16.msra.mxu3 %v744_v15  ;;  %v181_v15 = vld [vmem:[%s3377_s0 + $0x538] sm:$0xff] }
  0xc6   :  { %1147 = vmatmul.bf16.gmra.mxu3 %v309_v23  ;;  %v547_v23 = vld [vmem:[%s3376_s1 + $0x4a8] sm:$0xff] }
  0xc7   :  { %v728_v27 = vpack.c.bf16 %v547_v23, %v546_v22  ;;  %v355_v23 = vpack.c.bf16 %v195_v12, %v179_v11 }
  0xc8   :  { %v903_v34 = vpop.f32.mrf.mxu2  ;;  %v807_v39 = vpop.f32.mrf.mxu0 }
  0xc9   :  { %v904_v37 = vadd.f32 %v903_v34, %v855_v26  ;;  %v952_v38 = vpop.f32.mrf.mxu3  ;;  %v808_v40 = vadd.f32 %v2254_v55, %v807_v39  ;;  %v856_v41 = vpop.f32.mrf.mxu1  ;;  %1232 = vmatpush.bf16.msra.mxu1 %v728_v27  ;;  %v149_v34 = vld [vmem:[%s3377_s0 + $0x438] sm:$0xff] }
  0xca   :  { %v341_v46 = vpack.c.bf16 %v165_v35, %v149_v34  ;;  %v526_v34 = vld [vmem:[%s3376_s1 + $0x400] sm:$0xff]  ;;  %v734_v35 = vpack.c.bf16 %v559_v33, %v558_v32 }
  0xcb   :  { %v2408_v42 = vadd.f32 %v952_v38, %v904_v37  ;;  %v857_v45 = vadd.f32 %v856_v41, %v808_v40  ;;  %v338_v37 = vpack.c.bf16 %v162_v29, %v146_v28  ;;  %v339_v41 = vpack.c.bf16 %v163_v31, %v147_v30 }
  0xcc   :  { %1283 = vmatpush.bf16.msra.mxu2 %v734_v35  ;;  %v620_v35 = vld [vmem:[%s3376_s1 + $0x6f0] sm:$0xff] }
  0xd0   :  { %v905_v57 = vpop.f32.mrf.mxu2  ;;  %v810_v61 = vpop.f32.mrf.mxu0 }
  0xd1   :  { %v906_v59 = vadd.f32 %v905_v57, %v857_v45  ;;  %v954_v60 = vpop.f32.mrf.mxu3  ;;  %v811_v0 = vadd.f32 %v2254_v55, %v810_v61  ;;  %v859_v2 = vpop.f32.mrf.mxu1  ;;  %v577_v57 = vld [vmem:[%s3376_s1 + $0x598] sm:$0xff] }
  0xd3   :  { %v2441_v4 = vadd.f32 %v954_v60, %v906_v59  ;;  %v860_v5 = vadd.f32 %v859_v2, %v811_v0  ;;  %1005 = vmatmul.bf16.gmra.mxu0 %v322_v58  ;;  %v719_v59 = vpack.c.bf16 %v529_v54, %v528_v52  ;;  %v743_v60 = vpack.c.bf16 %v577_v57, %v576_v56  ;;  %v543_v52 = vld [vmem:[%s3376_s1 + $0x488] sm:$0xff]  ;;  %v210_v56 = vld [vmem:[%s3377_s0 + $0x620] sm:$0xff] }
  0xd4   :  { %1054 = vmatmul.bf16.gmra.mxu1 %v323_v62  ;;  %v726_v54 = vpack.c.bf16 %v543_v52, %v542_v51  ;;  %v226_v57 = vld [vmem:[%s3377_s0 + $0x6a0] sm:$0xff] }
  0xd5   :  { %1103 = vmatmul.bf16.gmra.mxu2 %v324_v63  ;;  %1184 = vmatpush.bf16.msra.mxu0 %v719_v59  ;;  %v227_v59 = vld [vmem:[%s3377_s0 + $0x6a8] sm:$0xff] }
  0xd6   :  { %1152 = vmatmul.bf16.gmra.mxu3 %v325_v3 }
  0xd7   :  { %1331 = vmatpush.bf16.msra.mxu3 %v743_v60  ;;  %v212_v60 = vld [vmem:[%s3377_s0 + $0x630] sm:$0xff] }
  0xd8   :  { %v908_v13 = vpop.f32.mrf.mxu2  ;;  %v812_v18 = vpop.f32.mrf.mxu0 }
  0xd9   :  { %v909_v16 = vadd.f32 %v908_v13, %v860_v5  ;;  %v957_v17 = vpop.f32.mrf.mxu3  ;;  %v813_v19 = vadd.f32 %v2254_v55, %v812_v18  ;;  %v861_v20 = vpop.f32.mrf.mxu1  ;;  %v544_v5 = vld [vmem:[%s3376_s1 + $0x490] sm:$0xff]  ;;  %v354_v18 = vpack.c.bf16 %v194_v10, %v178_v9 }
  0xda   :  { %v727_v8 = vpack.c.bf16 %v545_v6, %v544_v5  ;;  %v180_v13 = vld [vmem:[%s3377_s0 + $0x530] sm:$0xff] }
  0xdb   :  { %v2462_v21 = vadd.f32 %v957_v17, %v909_v16  ;;  %v862_v26 = vadd.f32 %v861_v20, %v813_v19  ;;  %v197_v16 = vld [vmem:[%s3377_s0 + $0x5b8] sm:$0xff] }
  0xdc   :  { %1233 = vmatpush.bf16.msra.mxu1 %v727_v8  ;;  %v357_v29 = vpack.c.bf16 %v197_v16, %v181_v15  ;;  %v636_v15 = vld [vmem:[%s3376_s1 + $0x770] sm:$0xff]  ;;  %v637_v16 = vld [vmem:[%s3376_s1 + $0x778] sm:$0xff] }
  0xe0   :  { %v910_v36 = vpop.f32.mrf.mxu2  ;;  %v815_v40 = vpop.f32.mrf.mxu0  ;;  %1234 = vmatpush.bf16.msra.mxu1 %v726_v54 }
  0xe1   :  { %v911_v38 = vadd.f32 %v910_v36, %v862_v26  ;;  %v959_v39 = vpop.f32.mrf.mxu3  ;;  %v816_v44 = vadd.f32 %v2254_v55, %v815_v40  ;;  %v864_v45 = vpop.f32.mrf.mxu1  ;;  %v356_v26 = vpack.c.bf16 %v196_v14, %v180_v13  ;;  %v527_v36 = vld [vmem:[%s3376_s1 + $0x408] sm:$0xff] }
  0xe2   :  { %v718_v40 = vpack.c.bf16 %v527_v36, %v526_v34  ;;  %v621_v36 = vld [vmem:[%s3376_s1 + $0x6f8] sm:$0xff] }
  0xe3   :  { %v2495_v48 = vadd.f32 %v959_v39, %v911_v38  ;;  %v865_v49 = vadd.f32 %v864_v45, %v816_v44  ;;  %1010 = vmatmul.bf16.gmra.mxu0 %v338_v37  ;;  %v574_v37 = vld [vmem:[%s3376_s1 + $0x580] sm:$0xff]  ;;  %v575_v38 = vld [vmem:[%s3376_s1 + $0x588] sm:$0xff] }
  0xe4   :  { %1059 = vmatmul.bf16.gmra.mxu1 %v339_v41  ;;  %v742_v41 = vpack.c.bf16 %v575_v38, %v574_v37  ;;  %1185 = vmatpush.bf16.msra.mxu0 %v718_v40  ;;  %v765_v38 = vpack.c.bf16 %v621_v36, %v620_v35  ;;  %v258_v40 = vld [vmem:[%s3377_s0 + $0x7a0] sm:$0xff]  ;;  %v41_v35 = vld [vmem:[%s3377_s0 + $0xd8] sm:$0xff] }
  0xe5   :  { %1108 = vmatmul.bf16.gmra.mxu2 %v340_v43 }
  0xe6   :  { %1157 = vmatmul.bf16.gmra.mxu3 %v341_v46  ;;  %1423 = vmatpush.bf16.msrb.mxu1 %v765_v38 }
  0xe7   :  { %1332 = vmatpush.bf16.msra.mxu3 %v742_v41  ;;  %v243_v41 = vld [vmem:[%s3377_s0 + $0x728] sm:$0xff] }
  0xe8   :  { %v913_v58 = vpop.f32.mrf.mxu2  ;;  %v817_v63 = vpop.f32.mrf.mxu0 }
  0xe9   :  { %v914_v61 = vadd.f32 %v913_v58, %v865_v49  ;;  %v962_v62 = vpop.f32.mrf.mxu3  ;;  %v818_v0 = vadd.f32 %v2254_v55, %v817_v63  ;;  %v866_v2 = vpop.f32.mrf.mxu1  ;;  %v211_v58 = vld [vmem:[%s3377_s0 + $0x628] sm:$0xff]  ;;  %v229_v63 = vld [vmem:[%s3377_s0 + $0x6b8] sm:$0xff] }
  0xea   :  { %v371_v8 = vpack.c.bf16 %v227_v59, %v211_v58 }
  0xeb   :  { %v2516_v3 = vadd.f32 %v962_v62, %v914_v61  ;;  %v867_v7 = vadd.f32 %v866_v2, %v818_v0  ;;  %v228_v61 = vld [vmem:[%s3377_s0 + $0x6b0] sm:$0xff]  ;;  %v213_v62 = vld [vmem:[%s3377_s0 + $0x638] sm:$0xff]  ;;  %v370_v2 = vpack.c.bf16 %v226_v57, %v210_v56 }
  0xec   :  { %v372_v9 = vpack.c.bf16 %v228_v61, %v212_v60  ;;  %v373_v12 = vpack.c.bf16 %v229_v63, %v213_v62 }
  0xf0   :  { %v915_v17 = vpop.f32.mrf.mxu2  ;;  %v820_v22 = vpop.f32.mrf.mxu0 }
  0xf1   :  { %v916_v19 = vadd.f32 %v915_v17, %v867_v7  ;;  %v964_v20 = vpop.f32.mrf.mxu3  ;;  %v821_v27 = vadd.f32 %v2254_v55, %v820_v22  ;;  %v869_v28 = vpop.f32.mrf.mxu1  ;;  %v604_v17 = vld [vmem:[%s3376_s1 + $0x670] sm:$0xff]  ;;  %v653_v22 = vld [vmem:[%s3376_s1 + $0x7f8] sm:$0xff] }
  0xf3   :  { %v2549_v30 = vadd.f32 %v964_v20, %v916_v19  ;;  %v870_v31 = vadd.f32 %v869_v28, %v821_v27  ;;  %1015 = vmatmul.bf16.gmra.mxu0 %v354_v18  ;;  %v773_v18 = vpack.c.bf16 %v637_v16, %v636_v15  ;;  %v605_v19 = vld [vmem:[%s3376_s1 + $0x678] sm:$0xff]  ;;  %v652_v20 = vld [vmem:[%s3376_s1 + $0x7f0] sm:$0xff] }
  0xf4   :  { %1064 = vmatmul.bf16.gmra.mxu1 %v355_v23  ;;  %v781_v27 = vpack.c.bf16 %v653_v22, %v652_v20  ;;  %v618_v20 = vld [vmem:[%s3376_s1 + $0x6e0] sm:$0xff]  ;;  %v619_v22 = vld [vmem:[%s3376_s1 + $0x6e8] sm:$0xff] }
  0xf5   :  { %1113 = vmatmul.bf16.gmra.mxu2 %v356_v26  ;;  %v757_v26 = vpack.c.bf16 %v605_v19, %v604_v17 }
  0xf6   :  { %1162 = vmatmul.bf16.gmra.mxu3 %v357_v29  ;;  %1472 = vmatpush.bf16.msrb.mxu2 %v773_v18 }
  0xf7   :  { %1374 = vmatpush.bf16.msrb.mxu0 %v757_v26  ;;  %1521 = vmatpush.bf16.msrb.mxu3 %v781_v27  ;;  %v764_v26 = vpack.c.bf16 %v619_v22, %v618_v20  ;;  %v22_v27 = vld [vmem:[%s3377_s0 + $0x40] sm:$0xff]  ;;  %v73_v20 = vld [vmem:[%s3377_s0 + $0x1d8] sm:$0xff] }
  0xf8   :  { %v918_v39 = vpop.f32.mrf.mxu2  ;;  %v822_v45 = vpop.f32.mrf.mxu0 }
  0xf9   :  { %v919_v43 = vadd.f32 %v918_v39, %v870_v31  ;;  %v967_v44 = vpop.f32.mrf.mxu3  ;;  %v823_v46 = vadd.f32 %v2254_v55, %v822_v45  ;;  %v871_v49 = vpop.f32.mrf.mxu1  ;;  %v242_v39 = vld [vmem:[%s3377_s0 + $0x720] sm:$0xff]  ;;  %v260_v45 = vld [vmem:[%s3377_s0 + $0x7b0] sm:$0xff]  ;;  %1424 = vmatpush.bf16.msrb.mxu1 %v764_v26 }
  0xfa   :  { %v386_v52 = vpack.c.bf16 %v258_v40, %v242_v39 }
  0xfb   :  { %v2570_v50 = vadd.f32 %v967_v44, %v919_v43  ;;  %v872_v53 = vadd.f32 %v871_v49, %v823_v46  ;;  %v259_v43 = vld [vmem:[%s3377_s0 + $0x7a8] sm:$0xff]  ;;  %v244_v44 = vld [vmem:[%s3377_s0 + $0x730] sm:$0xff]  ;;  %v245_v46 = vld [vmem:[%s3377_s0 + $0x738] sm:$0xff] }
  0xfc   :  { %v261_v49 = vld [vmem:[%s3377_s0 + $0x7b8] sm:$0xff]  ;;  %v387_v57 = vpack.c.bf16 %v259_v43, %v243_v41  ;;  %v388_v58 = vpack.c.bf16 %v260_v45, %v244_v44 }
  0xfd   :  { %v389_v61 = vpack.c.bf16 %v261_v49, %v245_v46 }
 0x100   :  { %v920_v0 = vpop.f32.mrf.mxu2  ;;  %v825_v7 = vpop.f32.mrf.mxu0 }
 0x101   :  { %v921_v5 = vadd.f32 %v920_v0, %v872_v53  ;;  %v969_v6 = vpop.f32.mrf.mxu3  ;;  %v826_v10 = vadd.f32 %v2254_v55, %v825_v7  ;;  %v874_v11 = vpop.f32.mrf.mxu1  ;;  %v634_v0 = vld [vmem:[%s3376_s1 + $0x760] sm:$0xff]  ;;  %v603_v7 = vld [vmem:[%s3376_s1 + $0x668] sm:$0xff] }
 0x103   :  { %v2603_v13 = vadd.f32 %v969_v6, %v921_v5  ;;  %v875_v14 = vadd.f32 %v874_v11, %v826_v10  ;;  %1020 = vmatmul.bf16.gmra.mxu0 %v370_v2  ;;  %v635_v2 = vld [vmem:[%s3376_s1 + $0x768] sm:$0xff]  ;;  %v602_v5 = vld [vmem:[%s3376_s1 + $0x660] sm:$0xff] }
 0x104   :  { %1069 = vmatmul.bf16.gmra.mxu1 %v371_v8  ;;  %v772_v6 = vpack.c.bf16 %v635_v2, %v634_v0  ;;  %v650_v8 = vld [vmem:[%s3376_s1 + $0x7e0] sm:$0xff]  ;;  %v756_v11 = vpack.c.bf16 %v603_v7, %v602_v5 }
 0x105   :  { %1118 = vmatmul.bf16.gmra.mxu2 %v372_v9  ;;  %v651_v9 = vld [vmem:[%s3376_s1 + $0x7e8] sm:$0xff] }
 0x106   :  { %1167 = vmatmul.bf16.gmra.mxu3 %v373_v12  ;;  %v780_v12 = vpack.c.bf16 %v651_v9, %v650_v8  ;;  %1473 = vmatpush.bf16.msrb.mxu2 %v772_v6  ;;  %v616_v8 = vld [vmem:[%s3376_s1 + $0x6d0] sm:$0xff]  ;;  %v617_v9 = vld [vmem:[%s3376_s1 + $0x6d8] sm:$0xff] }
 0x107   :  { %1375 = vmatpush.bf16.msrb.mxu0 %v756_v11  ;;  %v763_v11 = vpack.c.bf16 %v617_v9, %v616_v8  ;;  %v105_v8 = vld [vmem:[%s3377_s0 + $0x2d8] sm:$0xff] }
 0x108   :  { %v923_v23 = vpop.f32.mrf.mxu2  ;;  %v827_v31 = vpop.f32.mrf.mxu0  ;;  %1522 = vmatpush.bf16.msrb.mxu3 %v780_v12  ;;  %v54_v12 = vld [vmem:[%s3377_s0 + $0x140] sm:$0xff] }
 0x109   :  { %v924_v28 = vadd.f32 %v923_v23, %v875_v14  ;;  %v972_v29 = vpop.f32.mrf.mxu3  ;;  %v828_v32 = vadd.f32 %v2254_v55, %v827_v31  ;;  %v876_v33 = vpop.f32.mrf.mxu1  ;;  %v24_v31 = vld [vmem:[%s3377_s0 + $0x50] sm:$0xff]  ;;  %1425 = vmatpush.bf16.msrb.mxu1 %v763_v11 }
 0x10b   :  { %v2624_v34 = vadd.f32 %v972_v29, %v924_v28  ;;  %v877_v37 = vadd.f32 %v876_v33, %v828_v32  ;;  %v23_v28 = vld [vmem:[%s3377_s0 + $0x48] sm:$0xff]  ;;  %v40_v32 = vld [vmem:[%s3377_s0 + $0xd0] sm:$0xff]  ;;  %v25_v33 = vld [vmem:[%s3377_s0 + $0x58] sm:$0xff] }
 0x10c   :  { %v39_v29 = vld [vmem:[%s3377_s0 + $0xc8] sm:$0xff]  ;;  %v280_v43 = vpack.c.bf16 %v40_v32, %v24_v31  ;;  %v281_v46 = vpack.c.bf16 %v41_v35, %v25_v33 }
 0x10d   :  { %v279_v41 = vpack.c.bf16 %v39_v29, %v23_v28 }
 0x110   :  { %v925_v51 = vpop.f32.mrf.mxu2  ;;  %v830_v56 = vpop.f32.mrf.mxu0 }
 0x111   :  { %v926_v53 = vadd.f32 %v925_v51, %v877_v37  ;;  %v974_v54 = vpop.f32.mrf.mxu3  ;;  %v831_v59 = vadd.f32 %v2254_v55, %v830_v56  ;;  %v879_v60 = vpop.f32.mrf.mxu1  ;;  %v601_v56 = vld [vmem:[%s3376_s1 + $0x658] sm:$0xff] }
 0x113   :  { %v2657_v62 = vadd.f32 %v974_v54, %v926_v53  ;;  %v880_v63 = vadd.f32 %v879_v60, %v831_v59  ;;  %1025 = vmatmul.bf16.gmra.mxu0 %v386_v52  ;;  %v632_v52 = vld [vmem:[%s3376_s1 + $0x750] sm:$0xff]  ;;  %v633_v53 = vld [vmem:[%s3376_s1 + $0x758] sm:$0xff] }
 0x114   :  { %1074 = vmatmul.bf16.gmra.mxu1 %v387_v57  ;;  %v771_v54 = vpack.c.bf16 %v633_v53, %v632_v52  ;;  %v648_v57 = vld [vmem:[%s3376_s1 + $0x7d0] sm:$0xff] }
 0x115   :  { %1123 = vmatmul.bf16.gmra.mxu2 %v388_v58  ;;  %v649_v58 = vld [vmem:[%s3376_s1 + $0x7d8] sm:$0xff] }
 0x116   :  { %1172 = vmatmul.bf16.gmra.mxu3 %v389_v61  ;;  %v779_v61 = vpack.c.bf16 %v649_v58, %v648_v57  ;;  %1474 = vmatpush.bf16.msrb.mxu2 %v771_v54  ;;  %v614_v57 = vld [vmem:[%s3376_s1 + $0x6c0] sm:$0xff]  ;;  %v615_v58 = vld [vmem:[%s3376_s1 + $0x6c8] sm:$0xff] }
 0x118   :  { %v928_v10 = vpop.f32.mrf.mxu2  ;;  %v832_v16 = vpop.f32.mrf.mxu0  ;;  %1523 = vmatpush.bf16.msrb.mxu3 %v779_v61  ;;  %v86_v61 = vld [vmem:[%s3377_s0 + $0x240] sm:$0xff] }
 0x119   :  { %v929_v14 = vadd.f32 %v928_v10, %v880_v63  ;;  %v977_v15 = vpop.f32.mrf.mxu3  ;;  %v833_v17 = vadd.f32 %v2254_v55, %v832_v16  ;;  %v881_v18 = vpop.f32.mrf.mxu1  ;;  %v38_v55 = vld [vmem:[%s3377_s0 + $0xc0] sm:$0xff]  ;;  %v56_v16 = vld [vmem:[%s3377_s0 + $0x150] sm:$0xff] }
 0x11a   :  { %v278_v37 = vpack.c.bf16 %v38_v55, %v22_v27 }
 0x11b   :  { %v2678_v19 = vadd.f32 %v977_v15, %v929_v14  ;;  %v882_v23 = vadd.f32 %v881_v18, %v833_v17  ;;  %v55_v14 = vld [vmem:[%s3377_s0 + $0x148] sm:$0xff]  ;;  %v72_v17 = vld [vmem:[%s3377_s0 + $0x1d0] sm:$0xff]  ;;  %v57_v18 = vld [vmem:[%s3377_s0 + $0x158] sm:$0xff] }
 0x11c   :  { %v71_v15 = vld [vmem:[%s3377_s0 + $0x1c8] sm:$0xff]  ;;  %v296_v29 = vpack.c.bf16 %v72_v17, %v56_v16  ;;  %v297_v33 = vpack.c.bf16 %v73_v20, %v57_v18 }
 0x11d   :  { %v295_v28 = vpack.c.bf16 %v71_v15, %v55_v14 }
 0x120   :  { %v930_v36 = vpop.f32.mrf.mxu2  ;;  %v991_v40 = vpop.f32.mrf.mxu0 }
 0x121   :  { %v931_v38 = vadd.f32 %v930_v36, %v882_v23  ;;  %v979_v39 = vpop.f32.mrf.mxu3  ;;  %v992_v44 = vadd.f32 %v991_v40, %v2300_v24  ;;  %v1040_v45 = vpop.f32.mrf.mxu1  ;;  %v600_v24 = vld [vmem:[%s3376_s1 + $0x650] sm:$0xff]  ;;  %v599_v40 = vld [vmem:[%s3376_s1 + $0x648] sm:$0xff] }
 0x122   :  { %v755_v60 = vpack.c.bf16 %v601_v56, %v600_v24 }
 0x123   :  { %v2711_v49 = vadd.f32 %v979_v39, %v931_v38  ;;  %v1041_v51 = vadd.f32 %v1040_v45, %v992_v44  ;;  %1186 = vmatmul.bf16.vlgmr.msra.gmra.mxu0 %v278_v37  ;;  %v630_v37 = vld [vmem:[%s3376_s1 + $0x740] sm:$0xff]  ;;  %v631_v38 = vld [vmem:[%s3376_s1 + $0x748] sm:$0xff] }
 0x124   :  { %1235 = vmatmul.bf16.vlgmr.msra.gmra.mxu1 %v279_v41  ;;  %1376 = vmatpush.bf16.msrb.mxu0 %v755_v60  ;;  %v770_v39 = vpack.c.bf16 %v631_v38, %v630_v37  ;;  %v646_v41 = vld [vmem:[%s3376_s1 + $0x7c0] sm:$0xff]  ;;  %v762_v60 = vpack.c.bf16 %v615_v58, %v614_v57  ;;  %v137_v57 = vld [vmem:[%s3377_s0 + $0x3d8] sm:$0xff] }
 0x125   :  { %1284 = vmatmul.bf16.vlgmr.msra.gmra.mxu2 %v280_v43  ;;  %v647_v43 = vld [vmem:[%s3376_s1 + $0x7c8] sm:$0xff] }
 0x126   :  { %1333 = vmatmul.bf16.vlgmr.msra.gmra.mxu3 %v281_v46  ;;  %v778_v46 = vpack.c.bf16 %v647_v43, %v646_v41  ;;  %1475 = vmatpush.bf16.msrb.mxu2 %v770_v39  ;;  %v612_v41 = vld [vmem:[%s3376_s1 + $0x6b0] sm:$0xff]  ;;  %v613_v43 = vld [vmem:[%s3376_s1 + $0x6b8] sm:$0xff] }
 0x127   :  { %1426 = vmatpush.bf16.msrb.mxu1 %v762_v60 }
 0x128   :  { %v1089_v59 = vpop.f32.mrf.mxu2  ;;  %v993_v2 = vpop.f32.mrf.mxu0  ;;  %1524 = vmatpush.bf16.msrb.mxu3 %v778_v46  ;;  %v118_v46 = vld [vmem:[%s3377_s0 + $0x340] sm:$0xff] }
 0x129   :  { %v1090_v63 = vadd.f32 %v1089_v59, %v1041_v51  ;;  %v1138_v0 = vpop.f32.mrf.mxu3  ;;  %v994_v5 = vadd.f32 %v993_v2, %v2333_v47  ;;  %v1042_v6 = vpop.f32.mrf.mxu1  ;;  %v70_v47 = vld [vmem:[%s3377_s0 + $0x1c0] sm:$0xff]  ;;  %v88_v2 = vld [vmem:[%s3377_s0 + $0x250] sm:$0xff] }
 0x12a   :  { %v294_v23 = vpack.c.bf16 %v70_v47, %v54_v12 }
 0x12b   :  { %v2732_v7 = vadd.f32 %v1138_v0, %v1090_v63  ;;  %v1043_v10 = vadd.f32 %v1042_v6, %v994_v5  ;;  %v87_v63 = vld [vmem:[%s3377_s0 + $0x248] sm:$0xff]  ;;  %v104_v5 = vld [vmem:[%s3377_s0 + $0x2d0] sm:$0xff]  ;;  %v89_v6 = vld [vmem:[%s3377_s0 + $0x258] sm:$0xff] }
 0x12c   :  { %v103_v0 = vld [vmem:[%s3377_s0 + $0x2c8] sm:$0xff]  ;;  %v312_v15 = vpack.c.bf16 %v104_v5, %v88_v2  ;;  %v313_v18 = vpack.c.bf16 %v105_v8, %v89_v6 }
 0x12d   :  { %v311_v14 = vpack.c.bf16 %v103_v0, %v87_v63 }
 0x130   :  { %v1091_v22 = vpop.f32.mrf.mxu2  ;;  %v996_v55 = vpop.f32.mrf.mxu0 }
 0x131   :  { %v1092_v26 = vadd.f32 %v1091_v22, %v1043_v10  ;;  %v1140_v27 = vpop.f32.mrf.mxu3  ;;  %v997_v31 = vadd.f32 %v996_v55, %v2354_v1  ;;  %v1045_v32 = vpop.f32.mrf.mxu1  ;;  %v598_v1 = vld [vmem:[%s3376_s1 + $0x640] sm:$0xff]  ;;  %v597_v55 = vld [vmem:[%s3376_s1 + $0x638] sm:$0xff] }
 0x132   :  { %v754_v45 = vpack.c.bf16 %v599_v40, %v598_v1 }
 0x133   :  { %v2765_v35 = vadd.f32 %v1140_v27, %v1092_v26  ;;  %v1046_v36 = vadd.f32 %v1045_v32, %v997_v31  ;;  %1191 = vmatmul.bf16.gmra.mxu0 %v294_v23  ;;  %v628_v23 = vld [vmem:[%s3376_s1 + $0x730] sm:$0xff]  ;;  %v629_v26 = vld [vmem:[%s3376_s1 + $0x738] sm:$0xff] }
 0x134   :  { %1240 = vmatmul.bf16.gmra.mxu1 %v295_v28  ;;  %1377 = vmatpush.bf16.msrb.mxu0 %v754_v45  ;;  %v769_v27 = vpack.c.bf16 %v629_v26, %v628_v23  ;;  %v644_v28 = vld [vmem:[%s3376_s1 + $0x7b0] sm:$0xff]  ;;  %v761_v45 = vpack.c.bf16 %v613_v43, %v612_v41  ;;  %v169_v41 = vld [vmem:[%s3377_s0 + $0x4d8] sm:$0xff] }
 0x135   :  { %1289 = vmatmul.bf16.gmra.mxu2 %v296_v29  ;;  %v645_v29 = vld [vmem:[%s3376_s1 + $0x7b8] sm:$0xff] }
 0x136   :  { %1338 = vmatmul.bf16.gmra.mxu3 %v297_v33  ;;  %v777_v33 = vpack.c.bf16 %v645_v29, %v644_v28  ;;  %1476 = vmatpush.bf16.msrb.mxu2 %v769_v27  ;;  %v610_v28 = vld [vmem:[%s3376_s1 + $0x6a0] sm:$0xff]  ;;  %v611_v29 = vld [vmem:[%s3376_s1 + $0x6a8] sm:$0xff] }
 0x137   :  { %1427 = vmatpush.bf16.msrb.mxu1 %v761_v45 }
 0x138   :  { %v1094_v44 = vpop.f32.mrf.mxu2  ;;  %v998_v53 = vpop.f32.mrf.mxu0  ;;  %1525 = vmatpush.bf16.msrb.mxu3 %v777_v33  ;;  %v150_v33 = vld [vmem:[%s3377_s0 + $0x440] sm:$0xff] }
 0x139   :  { %v1095_v51 = vadd.f32 %v1094_v44, %v1046_v36  ;;  %v1143_v52 = vpop.f32.mrf.mxu3  ;;  %v999_v24 = vadd.f32 %v998_v53, %v2387_v25  ;;  %v1047_v54 = vpop.f32.mrf.mxu1  ;;  %v102_v25 = vld [vmem:[%s3377_s0 + $0x2c0] sm:$0xff]  ;;  %v120_v53 = vld [vmem:[%s3377_s0 + $0x350] sm:$0xff] }
 0x13a   :  { %v310_v10 = vpack.c.bf16 %v102_v25, %v86_v61 }
 0x13b   :  { %v2786_v56 = vadd.f32 %v1143_v52, %v1095_v51  ;;  %v1048_v59 = vadd.f32 %v1047_v54, %v999_v24  ;;  %v119_v51 = vld [vmem:[%s3377_s0 + $0x348] sm:$0xff]  ;;  %v136_v24 = vld [vmem:[%s3377_s0 + $0x3d0] sm:$0xff]  ;;  %v121_v54 = vld [vmem:[%s3377_s0 + $0x358] sm:$0xff] }
 0x13c   :  { %v135_v52 = vld [vmem:[%s3377_s0 + $0x3c8] sm:$0xff]  ;;  %v328_v0 = vpack.c.bf16 %v136_v24, %v120_v53  ;;  %v329_v6 = vpack.c.bf16 %v137_v57, %v121_v54 }
 0x13d   :  { %v327_v63 = vpack.c.bf16 %v135_v52, %v119_v51 }
 0x140   :  { %v1096_v9 = vpop.f32.mrf.mxu2  ;;  %v1001_v47 = vpop.f32.mrf.mxu0 }
 0x141   :  { %v1097_v11 = vadd.f32 %v1096_v9, %v1048_v59  ;;  %v1145_v12 = vpop.f32.mrf.mxu3  ;;  %v1002_v16 = vadd.f32 %v1001_v47, %v2408_v42  ;;  %v1050_v17 = vpop.f32.mrf.mxu1  ;;  %v596_v42 = vld [vmem:[%s3376_s1 + $0x630] sm:$0xff]  ;;  %v595_v47 = vld [vmem:[%s3376_s1 + $0x628] sm:$0xff] }
 0x142   :  { %v753_v32 = vpack.c.bf16 %v597_v55, %v596_v42 }
 0x143   :  { %v2819_v20 = vadd.f32 %v1145_v12, %v1097_v11  ;;  %v1051_v22 = vadd.f32 %v1050_v17, %v1002_v16  ;;  %1196 = vmatmul.bf16.gmra.mxu0 %v310_v10  ;;  %v626_v10 = vld [vmem:[%s3376_s1 + $0x720] sm:$0xff]  ;;  %v627_v11 = vld [vmem:[%s3376_s1 + $0x728] sm:$0xff] }
 0x144   :  { %1245 = vmatmul.bf16.gmra.mxu1 %v311_v14  ;;  %1378 = vmatpush.bf16.msrb.mxu0 %v753_v32  ;;  %v768_v12 = vpack.c.bf16 %v627_v11, %v626_v10  ;;  %v642_v14 = vld [vmem:[%s3376_s1 + $0x7a0] sm:$0xff]  ;;  %v760_v32 = vpack.c.bf16 %v611_v29, %v610_v28  ;;  %v201_v28 = vld [vmem:[%s3377_s0 + $0x5d8] sm:$0xff] }
 0x145   :  { %1294 = vmatmul.bf16.gmra.mxu2 %v312_v15  ;;  %v643_v15 = vld [vmem:[%s3376_s1 + $0x7a8] sm:$0xff] }
 0x146   :  { %1343 = vmatmul.bf16.gmra.mxu3 %v313_v18  ;;  %v776_v18 = vpack.c.bf16 %v643_v15, %v642_v14  ;;  %1477 = vmatpush.bf16.msrb.mxu2 %v768_v12  ;;  %v608_v14 = vld [vmem:[%s3376_s1 + $0x690] sm:$0xff]  ;;  %v609_v15 = vld [vmem:[%s3376_s1 + $0x698] sm:$0xff] }
 0x147   :  { %1428 = vmatpush.bf16.msrb.mxu1 %v760_v32 }
 0x148   :  { %v1099_v31 = vpop.f32.mrf.mxu2  ;;  %v1003_v38 = vpop.f32.mrf.mxu0  ;;  %1526 = vmatpush.bf16.msrb.mxu3 %v776_v18  ;;  %v182_v18 = vld [vmem:[%s3377_s0 + $0x540] sm:$0xff] }
 0x149   :  { %v1100_v36 = vadd.f32 %v1099_v31, %v1051_v22  ;;  %v1148_v37 = vpop.f32.mrf.mxu3  ;;  %v1004_v1 = vadd.f32 %v1003_v38, %v2441_v4  ;;  %v1052_v39 = vpop.f32.mrf.mxu1  ;;  %v134_v4 = vld [vmem:[%s3377_s0 + $0x3c0] sm:$0xff]  ;;  %v152_v38 = vld [vmem:[%s3377_s0 + $0x450] sm:$0xff] }
 0x14a   :  { %v326_v59 = vpack.c.bf16 %v134_v4, %v118_v46 }
 0x14b   :  { %v2840_v40 = vadd.f32 %v1148_v37, %v1100_v36  ;;  %v1053_v44 = vadd.f32 %v1052_v39, %v1004_v1  ;;  %v151_v36 = vld [vmem:[%s3377_s0 + $0x448] sm:$0xff]  ;;  %v168_v1 = vld [vmem:[%s3377_s0 + $0x4d0] sm:$0xff]  ;;  %v153_v39 = vld [vmem:[%s3377_s0 + $0x458] sm:$0xff] }
 0x14c   :  { %v167_v37 = vld [vmem:[%s3377_s0 + $0x4c8] sm:$0xff]  ;;  %v344_v52 = vpack.c.bf16 %v168_v1, %v152_v38  ;;  %v345_v54 = vpack.c.bf16 %v169_v41, %v153_v39 }
 0x14d   :  { %v343_v51 = vpack.c.bf16 %v167_v37, %v151_v36 }
 0x150   :  { %v1101_v58 = vpop.f32.mrf.mxu2  ;;  %v1006_v25 = vpop.f32.mrf.mxu0 }
 0x151   :  { %v1102_v60 = vadd.f32 %v1101_v58, %v1053_v44  ;;  %v1150_v61 = vpop.f32.mrf.mxu3  ;;  %v1007_v2 = vadd.f32 %v1006_v25, %v2462_v21  ;;  %v1055_v5 = vpop.f32.mrf.mxu1  ;;  %v594_v21 = vld [vmem:[%s3376_s1 + $0x620] sm:$0xff]  ;;  %v593_v25 = vld [vmem:[%s3376_s1 + $0x618] sm:$0xff] }
 0x152   :  { %v752_v17 = vpack.c.bf16 %v595_v47, %v594_v21 }
 0x153   :  { %v2873_v8 = vadd.f32 %v1150_v61, %v1102_v60  ;;  %v1056_v9 = vadd.f32 %v1055_v5, %v1007_v2  ;;  %1201 = vmatmul.bf16.gmra.mxu0 %v326_v59  ;;  %v624_v59 = vld [vmem:[%s3376_s1 + $0x710] sm:$0xff]  ;;  %v625_v60 = vld [vmem:[%s3376_s1 + $0x718] sm:$0xff] }
 0x154   :  { %1250 = vmatmul.bf16.gmra.mxu1 %v327_v63  ;;  %1379 = vmatpush.bf16.msrb.mxu0 %v752_v17  ;;  %v767_v61 = vpack.c.bf16 %v625_v60, %v624_v59  ;;  %v640_v63 = vld [vmem:[%s3376_s1 + $0x790] sm:$0xff]  ;;  %v759_v17 = vpack.c.bf16 %v609_v15, %v608_v14  ;;  %v233_v14 = vld [vmem:[%s3377_s0 + $0x6d8] sm:$0xff] }
 0x155   :  { %1299 = vmatmul.bf16.gmra.mxu2 %v328_v0  ;;  %v641_v0 = vld [vmem:[%s3376_s1 + $0x798] sm:$0xff] }
 0x156   :  { %1348 = vmatmul.bf16.gmra.mxu3 %v329_v6  ;;  %v775_v6 = vpack.c.bf16 %v641_v0, %v640_v63  ;;  %1478 = vmatpush.bf16.msrb.mxu2 %v767_v61  ;;  %v606_v63 = vld [vmem:[%s3376_s1 + $0x680] sm:$0xff]  ;;  %v607_v0 = vld [vmem:[%s3376_s1 + $0x688] sm:$0xff] }
 0x157   :  { %1429 = vmatpush.bf16.msrb.mxu1 %v759_v17 }
 0x158   :  { %v1104_v16 = vpop.f32.mrf.mxu2  ;;  %v1008_v26 = vpop.f32.mrf.mxu0  ;;  %1527 = vmatpush.bf16.msrb.mxu3 %v775_v6  ;;  %v214_v6 = vld [vmem:[%s3377_s0 + $0x640] sm:$0xff] }
 0x159   :  { %v1105_v22 = vadd.f32 %v1104_v16, %v1056_v9  ;;  %v1153_v23 = vpop.f32.mrf.mxu3  ;;  %v1009_v42 = vadd.f32 %v1008_v26, %v2495_v48  ;;  %v1057_v27 = vpop.f32.mrf.mxu1  ;;  %v166_v48 = vld [vmem:[%s3377_s0 + $0x4c0] sm:$0xff]  ;;  %v184_v26 = vld [vmem:[%s3377_s0 + $0x550] sm:$0xff] }
 0x15a   :  { %v342_v44 = vpack.c.bf16 %v166_v48, %v150_v33 }
 0x15b   :  { %v2894_v55 = vadd.f32 %v1153_v23, %v1105_v22  ;;  %v1058_v31 = vadd.f32 %v1057_v27, %v1009_v42  ;;  %v183_v22 = vld [vmem:[%s3377_s0 + $0x548] sm:$0xff]  ;;  %v200_v42 = vld [vmem:[%s3377_s0 + $0x5d0] sm:$0xff]  ;;  %v185_v27 = vld [vmem:[%s3377_s0 + $0x558] sm:$0xff] }
 0x15c   :  { %v199_v23 = vld [vmem:[%s3377_s0 + $0x5c8] sm:$0xff]  ;;  %v360_v37 = vpack.c.bf16 %v200_v42, %v184_v26  ;;  %v361_v39 = vpack.c.bf16 %v201_v28, %v185_v27 }
 0x15d   :  { %v359_v36 = vpack.c.bf16 %v199_v23, %v183_v22 }
 0x160   :  { %v1106_v43 = vpop.f32.mrf.mxu2  ;;  %v1011_v4 = vpop.f32.mrf.mxu0 }
 0x161   :  { %v1107_v45 = vadd.f32 %v1106_v43, %v1058_v31  ;;  %v1155_v46 = vpop.f32.mrf.mxu3  ;;  %v1012_v53 = vadd.f32 %v1011_v4, %v2516_v3  ;;  %v1060_v24 = vpop.f32.mrf.mxu1  ;;  %v592_v3 = vld [vmem:[%s3376_s1 + $0x610] sm:$0xff]  ;;  %v591_v4 = vld [vmem:[%s3376_s1 + $0x608] sm:$0xff] }
 0x162   :  { %v751_v5 = vpack.c.bf16 %v593_v25, %v592_v3 }
 0x163   :  { %v2927_v57 = vadd.f32 %v1155_v46, %v1107_v45  ;;  %v1061_v58 = vadd.f32 %v1060_v24, %v1012_v53  ;;  %1206 = vmatmul.bf16.gmra.mxu0 %v342_v44  ;;  %v622_v44 = vld [vmem:[%s3376_s1 + $0x700] sm:$0xff]  ;;  %v623_v45 = vld [vmem:[%s3376_s1 + $0x708] sm:$0xff] }
 0x164   :  { %1255 = vmatmul.bf16.gmra.mxu1 %v343_v51  ;;  %1380 = vmatpush.bf16.msrb.mxu0 %v751_v5  ;;  %v766_v46 = vpack.c.bf16 %v623_v45, %v622_v44  ;;  %v638_v51 = vld [vmem:[%s3376_s1 + $0x780] sm:$0xff]  ;;  %v758_v5 = vpack.c.bf16 %v607_v0, %v606_v63  ;;  %v248_v44 = vld [vmem:[%s3377_s0 + $0x750] sm:$0xff] }
 0x165   :  { %1304 = vmatmul.bf16.gmra.mxu2 %v344_v52  ;;  %v639_v52 = vld [vmem:[%s3376_s1 + $0x788] sm:$0xff]  ;;  %v264_v45 = vld [vmem:[%s3377_s0 + $0x7d0] sm:$0xff] }
 0x166   :  { %1353 = vmatmul.bf16.gmra.mxu3 %v345_v54  ;;  %v774_v54 = vpack.c.bf16 %v639_v52, %v638_v51  ;;  %1479 = vmatpush.bf16.msrb.mxu2 %v766_v46  ;;  %v265_v46 = vld [vmem:[%s3377_s0 + $0x7d8] sm:$0xff] }
 0x167   :  { %1430 = vmatpush.bf16.msrb.mxu1 %v758_v5 }
 0x168   :  { %v1109_v2 = vpop.f32.mrf.mxu2  ;;  %v1013_v11 = vpop.f32.mrf.mxu0  ;;  %1528 = vmatpush.bf16.msrb.mxu3 %v774_v54 }
 0x169   :  { %v1110_v9 = vadd.f32 %v1109_v2, %v1061_v58  ;;  %v1158_v10 = vpop.f32.mrf.mxu3  ;;  %v1014_v21 = vadd.f32 %v1013_v11, %v2549_v30  ;;  %v1062_v12 = vpop.f32.mrf.mxu1  ;;  %v198_v30 = vld [vmem:[%s3377_s0 + $0x5c0] sm:$0xff]  ;;  %v216_v11 = vld [vmem:[%s3377_s0 + $0x650] sm:$0xff] }
 0x16a   :  { %v358_v31 = vpack.c.bf16 %v198_v30, %v182_v18 }
 0x16b   :  { %v2948_v47 = vadd.f32 %v1158_v10, %v1110_v9  ;;  %v1063_v16 = vadd.f32 %v1062_v12, %v1014_v21  ;;  %v215_v9 = vld [vmem:[%s3377_s0 + $0x648] sm:$0xff]  ;;  %v232_v21 = vld [vmem:[%s3377_s0 + $0x6d0] sm:$0xff]  ;;  %v217_v12 = vld [vmem:[%s3377_s0 + $0x658] sm:$0xff] }
 0x16c   :  { %v231_v10 = vld [vmem:[%s3377_s0 + $0x6c8] sm:$0xff]  ;;  %v376_v23 = vpack.c.bf16 %v232_v21, %v216_v11  ;;  %v377_v27 = vpack.c.bf16 %v233_v14, %v217_v12  ;;  %v42_v21 = vld [vmem:[%s3377_s0 + $0xe0] sm:$0xff]  ;;  %v28_v14 = vld [vmem:[%s3377_s0 + $0x70] sm:$0xff] }
 0x16d   :  { %v375_v22 = vpack.c.bf16 %v231_v10, %v215_v9  ;;  %v27_v12 = vld [vmem:[%s3377_s0 + $0x68] sm:$0xff] }
 0x170   :  { %v1111_v29 = vpop.f32.mrf.mxu2  ;;  %v1016_v48 = vpop.f32.mrf.mxu0 }
 0x171   :  { %v1112_v32 = vadd.f32 %v1111_v29, %v1063_v16  ;;  %v1160_v33 = vpop.f32.mrf.mxu3  ;;  %v1017_v38 = vadd.f32 %v1016_v48, %v2570_v50  ;;  %v1065_v1 = vpop.f32.mrf.mxu1  ;;  %v590_v50 = vld [vmem:[%s3376_s1 + $0x600] sm:$0xff] }
 0x172   :  { %v750_v24 = vpack.c.bf16 %v591_v4, %v590_v50  ;;  %v249_v50 = vld [vmem:[%s3377_s0 + $0x758] sm:$0xff] }
 0x173   :  { %v2981_v41 = vadd.f32 %v1160_v33, %v1112_v32  ;;  %v1066_v43 = vadd.f32 %v1065_v1, %v1017_v38  ;;  %1211 = vmatmul.bf16.gmra.mxu0 %v358_v31 }
 0x174   :  { %1260 = vmatmul.bf16.gmra.mxu1 %v359_v36  ;;  %1381 = vmatpush.bf16.msrb.mxu0 %v750_v24 }
 0x175   :  { %1309 = vmatmul.bf16.gmra.mxu2 %v360_v37 }
 0x176   :  { %1358 = vmatmul.bf16.gmra.mxu3 %v361_v39  ;;  %v262_v39 = vld [vmem:[%s3377_s0 + $0x7c0] sm:$0xff] }
 0x178   :  { %v1114_v53 = vpop.f32.mrf.mxu2  ;;  %v1018_v60 = vpop.f32.mrf.mxu0 }
 0x179   :  { %v1115_v58 = vadd.f32 %v1114_v53, %v1066_v43  ;;  %v1163_v59 = vpop.f32.mrf.mxu3  ;;  %v1019_v3 = vadd.f32 %v1018_v60, %v2603_v13  ;;  %v1067_v61 = vpop.f32.mrf.mxu1  ;;  %v230_v13 = vld [vmem:[%s3377_s0 + $0x6c0] sm:$0xff]  ;;  %v247_v43 = vld [vmem:[%s3377_s0 + $0x748] sm:$0xff] }
 0x17a   :  { %v374_v16 = vpack.c.bf16 %v230_v13, %v214_v6 }
 0x17b   :  { %v3002_v25 = vadd.f32 %v1163_v59, %v1115_v58  ;;  %v1068_v2 = vadd.f32 %v1067_v61, %v1019_v3  ;;  %v392_v58 = vpack.c.bf16 %v264_v45, %v248_v44  ;;  %v393_v3 = vpack.c.bf16 %v265_v46, %v249_v50  ;;  %v74_v45 = vld [vmem:[%s3377_s0 + $0x1e0] sm:$0xff]  ;;  %v59_v50 = vld [vmem:[%s3377_s0 + $0x168] sm:$0xff]  ;;  %v60_v46 = vld [vmem:[%s3377_s0 + $0x170] sm:$0xff] }
 0x180   :  { %v1116_v15 = vpop.f32.mrf.mxu2  ;;  %v1021_v30 = vpop.f32.mrf.mxu0 }
 0x181   :  { %v1117_v17 = vadd.f32 %v1116_v15, %v1068_v2  ;;  %v1165_v18 = vpop.f32.mrf.mxu3  ;;  %v1022_v26 = vadd.f32 %v1021_v30, %v2624_v34  ;;  %v1070_v42 = vpop.f32.mrf.mxu1  ;;  %v246_v34 = vld [vmem:[%s3377_s0 + $0x740] sm:$0xff]  ;;  %v44_v15 = vld [vmem:[%s3377_s0 + $0xf0] sm:$0xff] }
 0x182   :  { %v390_v51 = vpack.c.bf16 %v262_v39, %v246_v34 }
 0x183   :  { %v3035_v28 = vadd.f32 %v1165_v18, %v1117_v17  ;;  %v1071_v29 = vadd.f32 %v1070_v42, %v1022_v26  ;;  %1216 = vmatmul.bf16.gmra.mxu0 %v374_v16  ;;  %v29_v16 = vld [vmem:[%s3377_s0 + $0x78] sm:$0xff] }
 0x184   :  { %1265 = vmatmul.bf16.gmra.mxu1 %v375_v22  ;;  %v45_v17 = vld [vmem:[%s3377_s0 + $0xf8] sm:$0xff] }
 0x185   :  { %1314 = vmatmul.bf16.gmra.mxu2 %v376_v23 }
 0x186   :  { %1363 = vmatmul.bf16.gmra.mxu3 %v377_v27  ;;  %v284_v27 = vpack.c.bf16 %v44_v15, %v28_v14  ;;  %v106_v15 = vld [vmem:[%s3377_s0 + $0x2e0] sm:$0xff] }
 0x188   :  { %v1119_v31 = vpop.f32.mrf.mxu2  ;;  %v1023_v48 = vpop.f32.mrf.mxu0 }
 0x189   :  { %v1120_v32 = vadd.f32 %v1119_v31, %v1071_v29  ;;  %v1168_v33 = vpop.f32.mrf.mxu3  ;;  %v1024_v36 = vadd.f32 %v1023_v48, %v2657_v62  ;;  %v1072_v37 = vpop.f32.mrf.mxu1  ;;  %v263_v62 = vld [vmem:[%s3377_s0 + $0x7c8] sm:$0xff] }
 0x18a   :  { %v391_v54 = vpack.c.bf16 %v263_v62, %v247_v43 }
 0x18b   :  { %v3038_v38 = vadd.f32 %v1168_v33, %v1120_v32  ;;  %v1073_v1 = vadd.f32 %v1072_v37, %v1024_v36  ;;  %v285_v32 = vpack.c.bf16 %v45_v17, %v29_v16  ;;  %v91_v16 = vld [vmem:[%s3377_s0 + $0x268] sm:$0xff]  ;;  %v92_v17 = vld [vmem:[%s3377_s0 + $0x270] sm:$0xff] }
 0x190   :  { %v1121_v4 = vpop.f32.mrf.mxu2  ;;  %v1026_v24 = vpop.f32.mrf.mxu0 }
 0x191   :  { %v1122_v52 = vadd.f32 %v1121_v4, %v1073_v1  ;;  %v1170_v53 = vpop.f32.mrf.mxu3  ;;  %v1027_v59 = vadd.f32 %v1026_v24, %v2678_v19  ;;  %v1075_v60 = vpop.f32.mrf.mxu1  ;;  %v26_v19 = vld [vmem:[%s3377_s0 + $0x60] sm:$0xff]  ;;  %v76_v4 = vld [vmem:[%s3377_s0 + $0x1f0] sm:$0xff] }
 0x192   :  { %v282_v30 = vpack.c.bf16 %v42_v21, %v26_v19 }
 0x193   :  { %v3065_v61 = vadd.f32 %v1170_v53, %v1122_v52  ;;  %v1076_v63 = vadd.f32 %v1075_v60, %v1027_v59  ;;  %1221 = vmatmul.bf16.gmra.mxu0 %v390_v51  ;;  %v61_v51 = vld [vmem:[%s3377_s0 + $0x178] sm:$0xff] }
 0x194   :  { %1270 = vmatmul.bf16.gmra.mxu1 %v391_v54  ;;  %v77_v52 = vld [vmem:[%s3377_s0 + $0x1f8] sm:$0xff] }
 0x195   :  { %1319 = vmatmul.bf16.gmra.mxu2 %v392_v58 }
 0x196   :  { %1368 = vmatmul.bf16.gmra.mxu3 %v393_v3  ;;  %v300_v3 = vpack.c.bf16 %v76_v4, %v60_v46  ;;  %v138_v4 = vld [vmem:[%s3377_s0 + $0x3e0] sm:$0xff] }
 0x198   :  { %v1124_v0 = vpop.f32.mrf.mxu2  ;;  %v1028_v6 = vpop.f32.mrf.mxu0 }
 0x199   :  { %v1125_v2 = vadd.f32 %v1124_v0, %v1076_v63  ;;  %v1173_v5 = vpop.f32.mrf.mxu3  ;;  %v1029_v13 = vadd.f32 %v1028_v6, %v2711_v49  ;;  %v1077_v9 = vpop.f32.mrf.mxu1  ;;  %v43_v49 = vld [vmem:[%s3377_s0 + $0xe8] sm:$0xff] }
 0x19a   :  { %v283_v42 = vpack.c.bf16 %v43_v49, %v27_v12 }
 0x19b   :  { %v3068_v10 = vadd.f32 %v1173_v5, %v1125_v2  ;;  %v1078_v11 = vadd.f32 %v1077_v9, %v1029_v13  ;;  %v301_v2 = vpack.c.bf16 %v77_v52, %v61_v51  ;;  %v123_v51 = vld [vmem:[%s3377_s0 + $0x368] sm:$0xff]  ;;  %v124_v52 = vld [vmem:[%s3377_s0 + $0x370] sm:$0xff] }
 0x1a0   :  { %v1126_v18 = vpop.f32.mrf.mxu2  ;;  %v1187_v26 = vpop.f32.mrf.mxu0 }
 0x1a1   :  { %v1127_v22 = vadd.f32 %v1126_v18, %v1078_v11  ;;  %v1175_v23 = vpop.f32.mrf.mxu3  ;;  %v1188_v29 = vadd.f32 %v1187_v26, %v2732_v7  ;;  %v1236_v31 = vpop.f32.mrf.mxu1  ;;  %v58_v7 = vld [vmem:[%s3377_s0 + $0x160] sm:$0xff]  ;;  %v108_v18 = vld [vmem:[%s3377_s0 + $0x2f0] sm:$0xff] }
 0x1a2   :  { %v298_v24 = vpack.c.bf16 %v74_v45, %v58_v7 }
 0x1a3   :  { %v3095_v33 = vadd.f32 %v1175_v23, %v1127_v22  ;;  %v1237_v48 = vadd.f32 %v1236_v31, %v1188_v29  ;;  %1382 = vmatmul.bf16.vlgmr.msrb.gmra.mxu0 %v282_v30  ;;  %v93_v30 = vld [vmem:[%s3377_s0 + $0x278] sm:$0xff] }
 0x1a4   :  { %1431 = vmatmul.bf16.vlgmr.msrb.gmra.mxu1 %v283_v42  ;;  %v109_v22 = vld [vmem:[%s3377_s0 + $0x2f8] sm:$0xff] }
 0x1a5   :  { %1480 = vmatmul.bf16.vlgmr.msrb.gmra.mxu2 %v284_v27 }
 0x1a6   :  { %1529 = vmatmul.bf16.vlgmr.msrb.gmra.mxu3 %v285_v32  ;;  %v316_v32 = vpack.c.bf16 %v108_v18, %v92_v17  ;;  %v170_v18 = vld [vmem:[%s3377_s0 + $0x4e0] sm:$0xff] }
 0x1a8   :  { %v1285_v36 = vpop.f32.mrf.mxu2  ;;  %v1189_v34 = vpop.f32.mrf.mxu0 }
 0x1a9   :  { %v1286_v37 = vadd.f32 %v1285_v36, %v1237_v48  ;;  %v1334_v1 = vpop.f32.mrf.mxu3  ;;  %v1190_v39 = vadd.f32 %v1189_v34, %v2765_v35  ;;  %v1238_v43 = vpop.f32.mrf.mxu1  ;;  %v75_v35 = vld [vmem:[%s3377_s0 + $0x1e8] sm:$0xff] }
 0x1aa   :  { %v299_v60 = vpack.c.bf16 %v75_v35, %v59_v50 }
 0x1ab   :  { %v3098_v62 = vadd.f32 %v1334_v1, %v1286_v37  ;;  %v1239_v44 = vadd.f32 %v1238_v43, %v1190_v39  ;;  %v317_v37 = vpack.c.bf16 %v109_v22, %v93_v30  ;;  %v155_v30 = vld [vmem:[%s3377_s0 + $0x468] sm:$0xff]  ;;  %v156_v22 = vld [vmem:[%s3377_s0 + $0x470] sm:$0xff] }
 0x1b0   :  { %v1287_v53 = vpop.f32.mrf.mxu2  ;;  %v1192_v59 = vpop.f32.mrf.mxu0 }
 0x1b1   :  { %v1288_v54 = vadd.f32 %v1287_v53, %v1239_v44  ;;  %v1336_v58 = vpop.f32.mrf.mxu3  ;;  %v1193_v63 = vadd.f32 %v1192_v59, %v2786_v56  ;;  %v1241_v0 = vpop.f32.mrf.mxu1  ;;  %v90_v56 = vld [vmem:[%s3377_s0 + $0x260] sm:$0xff]  ;;  %v140_v53 = vld [vmem:[%s3377_s0 + $0x3f0] sm:$0xff] }
 0x1b2   :  { %v314_v26 = vpack.c.bf16 %v106_v15, %v90_v56 }
 0x1b3   :  { %v3125_v5 = vadd.f32 %v1336_v58, %v1288_v54  ;;  %v1242_v6 = vadd.f32 %v1241_v0, %v1193_v63  ;;  %1387 = vmatmul.bf16.gmra.mxu0 %v298_v24  ;;  %v125_v24 = vld [vmem:[%s3377_s0 + $0x378] sm:$0xff] }
 0x1b4   :  { %1436 = vmatmul.bf16.gmra.mxu1 %v299_v60  ;;  %v141_v54 = vld [vmem:[%s3377_s0 + $0x3f8] sm:$0xff] }
 0x1b5   :  { %1485 = vmatmul.bf16.gmra.mxu2 %v300_v3 }
 0x1b6   :  { %1534 = vmatmul.bf16.gmra.mxu3 %v301_v2  ;;  %v332_v2 = vpack.c.bf16 %v140_v53, %v124_v52  ;;  %v202_v53 = vld [vmem:[%s3377_s0 + $0x5e0] sm:$0xff] }
 0x1b8   :  { %v1290_v13 = vpop.f32.mrf.mxu2  ;;  %v1194_v19 = vpop.f32.mrf.mxu0 }
 0x1b9   :  { %v1291_v9 = vadd.f32 %v1290_v13, %v1242_v6  ;;  %v1339_v11 = vpop.f32.mrf.mxu3  ;;  %v1195_v21 = vadd.f32 %v1194_v19, %v2819_v20  ;;  %v1243_v12 = vpop.f32.mrf.mxu1  ;;  %v107_v20 = vld [vmem:[%s3377_s0 + $0x2e8] sm:$0xff] }
 0x1ba   :  { %v315_v31 = vpack.c.bf16 %v107_v20, %v91_v16 }
 0x1bb   :  { %v3128_v49 = vadd.f32 %v1339_v11, %v1291_v9  ;;  %v1244_v14 = vadd.f32 %v1243_v12, %v1195_v21  ;;  %v333_v9 = vpack.c.bf16 %v141_v54, %v125_v24  ;;  %v187_v24 = vld [vmem:[%s3377_s0 + $0x568] sm:$0xff]  ;;  %v188_v54 = vld [vmem:[%s3377_s0 + $0x570] sm:$0xff] }
 0x1c0   :  { %v1292_v23 = vpop.f32.mrf.mxu2  ;;  %v1197_v29 = vpop.f32.mrf.mxu0 }
 0x1c1   :  { %v1293_v42 = vadd.f32 %v1292_v23, %v1244_v14  ;;  %v1341_v27 = vpop.f32.mrf.mxu3  ;;  %v1198_v48 = vadd.f32 %v1197_v29, %v2840_v40  ;;  %v1246_v36 = vpop.f32.mrf.mxu1  ;;  %v122_v40 = vld [vmem:[%s3377_s0 + $0x360] sm:$0xff]  ;;  %v172_v23 = vld [vmem:[%s3377_s0 + $0x4f0] sm:$0xff] }
 0x1c2   :  { %v330_v59 = vpack.c.bf16 %v138_v4, %v122_v40 }
 0x1c3   :  { %v3155_v1 = vadd.f32 %v1341_v27, %v1293_v42  ;;  %v1247_v34 = vadd.f32 %v1246_v36, %v1198_v48  ;;  %1392 = vmatmul.bf16.gmra.mxu0 %v314_v26  ;;  %v157_v26 = vld [vmem:[%s3377_s0 + $0x478] sm:$0xff] }
 0x1c4   :  { %1441 = vmatmul.bf16.gmra.mxu1 %v315_v31  ;;  %v173_v42 = vld [vmem:[%s3377_s0 + $0x4f8] sm:$0xff] }
 0x1c5   :  { %1490 = vmatmul.bf16.gmra.mxu2 %v316_v32 }
 0x1c6   :  { %1539 = vmatmul.bf16.gmra.mxu3 %v317_v37  ;;  %v348_v37 = vpack.c.bf16 %v172_v23, %v156_v22  ;;  %v234_v23 = vld [vmem:[%s3377_s0 + $0x6e0] sm:$0xff] }
 0x1c8   :  { %v1295_v39 = vpop.f32.mrf.mxu2  ;;  %v1199_v7 = vpop.f32.mrf.mxu0 }
 0x1c9   :  { %v1296_v43 = vadd.f32 %v1295_v39, %v1247_v34  ;;  %v1344_v44 = vpop.f32.mrf.mxu3  ;;  %v1200_v45 = vadd.f32 %v1199_v7, %v2873_v8  ;;  %v1248_v50 = vpop.f32.mrf.mxu1  ;;  %v139_v8 = vld [vmem:[%s3377_s0 + $0x3e8] sm:$0xff] }
 0x1ca   :  { %v331_v0 = vpack.c.bf16 %v139_v8, %v123_v51 }
 0x1cb   :  { %v3158_v35 = vadd.f32 %v1344_v44, %v1296_v43  ;;  %v1249_v46 = vadd.f32 %v1248_v50, %v1200_v45  ;;  %v349_v43 = vpack.c.bf16 %v173_v42, %v157_v26  ;;  %v219_v26 = vld [vmem:[%s3377_s0 + $0x668] sm:$0xff]  ;;  %v220_v42 = vld [vmem:[%s3377_s0 + $0x670] sm:$0xff] }
 0x1d0   :  { %v1297_v58 = vpop.f32.mrf.mxu2  ;;  %v1202_v63 = vpop.f32.mrf.mxu0 }
 0x1d1   :  { %v1298_v60 = vadd.f32 %v1297_v58, %v1249_v46  ;;  %v1346_v3 = vpop.f32.mrf.mxu3  ;;  %v1203_v6 = vadd.f32 %v1202_v63, %v2894_v55  ;;  %v1251_v13 = vpop.f32.mrf.mxu1  ;;  %v154_v55 = vld [vmem:[%s3377_s0 + $0x460] sm:$0xff]  ;;  %v204_v58 = vld [vmem:[%s3377_s0 + $0x5f0] sm:$0xff] }
 0x1d2   :  { %v346_v29 = vpack.c.bf16 %v170_v18, %v154_v55 }
 0x1d3   :  { %v3185_v11 = vadd.f32 %v1346_v3, %v1298_v60  ;;  %v1252_v19 = vadd.f32 %v1251_v13, %v1203_v6  ;;  %1397 = vmatmul.bf16.gmra.mxu0 %v330_v59  ;;  %v189_v59 = vld [vmem:[%s3377_s0 + $0x578] sm:$0xff] }
 0x1d4   :  { %1446 = vmatmul.bf16.gmra.mxu1 %v331_v0  ;;  %v205_v60 = vld [vmem:[%s3377_s0 + $0x5f8] sm:$0xff] }
 0x1d5   :  { %1495 = vmatmul.bf16.gmra.mxu2 %v332_v2 }
 0x1d6   :  { %1544 = vmatmul.bf16.gmra.mxu3 %v333_v9  ;;  %v364_v9 = vpack.c.bf16 %v204_v58, %v188_v54  ;;  %v266_v58 = vld [vmem:[%s3377_s0 + $0x7e0] sm:$0xff] }
 0x1d8   :  { %v1300_v21 = vpop.f32.mrf.mxu2  ;;  %v1204_v56 = vpop.f32.mrf.mxu0 }
 0x1d9   :  { %v1301_v12 = vadd.f32 %v1300_v21, %v1252_v19  ;;  %v1349_v14 = vpop.f32.mrf.mxu3  ;;  %v1205_v15 = vadd.f32 %v1204_v56, %v2927_v57  ;;  %v1253_v16 = vpop.f32.mrf.mxu1  ;;  %v171_v57 = vld [vmem:[%s3377_s0 + $0x4e8] sm:$0xff] }
 0x1da   :  { %v347_v36 = vpack.c.bf16 %v171_v57, %v155_v30 }
 0x1db   :  { %v3188_v20 = vadd.f32 %v1349_v14, %v1301_v12  ;;  %v1254_v17 = vadd.f32 %v1253_v16, %v1205_v15  ;;  %v365_v12 = vpack.c.bf16 %v205_v60, %v189_v59  ;;  %v251_v59 = vld [vmem:[%s3377_s0 + $0x768] sm:$0xff]  ;;  %v252_v60 = vld [vmem:[%s3377_s0 + $0x770] sm:$0xff] }
 0x1e0   :  { %v1302_v27 = vpop.f32.mrf.mxu2  ;;  %v1207_v48 = vpop.f32.mrf.mxu0 }
 0x1e1   :  { %v1303_v31 = vadd.f32 %v1302_v27, %v1254_v17  ;;  %v1351_v32 = vpop.f32.mrf.mxu3  ;;  %v1208_v34 = vadd.f32 %v1207_v48, %v2948_v47  ;;  %v1256_v39 = vpop.f32.mrf.mxu1  ;;  %v186_v47 = vld [vmem:[%s3377_s0 + $0x560] sm:$0xff]  ;;  %v236_v27 = vld [vmem:[%s3377_s0 + $0x6f0] sm:$0xff] }
 0x1e2   :  { %v362_v63 = vpack.c.bf16 %v202_v53, %v186_v47 }
 0x1e3   :  { %v3215_v44 = vadd.f32 %v1351_v32, %v1303_v31  ;;  %v1257_v7 = vadd.f32 %v1256_v39, %v1208_v34  ;;  %1402 = vmatmul.bf16.gmra.mxu0 %v346_v29  ;;  %v221_v29 = vld [vmem:[%s3377_s0 + $0x678] sm:$0xff] }
 0x1e4   :  { %1451 = vmatmul.bf16.gmra.mxu1 %v347_v36  ;;  %v237_v31 = vld [vmem:[%s3377_s0 + $0x6f8] sm:$0xff] }
 0x1e5   :  { %1500 = vmatmul.bf16.gmra.mxu2 %v348_v37 }
 0x1e6   :  { %1549 = vmatmul.bf16.gmra.mxu3 %v349_v43  ;;  %v380_v43 = vpack.c.bf16 %v236_v27, %v220_v42 }
 0x1e8   :  { %v1305_v45 = vpop.f32.mrf.mxu2  ;;  %v1209_v40 = vpop.f32.mrf.mxu0 }
 0x1e9   :  { %v1306_v50 = vadd.f32 %v1305_v45, %v1257_v7  ;;  %v1354_v46 = vpop.f32.mrf.mxu3  ;;  %v1210_v4 = vadd.f32 %v1209_v40, %v2981_v41  ;;  %v1258_v51 = vpop.f32.mrf.mxu1  ;;  %v203_v41 = vld [vmem:[%s3377_s0 + $0x5e8] sm:$0xff] }
 0x1ea   :  { %v363_v13 = vpack.c.bf16 %v203_v41, %v187_v24 }
 0x1eb   :  { %v3218_v8 = vadd.f32 %v1354_v46, %v1306_v50  ;;  %v1259_v52 = vadd.f32 %v1258_v51, %v1210_v4  ;;  %v381_v50 = vpack.c.bf16 %v237_v31, %v221_v29 }
 0x1f0   :  { %v1307_v3 = vpop.f32.mrf.mxu2  ;;  %v1212_v6 = vpop.f32.mrf.mxu0 }
 0x1f1   :  { %v1308_v0 = vadd.f32 %v1307_v3, %v1259_v52  ;;  %v1356_v2 = vpop.f32.mrf.mxu3  ;;  %v1213_v19 = vadd.f32 %v1212_v6, %v3002_v25  ;;  %v1261_v21 = vpop.f32.mrf.mxu1  ;;  %v218_v25 = vld [vmem:[%s3377_s0 + $0x660] sm:$0xff]  ;;  %v268_v3 = vld [vmem:[%s3377_s0 + $0x7f0] sm:$0xff] }
 0x1f2   :  { %v378_v48 = vpack.c.bf16 %v234_v23, %v218_v25 }
 0x1f3   :  { %v3245_v14 = vadd.f32 %v1356_v2, %v1308_v0  ;;  %v1262_v56 = vadd.f32 %v1261_v21, %v1213_v19  ;;  %1407 = vmatmul.bf16.gmra.mxu0 %v362_v63  ;;  %v253_v63 = vld [vmem:[%s3377_s0 + $0x778] sm:$0xff] }
 0x1f4   :  { %1456 = vmatmul.bf16.gmra.mxu1 %v363_v13  ;;  %v269_v0 = vld [vmem:[%s3377_s0 + $0x7f8] sm:$0xff] }
 0x1f5   :  { %1505 = vmatmul.bf16.gmra.mxu2 %v364_v9 }
 0x1f6   :  { %1554 = vmatmul.bf16.gmra.mxu3 %v365_v12  ;;  %v396_v12 = vpack.c.bf16 %v268_v3, %v252_v60 }
 0x1f8   :  { %v1310_v15 = vpop.f32.mrf.mxu2  ;;  %v1214_v55 = vpop.f32.mrf.mxu0 }
 0x1f9   :  { %v1311_v16 = vadd.f32 %v1310_v15, %v1262_v56  ;;  %v1359_v17 = vpop.f32.mrf.mxu3  ;;  %v1215_v18 = vadd.f32 %v1214_v55, %v3035_v28  ;;  %v1263_v30 = vpop.f32.mrf.mxu1  ;;  %v235_v28 = vld [vmem:[%s3377_s0 + $0x6e8] sm:$0xff] }
 0x1fa   :  { %v379_v39 = vpack.c.bf16 %v235_v28, %v219_v26 }
 0x1fb   :  { %v3248_v57 = vadd.f32 %v1359_v17, %v1311_v16  ;;  %v1264_v22 = vadd.f32 %v1263_v30, %v1215_v18  ;;  %v397_v16 = vpack.c.bf16 %v269_v0, %v253_v63 }
 0x200   :  { %v1312_v32 = vpop.f32.mrf.mxu2  ;;  %v1217_v34 = vpop.f32.mrf.mxu0 }
 0x201   :  { %v1313_v36 = vadd.f32 %v1312_v32, %v1264_v22  ;;  %v1361_v37 = vpop.f32.mrf.mxu3  ;;  %v1218_v7 = vadd.f32 %v1217_v34, %v3038_v38  ;;  %v1266_v45 = vpop.f32.mrf.mxu1  ;;  %v250_v38 = vld [vmem:[%s3377_s0 + $0x760] sm:$0xff] }
 0x202   :  { %v394_v6 = vpack.c.bf16 %v266_v58, %v250_v38 }
 0x203   :  { %v3275_v46 = vadd.f32 %v1361_v37, %v1313_v36  ;;  %v1267_v40 = vadd.f32 %v1266_v45, %v1218_v7  ;;  %1412 = vmatmul.bf16.gmra.mxu0 %v378_v48 }
 0x204   :  { %1461 = vmatmul.bf16.gmra.mxu1 %v379_v39 }
 0x205   :  { %1510 = vmatmul.bf16.gmra.mxu2 %v380_v43 }
 0x206   :  { %1559 = vmatmul.bf16.gmra.mxu3 %v381_v50 }
 0x208   :  { %v1315_v4 = vpop.f32.mrf.mxu2  ;;  %v1219_v47 = vpop.f32.mrf.mxu0 }
 0x209   :  { %v1316_v51 = vadd.f32 %v1315_v4, %v1267_v40  ;;  %v1364_v52 = vpop.f32.mrf.mxu3  ;;  %v1220_v53 = vadd.f32 %v1219_v47, %v3065_v61  ;;  %v1268_v24 = vpop.f32.mrf.mxu1  ;;  %v267_v61 = vld [vmem:[%s3377_s0 + $0x7e8] sm:$0xff] }
 0x20a   :  { %v395_v21 = vpack.c.bf16 %v267_v61, %v251_v59 }
 0x20b   :  { %v3278_v41 = vadd.f32 %v1364_v52, %v1316_v51  ;;  %v1269_v54 = vadd.f32 %v1268_v24, %v1220_v53 }
 0x210   :  { %v1317_v2 = vpop.f32.mrf.mxu2  ;;  %v1222_v19 = vpop.f32.mrf.mxu0 }
 0x211   :  { %v1318_v13 = vadd.f32 %v1317_v2, %v1269_v54  ;;  %v1366_v9 = vpop.f32.mrf.mxu3  ;;  %v1223_v56 = vadd.f32 %v1222_v19, %v3068_v10  ;;  %v1271_v15 = vpop.f32.mrf.mxu1 }
 0x213   :  { %v3305_v17 = vadd.f32 %v1366_v9, %v1318_v13  ;;  %v1272_v55 = vadd.f32 %v1271_v15, %v1223_v56  ;;  %1417 = vmatmul.bf16.gmra.mxu0 %v394_v6 }
 0x214   :  { %1466 = vmatmul.bf16.gmra.mxu1 %v395_v21 }
 0x215   :  { %1515 = vmatmul.bf16.gmra.mxu2 %v396_v12 }
 0x216   :  { %1564 = vmatmul.bf16.gmra.mxu3 %v397_v16 }
 0x218   :  { %v1320_v18 = vpop.f32.mrf.mxu2  ;;  %v1224_v25 = vpop.f32.mrf.mxu0 }
 0x219   :  { %v1321_v30 = vadd.f32 %v1320_v18, %v1272_v55  ;;  %v1369_v22 = vpop.f32.mrf.mxu3  ;;  %v1225_v23 = vadd.f32 %v1224_v25, %v3095_v33  ;;  %v1273_v26 = vpop.f32.mrf.mxu1 }
 0x21b   :  { %v3308_v28 = vadd.f32 %v1369_v22, %v1321_v30  ;;  %v1274_v42 = vadd.f32 %v1273_v26, %v1225_v23 }
 0x220   :  { %v1322_v10 = vpop.f32.mrf.mxu2  ;;  %v1383_v31 = vpop.f32.mrf.mxu0 }
 0x221   :  { %v1323_v27 = vadd.f32 %v1322_v10, %v1274_v42  ;;  %v1371_v29 = vpop.f32.mrf.mxu3  ;;  %v1432_v32 = vpop.f32.mrf.mxu1  ;;  %v1384_v36 = vadd.f32 %v1383_v31, %v3098_v62 }
 0x223   :  { %v3310_v48 = vadd.f32 %v1371_v29, %v1323_v27  ;;  %v1433_v37 = vadd.f32 %v1432_v32, %v1384_v36 }
 0x228   :  { %v1481_v34 = vpop.f32.mrf.mxu2  ;;  %v1385_v7 = vpop.f32.mrf.mxu0 }
 0x229   :  { %v1482_v39 = vadd.f32 %v1481_v34, %v1433_v37  ;;  %v1530_v43 = vpop.f32.mrf.mxu3  ;;  %v1434_v45 = vpop.f32.mrf.mxu1  ;;  %v1386_v50 = vadd.f32 %v1385_v7, %v3125_v5 }
 0x22b   :  { %v1531_v33 = vadd.f32 %v1530_v43, %v1482_v39  ;;  %v1435_v4 = vadd.f32 %v1434_v45, %v1386_v50 }
 0x22d   :  { %v1570_v40 = vmax.f32 %v1531_v33, 0.0 }
 0x22f   :  { %1586 = vst [vmem:[%s3379_s3] sm:$0xff] %v1570_v40 }
 0x230   :  { %v1483_v51 = vpop.f32.mrf.mxu2  ;;  %v1388_v53 = vpop.f32.mrf.mxu0 }
 0x231   :  { %v1484_v52 = vadd.f32 %v1483_v51, %v1435_v4  ;;  %v1532_v47 = vpop.f32.mrf.mxu3  ;;  %v1437_v62 = vpop.f32.mrf.mxu1  ;;  %v1389_v54 = vadd.f32 %v1388_v53, %v3128_v49 }
 0x233   :  { %v1533_v24 = vadd.f32 %v1532_v47, %v1484_v52  ;;  %v1438_v5 = vadd.f32 %v1437_v62, %v1389_v54 }
 0x235   :  { %v1571_v38 = vmax.f32 %v1533_v24, 0.0 }
 0x237   :  { %1587 = vst [vmem:[%s3379_s3 + $0x8] sm:$0xff] %v1571_v38 }
 0x238   :  { %v1486_v58 = vpop.f32.mrf.mxu2  ;;  %v1390_v60 = vpop.f32.mrf.mxu0 }
 0x239   :  { %v1487_v59 = vadd.f32 %v1486_v58, %v1438_v5  ;;  %v1535_v61 = vpop.f32.mrf.mxu3  ;;  %v1439_v3 = vpop.f32.mrf.mxu1  ;;  %v1391_v0 = vadd.f32 %v1390_v60, %v3155_v1 }
 0x23b   :  { %v1536_v63 = vadd.f32 %v1535_v61, %v1487_v59  ;;  %v1440_v49 = vadd.f32 %v1439_v3, %v1391_v0 }
 0x23d   :  { %v1572_v2 = vmax.f32 %v1536_v63, 0.0 }
 0x23f   :  { %1588 = vst [vmem:[%s3379_s3 + $0x10] sm:$0xff] %v1572_v2 }
 0x240   :  { %v1488_v6 = vpop.f32.mrf.mxu2  ;;  %v1393_v19 = vpop.f32.mrf.mxu0 }
 0x241   :  { %v1489_v13 = vadd.f32 %v1488_v6, %v1440_v49  ;;  %v1537_v9 = vpop.f32.mrf.mxu3  ;;  %v1442_v21 = vpop.f32.mrf.mxu1  ;;  %v1394_v56 = vadd.f32 %v1393_v19, %v3158_v35 }
 0x243   :  { %v1538_v12 = vadd.f32 %v1537_v9, %v1489_v13  ;;  %v1443_v1 = vadd.f32 %v1442_v21, %v1394_v56 }
 0x245   :  { %v1573_v15 = vmax.f32 %v1538_v12, 0.0 }
 0x247   :  { %1589 = vst [vmem:[%s3379_s3 + $0x18] sm:$0xff] %v1573_v15 }
 0x248   :  { %v1491_v16 = vpop.f32.mrf.mxu2  ;;  %v1395_v30 = vpop.f32.mrf.mxu0 }
 0x249   :  { %v1492_v55 = vadd.f32 %v1491_v16, %v1443_v1  ;;  %v1540_v18 = vpop.f32.mrf.mxu3  ;;  %v1444_v22 = vpop.f32.mrf.mxu1  ;;  %v1396_v23 = vadd.f32 %v1395_v30, %v3185_v11 }
 0x24b   :  { %v1541_v25 = vadd.f32 %v1540_v18, %v1492_v55  ;;  %v1445_v35 = vadd.f32 %v1444_v22, %v1396_v23 }
 0x24d   :  { %v1574_v26 = vmax.f32 %v1541_v25, 0.0 }
 0x24f   :  { %1590 = vst [vmem:[%s3379_s3 + $0x20] sm:$0xff] %v1574_v26 }
 0x250   :  { %v1493_v42 = vpop.f32.mrf.mxu2  ;;  %v1398_v29 = vpop.f32.mrf.mxu0 }
 0x251   :  { %v1494_v10 = vadd.f32 %v1493_v42, %v1445_v35  ;;  %v1542_v27 = vpop.f32.mrf.mxu3  ;;  %v1447_v31 = vpop.f32.mrf.mxu1  ;;  %v1399_v36 = vadd.f32 %v1398_v29, %v3188_v20 }
 0x253   :  { %v1543_v32 = vadd.f32 %v1542_v27, %v1494_v10  ;;  %v1448_v11 = vadd.f32 %v1447_v31, %v1399_v36 }
 0x255   :  { %v1575_v37 = vmax.f32 %v1543_v32, 0.0 }
 0x257   :  { %1591 = vst [vmem:[%s3379_s3 + $0x28] sm:$0xff] %v1575_v37 }
 0x258   :  { %v1496_v34 = vpop.f32.mrf.mxu2  ;;  %v1400_v7 = vpop.f32.mrf.mxu0 }
 0x259   :  { %v1497_v39 = vadd.f32 %v1496_v34, %v1448_v11  ;;  %v1545_v43 = vpop.f32.mrf.mxu3  ;;  %v1449_v45 = vpop.f32.mrf.mxu1  ;;  %v1401_v50 = vadd.f32 %v1400_v7, %v3215_v44 }
 0x25b   :  { %v1546_v33 = vadd.f32 %v1545_v43, %v1497_v39  ;;  %v1450_v20 = vadd.f32 %v1449_v45, %v1401_v50 }
 0x25d   :  { %v1576_v40 = vmax.f32 %v1546_v33, 0.0 }
 0x25f   :  { %1592 = vst [vmem:[%s3379_s3 + $0x30] sm:$0xff] %v1576_v40 }
 0x260   :  { %v1498_v4 = vpop.f32.mrf.mxu2  ;;  %v1403_v47 = vpop.f32.mrf.mxu0 }
 0x261   :  { %v1499_v51 = vadd.f32 %v1498_v4, %v1450_v20  ;;  %v1547_v52 = vpop.f32.mrf.mxu3  ;;  %v1452_v53 = vpop.f32.mrf.mxu1  ;;  %v1404_v24 = vadd.f32 %v1403_v47, %v3218_v8 }
 0x263   :  { %v1548_v62 = vadd.f32 %v1547_v52, %v1499_v51  ;;  %v1453_v44 = vadd.f32 %v1452_v53, %v1404_v24 }
 0x265   :  { %v1577_v54 = vmax.f32 %v1548_v62, 0.0 }
 0x267   :  { %1593 = vst [vmem:[%s3379_s3 + $0x38] sm:$0xff] %v1577_v54 }
 0x268   :  { %v1501_v38 = vpop.f32.mrf.mxu2  ;;  %v1405_v59 = vpop.f32.mrf.mxu0 }
 0x269   :  { %v1502_v5 = vadd.f32 %v1501_v38, %v1453_v44  ;;  %v1550_v58 = vpop.f32.mrf.mxu3  ;;  %v1454_v61 = vpop.f32.mrf.mxu1  ;;  %v1406_v3 = vadd.f32 %v1405_v59, %v3245_v14 }
 0x26b   :  { %v1551_v60 = vadd.f32 %v1550_v58, %v1502_v5  ;;  %v1455_v8 = vadd.f32 %v1454_v61, %v1406_v3 }
 0x26d   :  { %v1578_v63 = vmax.f32 %v1551_v60, 0.0 }
 0x26f   :  { %1594 = vst [vmem:[%s3379_s3 + $0x40] sm:$0xff] %v1578_v63 }
 0x270   :  { %v1503_v0 = vpop.f32.mrf.mxu2  ;;  %v1408_v6 = vpop.f32.mrf.mxu0 }
 0x271   :  { %v1504_v2 = vadd.f32 %v1503_v0, %v1455_v8  ;;  %v1552_v49 = vpop.f32.mrf.mxu3  ;;  %v1457_v13 = vpop.f32.mrf.mxu1  ;;  %v1409_v19 = vadd.f32 %v1408_v6, %v3248_v57 }
 0x273   :  { %v1553_v9 = vadd.f32 %v1552_v49, %v1504_v2  ;;  %v1458_v14 = vadd.f32 %v1457_v13, %v1409_v19 }
 0x275   :  { %v1579_v21 = vmax.f32 %v1553_v9, 0.0 }
 0x277   :  { %1595 = vst [vmem:[%s3379_s3 + $0x48] sm:$0xff] %v1579_v21 }
 0x278   :  { %v1506_v12 = vpop.f32.mrf.mxu2  ;;  %v1410_v1 = vpop.f32.mrf.mxu0 }
 0x279   :  { %v1507_v56 = vadd.f32 %v1506_v12, %v1458_v14  ;;  %v1555_v15 = vpop.f32.mrf.mxu3  ;;  %v1459_v16 = vpop.f32.mrf.mxu1  ;;  %v1411_v18 = vadd.f32 %v1410_v1, %v3275_v46 }
 0x27b   :  { %v1556_v55 = vadd.f32 %v1555_v15, %v1507_v56  ;;  %v1460_v57 = vadd.f32 %v1459_v16, %v1411_v18 }
 0x27d   :  { %v1580_v30 = vmax.f32 %v1556_v55, 0.0 }
 0x27f   :  { %1596 = vst [vmem:[%s3379_s3 + $0x50] sm:$0xff] %v1580_v30 }
 0x280   :  { %v1508_v22 = vpop.f32.mrf.mxu2  ;;  %v1413_v26 = vpop.f32.mrf.mxu0 }
 0x281   :  { %v1509_v25 = vadd.f32 %v1508_v22, %v1460_v57  ;;  %v1557_v23 = vpop.f32.mrf.mxu3  ;;  %v1462_v35 = vpop.f32.mrf.mxu1  ;;  %v1414_v10 = vadd.f32 %v1413_v26, %v3278_v41 }
 0x283   :  { %v1558_v42 = vadd.f32 %v1557_v23, %v1509_v25  ;;  %v1463_v46 = vadd.f32 %v1462_v35, %v1414_v10 }
 0x285   :  { %v1581_v27 = vmax.f32 %v1558_v42, 0.0 }
 0x287   :  { %1597 = vst [vmem:[%s3379_s3 + $0x58] sm:$0xff] %v1581_v27 }
 0x288   :  { %v1511_v29 = vpop.f32.mrf.mxu2  ;;  %v1415_v36 = vpop.f32.mrf.mxu0 }
 0x289   :  { %v1512_v31 = vadd.f32 %v1511_v29, %v1463_v46  ;;  %v1560_v32 = vpop.f32.mrf.mxu3  ;;  %v1464_v37 = vpop.f32.mrf.mxu1  ;;  %v1416_v34 = vadd.f32 %v1415_v36, %v3305_v17 }
 0x28b   :  { %v1561_v11 = vadd.f32 %v1560_v32, %v1512_v31  ;;  %v1465_v41 = vadd.f32 %v1464_v37, %v1416_v34 }
 0x28d   :  { %v1582_v39 = vmax.f32 %v1561_v11, 0.0 }
 0x28f   :  { %1598 = vst [vmem:[%s3379_s3 + $0x60] sm:$0xff] %v1582_v39 }
 0x290   :  { %v1513_v43 = vpop.f32.mrf.mxu2  ;;  %v1418_v33 = vpop.f32.mrf.mxu0 }
 0x291   :  { %v1514_v7 = vadd.f32 %v1513_v43, %v1465_v41  ;;  %v1562_v45 = vpop.f32.mrf.mxu3  ;;  %v1419_v40 = vadd.f32 %v1418_v33, %v3308_v28  ;;  %v1467_v20 = vpop.f32.mrf.mxu1 }
 0x293   :  { %v1563_v50 = vadd.f32 %v1562_v45, %v1514_v7  ;;  %v1468_v17 = vadd.f32 %v1467_v20, %v1419_v40 }
 0x295   :  { %v1583_v4 = vmax.f32 %v1563_v50, 0.0 }
 0x297   :  { %1599 = vst [vmem:[%s3379_s3 + $0x68] sm:$0xff] %v1583_v4 }
 0x298   :  { %v1516_v51 = vpop.f32.mrf.mxu2  ;;  %v1420_v53 = vpop.f32.mrf.mxu0 }
 0x299   :  { %v1517_v52 = vadd.f32 %v1516_v51, %v1468_v17  ;;  %v1565_v47 = vpop.f32.mrf.mxu3  ;;  %v1421_v24 = vadd.f32 %v1420_v53, %v3310_v48  ;;  %v1469_v44 = vpop.f32.mrf.mxu1 }
 0x29b   :  { %v1566_v62 = vadd.f32 %v1565_v47, %v1517_v52  ;;  %v1470_v28 = vadd.f32 %v1469_v44, %v1421_v24 }
 0x29d   :  { %v1584_v54 = vmax.f32 %v1566_v62, 0.0 }
 0x29f   :  { %1600 = vst [vmem:[%s3379_s3 + $0x70] sm:$0xff] %v1584_v54 }
 0x2a0   :  { %v1518_v38 = vpop.f32.mrf.mxu2 }
 0x2a1   :  { %v1519_v5 = vadd.f32 %v1518_v38, %v1470_v28  ;;  %v1567_v58 = vpop.f32.mrf.mxu3 }
 0x2a3   :  { %v1568_v59 = vadd.f32 %v1567_v58, %v1519_v5 }
 0x2a5   :  { %v1585_v61 = vmax.f32 %v1568_v59, 0.0 }
 0x2a7   :  { %1601 = vst [vmem:[%s3379_s3 + $0x78] sm:$0xff] %v1585_v61 }

// kernel: unet_with_attention.9
= control target key start
LH: loop header
LB: loop body
LE: loop exit
PB: predicated region body
PF: predicated region fallthrough
CT: control target
= control target key end

     0   :  { %s1704_s12 = smov 0   ;;  %s2537_s0 = inlined_call_operand.vmem [shape: f32[512,1024], index: 0, kind: input, shape index: {}]   ;;  %s2538_s1 = inlined_call_operand.vmem [shape: f32[1024,128], index: 1, kind: input, shape index: {}]   ;;  %s2539_s2 = inlined_call_operand.vmem [shape: f32[1,128], index: 2, kind: input, shape index: {}]   ;;  %s2540_s3 = inlined_call_operand.vmem [shape: f32[512,128], index: 3, kind: output, shape index: {}]  }
   0x1 LB: > { %s1589_s13 = sadd.s32 4294967295, %s1682_s12   ;;  %p1593_p0 = scmp.ge.s32.totalorder %s1682_s12, 1  ;;  %s1682_s12 = sphi %s1704_s12, %s13_s12  }
   0x2   : > { %p139_p1 = scmp.lt.s32.totalorder %s1682_s12, 3 }
   0x4   : > { %p140_p2 = pnand %p1593_p0, %p139_p1 }
   0x5   : > { %s1594_s18 = sshll.u32 (!%p140_p2), %s1589_s13, 5 }
   0x6   : > { %143 = sbr.rel (%p140_p2) target bundleno = 695 (0x2b7), region = 32  ;;  %p165_p3 = scmp.lt.s32.totalorder (!%p140_p2), %s1594_s18, 63 }
   0xb   : > { %v575_v0 = vld [vmem:[%s2538_s1 + $0x70] sm:$0xff]  ;;  %v576_v1 = vld [vmem:[%s2538_s1 + $0x78] sm:$0xff]  ;;  %v573_v11 = vld [vmem:[%s2538_s1 + $0x60] sm:$0xff]  ;;  %s2542_s18 = smov (!%p165_p3, %s1594_s18), 63 }
   0xc   : > { %v591_v2 = vld [vmem:[%s2538_s1 + $0xf0] sm:$0xff]  ;;  %v696_v3 = vpack.c.bf16 %v576_v1, %v575_v0  ;;  %v592_v4 = vld [vmem:[%s2538_s1 + $0xf8] sm:$0xff]  ;;  %v574_v13 = vld [vmem:[%s2538_s1 + $0x68] sm:$0xff]  ;;  %s1601_s8 = sshll.u32 %s2542_s18, 6  ;;  %s1598_s7 = sshll.u32 %s2542_s18, 3 }
   0xd   : > { %v607_v5 = vld [vmem:[%s2538_s1 + $0x170] sm:$0xff]  ;;  %v608_v6 = vld [vmem:[%s2538_s1 + $0x178] sm:$0xff]  ;;  %v704_v7 = vpack.c.bf16 %v592_v4, %v591_v2  ;;  %v589_v14 = vld [vmem:[%s2538_s1 + $0xe0] sm:$0xff]  ;;  %v695_v16 = vpack.c.bf16 %v574_v13, %v573_v11  ;;  %s1892_s4 = scalar_lea.vmem %s2537_s0, %s1601_s8  ;;  %s2422_s11 = scalar_lea.vmem %s2540_s3, %s1598_s7 }
   0xe   : > { %v712_v8 = vpack.c.bf16 %v608_v6, %v607_v5  ;;  %v623_v9 = vld [vmem:[%s2538_s1 + $0x1f0] sm:$0xff]  ;;  %v624_v10 = vld [vmem:[%s2538_s1 + $0x1f8] sm:$0xff]  ;;  %757 = vmatpush.bf16.msra.mxu0 %v696_v3  ;;  %v590_v15 = vld [vmem:[%s2538_s1 + $0xe8] sm:$0xff] }
   0xf   : > { %v720_v12 = vpack.c.bf16 %v624_v10, %v623_v9  ;;  %846 = vmatpush.bf16.msra.mxu1 %v704_v7  ;;  %v703_v17 = vpack.c.bf16 %v590_v15, %v589_v14  ;;  %v605_v18 = vld [vmem:[%s2538_s1 + $0x160] sm:$0xff]  ;;  %v606_v19 = vld [vmem:[%s2538_s1 + $0x168] sm:$0xff]  ;;  %v571_v23 = vld [vmem:[%s2538_s1 + $0x50] sm:$0xff] }
  0x10   : > { %935 = vmatpush.bf16.msra.mxu2 %v712_v8  ;;  %v621_v20 = vld [vmem:[%s2538_s1 + $0x1e0] sm:$0xff]  ;;  %v711_v21 = vpack.c.bf16 %v606_v19, %v605_v18  ;;  %v622_v22 = vld [vmem:[%s2538_s1 + $0x1e8] sm:$0xff]  ;;  %v572_v24 = vld [vmem:[%s2538_s1 + $0x58] sm:$0xff] }
  0x11   : > { %1024 = vmatpush.bf16.msra.mxu3 %v720_v12  ;;  %v719_v25 = vpack.c.bf16 %v622_v22, %v621_v20  ;;  %v587_v26 = vld [vmem:[%s2538_s1 + $0xd0] sm:$0xff]  ;;  %v588_v27 = vld [vmem:[%s2538_s1 + $0xd8] sm:$0xff]  ;;  %v694_v29 = vpack.c.bf16 %v572_v24, %v571_v23  ;;  %v569_v35 = vld [vmem:[%s2538_s1 + $0x40] sm:$0xff] }
  0x12   : > { %v603_v28 = vld [vmem:[%s2538_s1 + $0x150] sm:$0xff]  ;;  %758 = vmatpush.bf16.msra.mxu0 %v695_v16  ;;  %v604_v30 = vld [vmem:[%s2538_s1 + $0x158] sm:$0xff]  ;;  %v702_v33 = vpack.c.bf16 %v588_v27, %v587_v26  ;;  %v570_v36 = vld [vmem:[%s2538_s1 + $0x48] sm:$0xff] }
  0x13   : > { %v619_v31 = vld [vmem:[%s2538_s1 + $0x1d0] sm:$0xff]  ;;  %v620_v32 = vld [vmem:[%s2538_s1 + $0x1d8] sm:$0xff]  ;;  %847 = vmatpush.bf16.msra.mxu1 %v703_v17  ;;  %v710_v34 = vpack.c.bf16 %v604_v30, %v603_v28  ;;  %v585_v37 = vld [vmem:[%s2538_s1 + $0xc0] sm:$0xff]  ;;  %v693_v44 = vpack.c.bf16 %v570_v36, %v569_v35 }
  0x14   : > { %936 = vmatpush.bf16.msra.mxu2 %v711_v21  ;;  %v718_v38 = vpack.c.bf16 %v620_v32, %v619_v31  ;;  %v586_v39 = vld [vmem:[%s2538_s1 + $0xc8] sm:$0xff]  ;;  %v601_v40 = vld [vmem:[%s2538_s1 + $0x140] sm:$0xff]  ;;  %v567_v47 = vld [vmem:[%s2538_s1 + $0x30] sm:$0xff] }
  0x15   : > { %1025 = vmatpush.bf16.msra.mxu3 %v719_v25  ;;  %v602_v41 = vld [vmem:[%s2538_s1 + $0x148] sm:$0xff]  ;;  %v617_v42 = vld [vmem:[%s2538_s1 + $0x1c0] sm:$0xff]  ;;  %v701_v45 = vpack.c.bf16 %v586_v39, %v585_v37  ;;  %v568_v48 = vld [vmem:[%s2538_s1 + $0x38] sm:$0xff] }
  0x16   : > { %v618_v43 = vld [vmem:[%s2538_s1 + $0x1c8] sm:$0xff]  ;;  %759 = vmatpush.bf16.msra.mxu0 %v694_v29  ;;  %v709_v46 = vpack.c.bf16 %v602_v41, %v601_v40  ;;  %v583_v49 = vld [vmem:[%s2538_s1 + $0xb0] sm:$0xff]  ;;  %v584_v51 = vld [vmem:[%s2538_s1 + $0xb8] sm:$0xff]  ;;  %v692_v56 = vpack.c.bf16 %v568_v48, %v567_v47 }
  0x17   : > { %848 = vmatpush.bf16.msra.mxu1 %v702_v33  ;;  %v717_v50 = vpack.c.bf16 %v618_v43, %v617_v42  ;;  %v599_v52 = vld [vmem:[%s2538_s1 + $0x130] sm:$0xff]  ;;  %v600_v53 = vld [vmem:[%s2538_s1 + $0x138] sm:$0xff]  ;;  %v700_v57 = vpack.c.bf16 %v584_v51, %v583_v49  ;;  %v565_v59 = vld [vmem:[%s2538_s1 + $0x20] sm:$0xff] }
  0x18   : > { %937 = vmatpush.bf16.msra.mxu2 %v710_v34  ;;  %v615_v54 = vld [vmem:[%s2538_s1 + $0x1b0] sm:$0xff]  ;;  %v616_v55 = vld [vmem:[%s2538_s1 + $0x1b8] sm:$0xff]  ;;  %v708_v58 = vpack.c.bf16 %v600_v53, %v599_v52  ;;  %v566_v60 = vld [vmem:[%s2538_s1 + $0x28] sm:$0xff] }
  0x19   : > { %1026 = vmatpush.bf16.msra.mxu3 %v718_v38  ;;  %v581_v61 = vld [vmem:[%s2538_s1 + $0xa0] sm:$0xff]  ;;  %v716_v62 = vpack.c.bf16 %v616_v55, %v615_v54  ;;  %v582_v63 = vld [vmem:[%s2538_s1 + $0xa8] sm:$0xff]  ;;  %v691_v4 = vpack.c.bf16 %v566_v60, %v565_v59  ;;  %v563_v7 = vld [vmem:[%s2538_s1 + $0x10] sm:$0xff] }
  0x1a   : > { %760 = vmatpush.bf16.msra.mxu0 %v693_v44  ;;  %v597_v0 = vld [vmem:[%s2538_s1 + $0x120] sm:$0xff]  ;;  %v598_v1 = vld [vmem:[%s2538_s1 + $0x128] sm:$0xff]  ;;  %v699_v5 = vpack.c.bf16 %v582_v63, %v581_v61  ;;  %v564_v8 = vld [vmem:[%s2538_s1 + $0x18] sm:$0xff] }
  0x1b   : > { %849 = vmatpush.bf16.msra.mxu1 %v701_v45  ;;  %v613_v2 = vld [vmem:[%s2538_s1 + $0x1a0] sm:$0xff]  ;;  %v614_v3 = vld [vmem:[%s2538_s1 + $0x1a8] sm:$0xff]  ;;  %v707_v6 = vpack.c.bf16 %v598_v1, %v597_v0  ;;  %v579_v9 = vld [vmem:[%s2538_s1 + $0x90] sm:$0xff]  ;;  %v690_v17 = vpack.c.bf16 %v564_v8, %v563_v7 }
  0x1c   : > { %938 = vmatpush.bf16.msra.mxu2 %v709_v46  ;;  %v715_v10 = vpack.c.bf16 %v614_v3, %v613_v2  ;;  %v580_v11 = vld [vmem:[%s2538_s1 + $0x98] sm:$0xff]  ;;  %v595_v12 = vld [vmem:[%s2538_s1 + $0x110] sm:$0xff]  ;;  %v561_v16 = vld [vmem:[%s2538_s1] sm:$0xff] }
  0x1d   : > { %1027 = vmatpush.bf16.msra.mxu3 %v717_v50  ;;  %v596_v13 = vld [vmem:[%s2538_s1 + $0x118] sm:$0xff]  ;;  %v611_v14 = vld [vmem:[%s2538_s1 + $0x190] sm:$0xff]  ;;  %v562_v18 = vld [vmem:[%s2538_s1 + $0x8] sm:$0xff]  ;;  %v698_v21 = vpack.c.bf16 %v580_v11, %v579_v9 }
  0x1e   : > { %761 = vmatpush.bf16.msra.mxu0 %v692_v56  ;;  %v612_v15 = vld [vmem:[%s2538_s1 + $0x198] sm:$0xff]  ;;  %v577_v19 = vld [vmem:[%s2538_s1 + $0x80] sm:$0xff]  ;;  %v578_v20 = vld [vmem:[%s2538_s1 + $0x88] sm:$0xff]  ;;  %v706_v22 = vpack.c.bf16 %v596_v13, %v595_v12  ;;  %v689_v33 = vpack.c.bf16 %v562_v18, %v561_v16 }
  0x1f   : > { %850 = vmatpush.bf16.msra.mxu1 %v700_v57  ;;  %v593_v23 = vld [vmem:[%s2538_s1 + $0x100] sm:$0xff]  ;;  %v594_v24 = vld [vmem:[%s2538_s1 + $0x108] sm:$0xff]  ;;  %v714_v26 = vpack.c.bf16 %v612_v15, %v611_v14  ;;  %v671_v31 = vld [vmem:[%s2538_s1 + $0x370] sm:$0xff]  ;;  %v697_v37 = vpack.c.bf16 %v578_v20, %v577_v19 }
  0x20   : > { %939 = vmatpush.bf16.msra.mxu2 %v708_v58  ;;  %v609_v25 = vld [vmem:[%s2538_s1 + $0x180] sm:$0xff]  ;;  %v610_v27 = vld [vmem:[%s2538_s1 + $0x188] sm:$0xff]  ;;  %v672_v32 = vld [vmem:[%s2538_s1 + $0x378] sm:$0xff]  ;;  %v705_v38 = vpack.c.bf16 %v594_v24, %v593_v23 }
  0x21   : > { %1028 = vmatpush.bf16.msra.mxu3 %v716_v62  ;;  %v177_v28 = vld [vmem:[%s1892_s4] sm:$0xff]  ;;  %v178_v30 = vld [vmem:[%s1892_s4 + $0x8] sm:$0xff]  ;;  %v687_v35 = vld [vmem:[%s2538_s1 + $0x3f0] sm:$0xff]  ;;  %v713_v42 = vpack.c.bf16 %v610_v27, %v609_v25  ;;  %v744_v44 = vpack.c.bf16 %v672_v32, %v671_v31 }
  0x22   : > { %762 = vmatpush.bf16.msra.mxu0 %v691_v4  ;;  %v185_v29 = vld [vmem:[%s1892_s4 + $0x40] sm:$0xff]  ;;  %v186_v34 = vld [vmem:[%s1892_s4 + $0x48] sm:$0xff]  ;;  %v688_v36 = vld [vmem:[%s2538_s1 + $0x3f8] sm:$0xff] }
  0x23   : > { %851 = vmatpush.bf16.msra.mxu1 %v699_v5  ;;  %v179_v39 = vld [vmem:[%s1892_s4 + $0x10] sm:$0xff]  ;;  %v180_v41 = vld [vmem:[%s1892_s4 + $0x18] sm:$0xff]  ;;  %v433_v47 = vpack.c.bf16 %v185_v29, %v177_v28  ;;  %v752_v48 = vpack.c.bf16 %v688_v36, %v687_v35  ;;  %v434_v51 = vpack.c.bf16 %v186_v34, %v178_v30  ;;  %v669_v56 = vld [vmem:[%s2538_s1 + $0x360] sm:$0xff] }
  0x24   : > { %940 = vmatpush.bf16.msra.mxu2 %v707_v6  ;;  %v187_v40 = vld [vmem:[%s1892_s4 + $0x50] sm:$0xff]  ;;  %v188_v43 = vld [vmem:[%s1892_s4 + $0x58] sm:$0xff]  ;;  %v670_v57 = vld [vmem:[%s2538_s1 + $0x368] sm:$0xff] }
  0x25   : > { %1029 = vmatpush.bf16.msra.mxu3 %v715_v10  ;;  %v639_v45 = vld [vmem:[%s2538_s1 + $0x270] sm:$0xff]  ;;  %v640_v46 = vld [vmem:[%s2538_s1 + $0x278] sm:$0xff]  ;;  %v435_v52 = vpack.c.bf16 %v187_v40, %v179_v39  ;;  %v436_v53 = vpack.c.bf16 %v188_v43, %v180_v41  ;;  %v637_v58 = vld [vmem:[%s2538_s1 + $0x260] sm:$0xff]  ;;  %v743_v59 = vpack.c.bf16 %v670_v57, %v669_v56 }
  0x26   : > { %763 = vmatpush.bf16.msra.mxu0 %v690_v17  ;;  %v655_v49 = vld [vmem:[%s2538_s1 + $0x2f0] sm:$0xff]  ;;  %v656_v50 = vld [vmem:[%s2538_s1 + $0x2f8] sm:$0xff]  ;;  %v728_v54 = vpack.c.bf16 %v640_v46, %v639_v45  ;;  %v638_v60 = vld [vmem:[%s2538_s1 + $0x268] sm:$0xff] }
  0x27   : > { %852 = vmatpush.bf16.msra.mxu1 %v698_v21  ;;  %v736_v55 = vpack.c.bf16 %v656_v50, %v655_v49  ;;  %v685_v61 = vld [vmem:[%s2538_s1 + $0x3e0] sm:$0xff]  ;;  %v686_v62 = vld [vmem:[%s2538_s1 + $0x3e8] sm:$0xff]  ;;  %v727_v63 = vpack.c.bf16 %v638_v60, %v637_v58  ;;  %v195_v8 = vld [vmem:[%s1892_s4 + $0x90] sm:$0xff] }
  0x28   : > { %941 = vmatpush.bf16.msra.mxu2 %v706_v22  ;;  %v751_v0 = vpack.c.bf16 %v686_v62, %v685_v61  ;;  %v653_v1 = vld [vmem:[%s2538_s1 + $0x2e0] sm:$0xff]  ;;  %v654_v2 = vld [vmem:[%s2538_s1 + $0x2e8] sm:$0xff]  ;;  %v203_v9 = vld [vmem:[%s1892_s4 + $0xd0] sm:$0xff] }
  0x29   : > { %1030 = vmatpush.bf16.msra.mxu3 %v714_v26  ;;  %v735_v3 = vpack.c.bf16 %v654_v2, %v653_v1  ;;  %v193_v4 = vld [vmem:[%s1892_s4 + $0x80] sm:$0xff]  ;;  %v194_v6 = vld [vmem:[%s1892_s4 + $0x88] sm:$0xff]  ;;  %v196_v10 = vld [vmem:[%s1892_s4 + $0x98] sm:$0xff]  ;;  %v443_v14 = vpack.c.bf16 %v203_v9, %v195_v8 }
  0x2a   : > { %764 = vmatpush.bf16.msra.mxu0 %v689_v33  ;;  %v201_v5 = vld [vmem:[%s1892_s4 + $0xc0] sm:$0xff]  ;;  %v202_v7 = vld [vmem:[%s1892_s4 + $0xc8] sm:$0xff]  ;;  %v204_v11 = vld [vmem:[%s1892_s4 + $0xd8] sm:$0xff] }
  0x2b   : > { %853 = vmatpush.bf16.msra.mxu1 %v697_v37  ;;  %v441_v12 = vpack.c.bf16 %v201_v5, %v193_v4  ;;  %v442_v13 = vpack.c.bf16 %v202_v7, %v194_v6  ;;  %v444_v15 = vpack.c.bf16 %v204_v11, %v196_v10  ;;  %v209_v16 = vld [vmem:[%s1892_s4 + $0x100] sm:$0xff]  ;;  %v210_v18 = vld [vmem:[%s1892_s4 + $0x108] sm:$0xff]  ;;  %v211_v20 = vld [vmem:[%s1892_s4 + $0x110] sm:$0xff] }
  0x2c   : > { %942 = vmatpush.bf16.msra.mxu2 %v705_v38  ;;  %v217_v17 = vld [vmem:[%s1892_s4 + $0x140] sm:$0xff]  ;;  %v218_v19 = vld [vmem:[%s1892_s4 + $0x148] sm:$0xff]  ;;  %v219_v21 = vld [vmem:[%s1892_s4 + $0x150] sm:$0xff] }
  0x2d   : > { %1031 = vmatpush.bf16.msra.mxu3 %v713_v42  ;;  %765 = vmatmul.bf16.vlgmr.msra.gmra.mxu0 %v433_v47  ;;  %v212_v22 = vld [vmem:[%s1892_s4 + $0x118] sm:$0xff]  ;;  %v449_v24 = vpack.c.bf16 %v217_v17, %v209_v16  ;;  %v450_v25 = vpack.c.bf16 %v218_v19, %v210_v18  ;;  %v451_v26 = vpack.c.bf16 %v219_v21, %v211_v20  ;;  %v667_v28 = vld [vmem:[%s2538_s1 + $0x350] sm:$0xff]  ;;  %v225_v40 = vld [vmem:[%s1892_s4 + $0x180] sm:$0xff] }
  0x2e   : > { %854 = vmatmul.bf16.vlgmr.msra.gmra.mxu1 %v434_v51  ;;  %1113 = vmatpush.bf16.msrb.mxu0 %v728_v54  ;;  %v220_v23 = vld [vmem:[%s1892_s4 + $0x158] sm:$0xff]  ;;  %v635_v30 = vld [vmem:[%s2538_s1 + $0x250] sm:$0xff]  ;;  %v233_v41 = vld [vmem:[%s1892_s4 + $0x1c0] sm:$0xff] }
  0x2f   : > { %943 = vmatmul.bf16.vlgmr.msra.gmra.mxu2 %v435_v52  ;;  %1202 = vmatpush.bf16.msrb.mxu1 %v736_v55  ;;  %v452_v27 = vpack.c.bf16 %v220_v23, %v212_v22  ;;  %v668_v29 = vld [vmem:[%s2538_s1 + $0x358] sm:$0xff]  ;;  %v683_v33 = vld [vmem:[%s2538_s1 + $0x3d0] sm:$0xff]  ;;  %v226_v42 = vld [vmem:[%s1892_s4 + $0x188] sm:$0xff] }
  0x30   : > { %1291 = vmatpush.bf16.msrb.mxu2 %v744_v44  ;;  %1032 = vmatmul.bf16.vlgmr.msra.gmra.mxu3 %v436_v53  ;;  %v742_v31 = vpack.c.bf16 %v668_v29, %v667_v28  ;;  %v636_v32 = vld [vmem:[%s2538_s1 + $0x258] sm:$0xff]  ;;  %v651_v37 = vld [vmem:[%s2538_s1 + $0x2d0] sm:$0xff]  ;;  %v234_v43 = vld [vmem:[%s1892_s4 + $0x1c8] sm:$0xff] }
  0x31   : > { %1380 = vmatpush.bf16.msrb.mxu3 %v752_v48  ;;  %v684_v34 = vld [vmem:[%s2538_s1 + $0x3d8] sm:$0xff]  ;;  %v726_v35 = vpack.c.bf16 %v636_v32, %v635_v30  ;;  %v227_v44 = vld [vmem:[%s1892_s4 + $0x190] sm:$0xff]  ;;  %v457_v48 = vpack.c.bf16 %v233_v41, %v225_v40  ;;  %v458_v49 = vpack.c.bf16 %v234_v43, %v226_v42  ;;  %v241_v52 = vld [vmem:[%s1892_s4 + $0x200] sm:$0xff] }
  0x32   : > { %1114 = vmatpush.bf16.msrb.mxu0 %v727_v63  ;;  %v750_v36 = vpack.c.bf16 %v684_v34, %v683_v33  ;;  %v652_v38 = vld [vmem:[%s2538_s1 + $0x2d8] sm:$0xff]  ;;  %v235_v45 = vld [vmem:[%s1892_s4 + $0x1d0] sm:$0xff]  ;;  %v249_v53 = vld [vmem:[%s1892_s4 + $0x240] sm:$0xff] }
  0x33   : > { %1203 = vmatpush.bf16.msrb.mxu1 %v735_v3  ;;  %v734_v39 = vpack.c.bf16 %v652_v38, %v651_v37  ;;  %v228_v46 = vld [vmem:[%s1892_s4 + $0x198] sm:$0xff]  ;;  %v459_v50 = vpack.c.bf16 %v235_v45, %v227_v44  ;;  %v242_v54 = vld [vmem:[%s1892_s4 + $0x208] sm:$0xff]  ;;  %v243_v56 = vld [vmem:[%s1892_s4 + $0x210] sm:$0xff]  ;;  %v465_v60 = vpack.c.bf16 %v249_v53, %v241_v52 }
  0x34   : > { %1292 = vmatpush.bf16.msrb.mxu2 %v743_v59  ;;  %v236_v47 = vld [vmem:[%s1892_s4 + $0x1d8] sm:$0xff]  ;;  %v250_v55 = vld [vmem:[%s1892_s4 + $0x248] sm:$0xff]  ;;  %v251_v57 = vld [vmem:[%s1892_s4 + $0x250] sm:$0xff] }
  0x35   : > { %1381 = vmatpush.bf16.msrb.mxu3 %v751_v0  ;;  %v460_v51 = vpack.c.bf16 %v236_v47, %v228_v46  ;;  %v244_v58 = vld [vmem:[%s1892_s4 + $0x218] sm:$0xff]  ;;  %v466_v61 = vpack.c.bf16 %v250_v55, %v242_v54  ;;  %v467_v62 = vpack.c.bf16 %v251_v57, %v243_v56  ;;  %v665_v0 = vld [vmem:[%s2538_s1 + $0x340] sm:$0xff]  ;;  %v666_v1 = vld [vmem:[%s2538_s1 + $0x348] sm:$0xff] }
  0x36   : > { %1115 = vmatpush.bf16.msrb.mxu0 %v726_v35  ;;  %v252_v59 = vld [vmem:[%s1892_s4 + $0x258] sm:$0xff]  ;;  %v633_v2 = vld [vmem:[%s2538_s1 + $0x240] sm:$0xff]  ;;  %v741_v3 = vpack.c.bf16 %v666_v1, %v665_v0  ;;  %v634_v4 = vld [vmem:[%s2538_s1 + $0x248] sm:$0xff] }
  0x37   : > { %1204 = vmatpush.bf16.msrb.mxu1 %v734_v39  ;;  %v468_v63 = vpack.c.bf16 %v252_v59, %v244_v58  ;;  %v681_v5 = vld [vmem:[%s2538_s1 + $0x3c0] sm:$0xff]  ;;  %v682_v6 = vld [vmem:[%s2538_s1 + $0x3c8] sm:$0xff]  ;;  %v725_v7 = vpack.c.bf16 %v634_v4, %v633_v2  ;;  %v259_v16 = vld [vmem:[%s1892_s4 + $0x290] sm:$0xff] }
  0x38   : > { %1293 = vmatpush.bf16.msrb.mxu2 %v742_v31  ;;  %v749_v8 = vpack.c.bf16 %v682_v6, %v681_v5  ;;  %v649_v9 = vld [vmem:[%s2538_s1 + $0x2c0] sm:$0xff]  ;;  %v650_v10 = vld [vmem:[%s2538_s1 + $0x2c8] sm:$0xff]  ;;  %v267_v17 = vld [vmem:[%s1892_s4 + $0x2d0] sm:$0xff] }
  0x39   : > { %1382 = vmatpush.bf16.msrb.mxu3 %v750_v36  ;;  %v733_v11 = vpack.c.bf16 %v650_v10, %v649_v9  ;;  %v260_v18 = vld [vmem:[%s1892_s4 + $0x298] sm:$0xff]  ;;  %v475_v22 = vpack.c.bf16 %v267_v17, %v259_v16  ;;  %v275_v28 = vld [vmem:[%s1892_s4 + $0x310] sm:$0xff]  ;;  %v314_v0 = vld [vmem:[%s1892_s4 + $0x448] sm:$0xff] }
  0x3a   : > { %1116 = vmatpush.bf16.msrb.mxu0 %v725_v7  ;;  %v268_v19 = vld [vmem:[%s1892_s4 + $0x2d8] sm:$0xff]  ;;  %v283_v29 = vld [vmem:[%s1892_s4 + $0x350] sm:$0xff]  ;;  %v630_v17 = vld [vmem:[%s2538_s1 + $0x228] sm:$0xff] }
  0x3b   : > { %1205 = vmatpush.bf16.msrb.mxu1 %v733_v11  ;;  %v476_v23 = vpack.c.bf16 %v268_v19, %v260_v18  ;;  %v276_v30 = vld [vmem:[%s1892_s4 + $0x318] sm:$0xff]  ;;  %v483_v34 = vpack.c.bf16 %v283_v29, %v275_v28  ;;  %v663_v36 = vld [vmem:[%s2538_s1 + $0x330] sm:$0xff]  ;;  %v677_v18 = vld [vmem:[%s2538_s1 + $0x3a0] sm:$0xff] }
  0x3c   : > { %1294 = vmatpush.bf16.msrb.mxu2 %v741_v3  ;;  %v284_v31 = vld [vmem:[%s1892_s4 + $0x358] sm:$0xff]  ;;  %v631_v38 = vld [vmem:[%s2538_s1 + $0x230] sm:$0xff]  ;;  %v678_v19 = vld [vmem:[%s2538_s1 + $0x3a8] sm:$0xff] }
  0x3d   : > { %770 = vmatmul.bf16.gmra.mxu0 %v441_v12  ;;  %1383 = vmatpush.bf16.msrb.mxu3 %v749_v8  ;;  %v257_v12 = vld [vmem:[%s1892_s4 + $0x280] sm:$0xff]  ;;  %v484_v35 = vpack.c.bf16 %v284_v31, %v276_v30  ;;  %v664_v37 = vld [vmem:[%s2538_s1 + $0x338] sm:$0xff]  ;;  %v679_v41 = vld [vmem:[%s2538_s1 + $0x3b0] sm:$0xff] }
  0x3e   : > { %859 = vmatmul.bf16.gmra.mxu1 %v442_v13  ;;  %v265_v13 = vld [vmem:[%s1892_s4 + $0x2c0] sm:$0xff]  ;;  %v740_v39 = vpack.c.bf16 %v664_v37, %v663_v36  ;;  %v632_v40 = vld [vmem:[%s2538_s1 + $0x238] sm:$0xff]  ;;  %v647_v45 = vld [vmem:[%s2538_s1 + $0x2b0] sm:$0xff] }
  0x3f   : > { %948 = vmatmul.bf16.gmra.mxu2 %v443_v14  ;;  %v258_v14 = vld [vmem:[%s1892_s4 + $0x288] sm:$0xff]  ;;  %v473_v20 = vpack.c.bf16 %v265_v13, %v257_v12  ;;  %v680_v42 = vld [vmem:[%s2538_s1 + $0x3b8] sm:$0xff]  ;;  %v724_v43 = vpack.c.bf16 %v632_v40, %v631_v38  ;;  %v291_v52 = vld [vmem:[%s1892_s4 + $0x390] sm:$0xff] }
  0x40   : > { %1037 = vmatmul.bf16.gmra.mxu3 %v444_v15  ;;  %v266_v15 = vld [vmem:[%s1892_s4 + $0x2c8] sm:$0xff]  ;;  %v748_v44 = vpack.c.bf16 %v680_v42, %v679_v41  ;;  %1295 = vmatpush.bf16.msrb.mxu2 %v740_v39  ;;  %v648_v46 = vld [vmem:[%s2538_s1 + $0x2b8] sm:$0xff]  ;;  %v299_v53 = vld [vmem:[%s1892_s4 + $0x3d0] sm:$0xff] }
  0x41   : > { %v474_v21 = vpack.c.bf16 %v266_v15, %v258_v14  ;;  %1117 = vmatpush.bf16.msrb.mxu0 %v724_v43  ;;  %v732_v47 = vpack.c.bf16 %v648_v46, %v647_v45  ;;  %v292_v54 = vld [vmem:[%s1892_s4 + $0x398] sm:$0xff]  ;;  %v491_v58 = vpack.c.bf16 %v299_v53, %v291_v52  ;;  %v307_v1 = vld [vmem:[%s1892_s4 + $0x410] sm:$0xff]  ;;  %v661_v13 = vld [vmem:[%s2538_s1 + $0x320] sm:$0xff] }
  0x42   : > { %1384 = vmatpush.bf16.msrb.mxu3 %v748_v44  ;;  %v300_v55 = vld [vmem:[%s1892_s4 + $0x3d8] sm:$0xff]  ;;  %v315_v2 = vld [vmem:[%s1892_s4 + $0x450] sm:$0xff]  ;;  %v662_v14 = vld [vmem:[%s2538_s1 + $0x328] sm:$0xff] }
  0x43   : > { %1206 = vmatpush.bf16.msrb.mxu1 %v732_v47  ;;  %v492_v59 = vpack.c.bf16 %v300_v55, %v292_v54  ;;  %v308_v3 = vld [vmem:[%s1892_s4 + $0x418] sm:$0xff]  ;;  %v499_v8 = vpack.c.bf16 %v315_v2, %v307_v1  ;;  %v629_v15 = vld [vmem:[%s2538_s1 + $0x220] sm:$0xff]  ;;  %v739_v16 = vpack.c.bf16 %v662_v14, %v661_v13  ;;  %v646_v30 = vld [vmem:[%s2538_s1 + $0x2a8] sm:$0xff] }
  0x44   : > { %v316_v4 = vld [vmem:[%s1892_s4 + $0x458] sm:$0xff]  ;;  %v645_v29 = vld [vmem:[%s2538_s1 + $0x2a0] sm:$0xff]  ;;  %v330_v36 = vld [vmem:[%s1892_s4 + $0x4c8] sm:$0xff] }
  0x45   : > { %v500_v11 = vpack.c.bf16 %v316_v4, %v308_v3  ;;  %1296 = vmatpush.bf16.msrb.mxu2 %v739_v16  ;;  %v323_v37 = vld [vmem:[%s1892_s4 + $0x490] sm:$0xff]  ;;  %v324_v39 = vld [vmem:[%s1892_s4 + $0x498] sm:$0xff]  ;;  %v346_v1 = vld [vmem:[%s1892_s4 + $0x548] sm:$0xff] }
  0x46   : > { %v331_v38 = vld [vmem:[%s1892_s4 + $0x4d0] sm:$0xff]  ;;  %v332_v40 = vld [vmem:[%s1892_s4 + $0x4d8] sm:$0xff] }
  0x47   : > { %v507_v47 = vpack.c.bf16 %v331_v38, %v323_v37  ;;  %v339_v2 = vld [vmem:[%s1892_s4 + $0x510] sm:$0xff]  ;;  %v340_v4 = vld [vmem:[%s1892_s4 + $0x518] sm:$0xff] }
  0x48   : > { %v347_v3 = vld [vmem:[%s1892_s4 + $0x550] sm:$0xff] }
  0x4d   : > { %775 = vmatmul.bf16.gmra.mxu0 %v449_v24  ;;  %v273_v24 = vld [vmem:[%s1892_s4 + $0x300] sm:$0xff] }
  0x4e   : > { %864 = vmatmul.bf16.gmra.mxu1 %v450_v25  ;;  %v281_v25 = vld [vmem:[%s1892_s4 + $0x340] sm:$0xff] }
  0x4f   : > { %953 = vmatmul.bf16.gmra.mxu2 %v451_v26  ;;  %v274_v26 = vld [vmem:[%s1892_s4 + $0x308] sm:$0xff]  ;;  %v481_v32 = vpack.c.bf16 %v281_v25, %v273_v24 }
  0x50   : > { %1042 = vmatmul.bf16.gmra.mxu3 %v452_v27  ;;  %v282_v27 = vld [vmem:[%s1892_s4 + $0x348] sm:$0xff] }
  0x51   : > { %v482_v33 = vpack.c.bf16 %v282_v27, %v274_v26 }
  0x5d   : > { %780 = vmatmul.bf16.gmra.mxu0 %v457_v48  ;;  %v289_v48 = vld [vmem:[%s1892_s4 + $0x380] sm:$0xff] }
  0x5e   : > { %869 = vmatmul.bf16.gmra.mxu1 %v458_v49  ;;  %v297_v49 = vld [vmem:[%s1892_s4 + $0x3c0] sm:$0xff] }
  0x5f   : > { %958 = vmatmul.bf16.gmra.mxu2 %v459_v50  ;;  %v290_v50 = vld [vmem:[%s1892_s4 + $0x388] sm:$0xff]  ;;  %v489_v56 = vpack.c.bf16 %v297_v49, %v289_v48 }
  0x60   : > { %1047 = vmatmul.bf16.gmra.mxu3 %v460_v51  ;;  %v298_v51 = vld [vmem:[%s1892_s4 + $0x3c8] sm:$0xff] }
  0x61   : > { %v490_v57 = vpack.c.bf16 %v298_v51, %v290_v50  ;;  %v508_v50 = vpack.c.bf16 %v332_v40, %v324_v39  ;;  %v353_v39 = vld [vmem:[%s1892_s4 + $0x580] sm:$0xff] }
  0x62   : > { %v361_v40 = vld [vmem:[%s1892_s4 + $0x5c0] sm:$0xff] }
  0x6d   : > { %785 = vmatmul.bf16.gmra.mxu0 %v465_v60  ;;  %v2102_v60 = vld [vmem:[%s2539_s2] ss:$0 sm:$0xff] }
  0x6e   : > { %874 = vmatmul.bf16.gmra.mxu1 %v466_v61  ;;  %v305_v61 = vld [vmem:[%s1892_s4 + $0x400] sm:$0xff] }
  0x6f   : > { %963 = vmatmul.bf16.gmra.mxu2 %v467_v62  ;;  %v313_v62 = vld [vmem:[%s1892_s4 + $0x440] sm:$0xff] }
  0x70   : > { %1052 = vmatmul.bf16.gmra.mxu3 %v468_v63  ;;  %v306_v63 = vld [vmem:[%s1892_s4 + $0x408] sm:$0xff]  ;;  %v497_v5 = vpack.c.bf16 %v313_v62, %v305_v61  ;;  %v337_v62 = vld [vmem:[%s1892_s4 + $0x500] sm:$0xff] }
  0x71   : > { %v498_v7 = vpack.c.bf16 %v314_v0, %v306_v63  ;;  %v345_v63 = vld [vmem:[%s1892_s4 + $0x540] sm:$0xff]  ;;  %v338_v0 = vld [vmem:[%s1892_s4 + $0x508] sm:$0xff] }
  0x7d   : > { %790 = vmatmul.bf16.gmra.mxu0 %v473_v20 }
  0x7e   : > { %879 = vmatmul.bf16.gmra.mxu1 %v474_v21  ;;  %v723_v21 = vpack.c.bf16 %v630_v17, %v629_v15 }
  0x7f   : > { %968 = vmatmul.bf16.gmra.mxu2 %v475_v22  ;;  %v747_v22 = vpack.c.bf16 %v678_v19, %v677_v18  ;;  %v659_v18 = vld [vmem:[%s2538_s1 + $0x310] sm:$0xff]  ;;  %v660_v19 = vld [vmem:[%s2538_s1 + $0x318] sm:$0xff] }
  0x80   : > { %1057 = vmatmul.bf16.gmra.mxu3 %v476_v23  ;;  %1118 = vmatpush.bf16.msrb.mxu0 %v723_v21  ;;  %v738_v21 = vpack.c.bf16 %v660_v19, %v659_v18 }
  0x81   : > { %1385 = vmatpush.bf16.msrb.mxu3 %v747_v22  ;;  %v628_v22 = vld [vmem:[%s2538_s1 + $0x218] sm:$0xff] }
  0x82   : > { %1297 = vmatpush.bf16.msrb.mxu2 %v738_v21 }
  0x8d   : > { %795 = vmatmul.bf16.gmra.mxu0 %v481_v32  ;;  %v731_v32 = vpack.c.bf16 %v646_v30, %v645_v29 }
  0x8e   : > { %884 = vmatmul.bf16.gmra.mxu1 %v482_v33  ;;  %v321_v33 = vld [vmem:[%s1892_s4 + $0x480] sm:$0xff] }
  0x8f   : > { %973 = vmatmul.bf16.gmra.mxu2 %v483_v34  ;;  %v329_v34 = vld [vmem:[%s1892_s4 + $0x4c0] sm:$0xff]  ;;  %1207 = vmatpush.bf16.msrb.mxu1 %v731_v32 }
  0x90   : > { %1062 = vmatmul.bf16.gmra.mxu3 %v484_v35  ;;  %v322_v35 = vld [vmem:[%s1892_s4 + $0x488] sm:$0xff]  ;;  %v505_v42 = vpack.c.bf16 %v329_v34, %v321_v33 }
  0x91   : > { %v506_v46 = vpack.c.bf16 %v330_v36, %v322_v35  ;;  %v643_v35 = vld [vmem:[%s2538_s1 + $0x290] sm:$0xff]  ;;  %v644_v36 = vld [vmem:[%s2538_s1 + $0x298] sm:$0xff] }
  0x92   : > { %v730_v38 = vpack.c.bf16 %v644_v36, %v643_v35  ;;  %v674_v35 = vld [vmem:[%s2538_s1 + $0x388] sm:$0xff] }
  0x94   : > { %1208 = vmatpush.bf16.msrb.mxu1 %v730_v38 }
  0x9d   : > { %800 = vmatmul.bf16.gmra.mxu0 %v489_v56 }
  0x9e   : > { %889 = vmatmul.bf16.gmra.mxu1 %v490_v57 }
  0x9f   : > { %978 = vmatmul.bf16.gmra.mxu2 %v491_v58 }
  0xa0   : > { %1067 = vmatmul.bf16.gmra.mxu3 %v492_v59 }
  0xaa   : > { %v766_v6 = vpop.f32.mrf.mxu0 }
  0xab   : > { %v767_v9 = vadd.f32 %v2102_v60, %v766_v6  ;;  %v855_v10 = vpop.f32.mrf.mxu1 }
  0xad   : > { %v856_v12 = vadd.f32 %v855_v10, %v767_v9  ;;  %805 = vmatmul.bf16.gmra.mxu0 %v497_v5  ;;  %v348_v5 = vld [vmem:[%s1892_s4 + $0x558] sm:$0xff] }
  0xae   : > { %894 = vmatmul.bf16.gmra.mxu1 %v498_v7  ;;  %v513_v7 = vpack.c.bf16 %v345_v63, %v337_v62  ;;  %v516_v15 = vpack.c.bf16 %v348_v5, %v340_v4 }
  0xaf   : > { %983 = vmatmul.bf16.gmra.mxu2 %v499_v8 }
  0xb0   : > { %1072 = vmatmul.bf16.gmra.mxu3 %v500_v11  ;;  %v514_v11 = vpack.c.bf16 %v346_v1, %v338_v0 }
  0xb2   : > { %v944_v20 = vpop.f32.mrf.mxu2  ;;  %v768_v25 = vpop.f32.mrf.mxu0 }
  0xb3   : > { %v945_v23 = vadd.f32 %v944_v20, %v856_v12  ;;  %v1033_v24 = vpop.f32.mrf.mxu3  ;;  %v769_v26 = vadd.f32 %v2102_v60, %v768_v25  ;;  %v857_v27 = vpop.f32.mrf.mxu1  ;;  %v515_v12 = vpack.c.bf16 %v347_v3, %v339_v2  ;;  %v627_v20 = vld [vmem:[%s2538_s1 + $0x210] sm:$0xff] }
  0xb5   : > { %v2132_v28 = vadd.f32 %v1033_v24, %v945_v23  ;;  %v858_v31 = vadd.f32 %v857_v27, %v769_v26  ;;  %v675_v23 = vld [vmem:[%s2538_s1 + $0x390] sm:$0xff]  ;;  %v676_v24 = vld [vmem:[%s2538_s1 + $0x398] sm:$0xff]  ;;  %v722_v26 = vpack.c.bf16 %v628_v22, %v627_v20 }
  0xb6   : > { %v746_v27 = vpack.c.bf16 %v676_v24, %v675_v23 }
  0xb7   : > { %1119 = vmatpush.bf16.msrb.mxu0 %v722_v26 }
  0xb8   : > { %1386 = vmatpush.bf16.msrb.mxu3 %v746_v27  ;;  %v657_v27 = vld [vmem:[%s2538_s1 + $0x300] sm:$0xff] }
  0xba   : > { %v946_v41 = vpop.f32.mrf.mxu2  ;;  %v771_v45 = vpop.f32.mrf.mxu0 }
  0xbb   : > { %v947_v43 = vadd.f32 %v946_v41, %v858_v31  ;;  %v1035_v44 = vpop.f32.mrf.mxu3  ;;  %v772_v48 = vadd.f32 %v2102_v60, %v771_v45  ;;  %v860_v49 = vpop.f32.mrf.mxu1  ;;  %v354_v41 = vld [vmem:[%s1892_s4 + $0x588] sm:$0xff]  ;;  %v356_v45 = vld [vmem:[%s1892_s4 + $0x598] sm:$0xff] }
  0xbd   : > { %v2149_v51 = vadd.f32 %v1035_v44, %v947_v43  ;;  %v861_v52 = vadd.f32 %v860_v49, %v772_v48  ;;  %810 = vmatmul.bf16.gmra.mxu0 %v505_v42  ;;  %v362_v42 = vld [vmem:[%s1892_s4 + $0x5c8] sm:$0xff]  ;;  %v355_v43 = vld [vmem:[%s1892_s4 + $0x590] sm:$0xff]  ;;  %v521_v48 = vpack.c.bf16 %v361_v40, %v353_v39 }
  0xbe   : > { %899 = vmatmul.bf16.gmra.mxu1 %v506_v46  ;;  %v363_v44 = vld [vmem:[%s1892_s4 + $0x5d0] sm:$0xff]  ;;  %v364_v46 = vld [vmem:[%s1892_s4 + $0x5d8] sm:$0xff] }
  0xbf   : > { %988 = vmatmul.bf16.gmra.mxu2 %v507_v47 }
  0xc0   : > { %1077 = vmatmul.bf16.gmra.mxu3 %v508_v50 }
  0xc2   : > { %v949_v53 = vpop.f32.mrf.mxu2  ;;  %v773_v56 = vpop.f32.mrf.mxu0 }
  0xc3   : > { %v950_v54 = vadd.f32 %v949_v53, %v861_v52  ;;  %v1038_v55 = vpop.f32.mrf.mxu3  ;;  %v774_v57 = vadd.f32 %v2102_v60, %v773_v56  ;;  %v862_v58 = vpop.f32.mrf.mxu1  ;;  %v522_v53 = vpack.c.bf16 %v362_v42, %v354_v41 }
  0xc5   : > { %v2152_v59 = vadd.f32 %v1038_v55, %v950_v54  ;;  %v863_v61 = vadd.f32 %v862_v58, %v774_v57  ;;  %v523_v54 = vpack.c.bf16 %v363_v44, %v355_v43  ;;  %v524_v57 = vpack.c.bf16 %v364_v46, %v356_v45  ;;  %v641_v45 = vld [vmem:[%s2538_s1 + $0x280] sm:$0xff]  ;;  %v642_v46 = vld [vmem:[%s2538_s1 + $0x288] sm:$0xff] }
  0xca   : > { %v951_v6 = vpop.f32.mrf.mxu2  ;;  %v776_v10 = vpop.f32.mrf.mxu0 }
  0xcb   : > { %v952_v8 = vadd.f32 %v951_v6, %v863_v61  ;;  %v1040_v9 = vpop.f32.mrf.mxu3  ;;  %v777_v13 = vadd.f32 %v2102_v60, %v776_v10  ;;  %v865_v14 = vpop.f32.mrf.mxu1  ;;  %v369_v6 = vld [vmem:[%s1892_s4 + $0x600] sm:$0xff]  ;;  %v371_v10 = vld [vmem:[%s1892_s4 + $0x610] sm:$0xff] }
  0xcd   : > { %v2163_v16 = vadd.f32 %v1040_v9, %v952_v8  ;;  %v866_v17 = vadd.f32 %v865_v14, %v777_v13  ;;  %815 = vmatmul.bf16.gmra.mxu0 %v513_v7  ;;  %v377_v7 = vld [vmem:[%s1892_s4 + $0x640] sm:$0xff]  ;;  %v370_v8 = vld [vmem:[%s1892_s4 + $0x608] sm:$0xff]  ;;  %v380_v13 = vld [vmem:[%s1892_s4 + $0x658] sm:$0xff] }
  0xce   : > { %904 = vmatmul.bf16.gmra.mxu1 %v514_v11  ;;  %v378_v9 = vld [vmem:[%s1892_s4 + $0x648] sm:$0xff]  ;;  %v379_v11 = vld [vmem:[%s1892_s4 + $0x650] sm:$0xff] }
  0xcf   : > { %993 = vmatmul.bf16.gmra.mxu2 %v515_v12  ;;  %v372_v12 = vld [vmem:[%s1892_s4 + $0x618] sm:$0xff]  ;;  %v530_v20 = vpack.c.bf16 %v378_v9, %v370_v8  ;;  %v531_v21 = vpack.c.bf16 %v379_v11, %v371_v10 }
  0xd0   : > { %1082 = vmatmul.bf16.gmra.mxu3 %v516_v15  ;;  %v529_v15 = vpack.c.bf16 %v377_v7, %v369_v6  ;;  %v532_v24 = vpack.c.bf16 %v380_v13, %v372_v12 }
  0xd2   : > { %v954_v25 = vpop.f32.mrf.mxu2  ;;  %v778_v31 = vpop.f32.mrf.mxu0 }
  0xd3   : > { %v955_v29 = vadd.f32 %v954_v25, %v866_v17  ;;  %v1043_v30 = vpop.f32.mrf.mxu3  ;;  %v779_v32 = vadd.f32 %v2102_v60, %v778_v31  ;;  %v867_v33 = vpop.f32.mrf.mxu1 }
  0xd5   : > { %v2184_v34 = vadd.f32 %v1043_v30, %v955_v29  ;;  %v868_v37 = vadd.f32 %v867_v33, %v779_v32  ;;  %v658_v29 = vld [vmem:[%s2538_s1 + $0x308] sm:$0xff]  ;;  %v625_v30 = vld [vmem:[%s2538_s1 + $0x200] sm:$0xff] }
  0xd6   : > { %v737_v31 = vpack.c.bf16 %v658_v29, %v657_v27  ;;  %v626_v32 = vld [vmem:[%s2538_s1 + $0x208] sm:$0xff]  ;;  %v673_v33 = vld [vmem:[%s2538_s1 + $0x380] sm:$0xff]  ;;  %v412_v27 = vld [vmem:[%s1892_s4 + $0x758] sm:$0xff] }
  0xd7   : > { %v745_v38 = vpack.c.bf16 %v674_v35, %v673_v33 }
  0xd8   : > { %1298 = vmatpush.bf16.msrb.mxu2 %v737_v31 }
  0xd9   : > { %1387 = vmatpush.bf16.msrb.mxu3 %v745_v38 }
  0xda   : > { %v956_v47 = vpop.f32.mrf.mxu2  ;;  %v781_v52 = vpop.f32.mrf.mxu0 }
  0xdb   : > { %v957_v49 = vadd.f32 %v956_v47, %v868_v37  ;;  %v1045_v50 = vpop.f32.mrf.mxu3  ;;  %v782_v55 = vadd.f32 %v2102_v60, %v781_v52  ;;  %v870_v56 = vpop.f32.mrf.mxu1  ;;  %v721_v37 = vpack.c.bf16 %v626_v32, %v625_v30  ;;  %v386_v52 = vld [vmem:[%s1892_s4 + $0x688] sm:$0xff] }
  0xdd   : > { %v2201_v58 = vadd.f32 %v1045_v50, %v957_v49  ;;  %v871_v61 = vadd.f32 %v870_v56, %v782_v55  ;;  %820 = vmatmul.bf16.gmra.mxu0 %v521_v48  ;;  %v729_v48 = vpack.c.bf16 %v642_v46, %v641_v45  ;;  %v385_v49 = vld [vmem:[%s1892_s4 + $0x680] sm:$0xff]  ;;  %v395_v55 = vld [vmem:[%s1892_s4 + $0x6d0] sm:$0xff]  ;;  %v388_v56 = vld [vmem:[%s1892_s4 + $0x698] sm:$0xff] }
  0xde   : > { %909 = vmatmul.bf16.gmra.mxu1 %v522_v53  ;;  %1120 = vmatpush.bf16.msrb.mxu0 %v721_v37  ;;  %v393_v50 = vld [vmem:[%s1892_s4 + $0x6c0] sm:$0xff]  ;;  %v394_v53 = vld [vmem:[%s1892_s4 + $0x6c8] sm:$0xff] }
  0xdf   : > { %998 = vmatmul.bf16.gmra.mxu2 %v523_v54  ;;  %v387_v54 = vld [vmem:[%s1892_s4 + $0x690] sm:$0xff]  ;;  %1209 = vmatpush.bf16.msrb.mxu1 %v729_v48 }
  0xe0   : > { %1087 = vmatmul.bf16.gmra.mxu3 %v524_v57  ;;  %v396_v57 = vld [vmem:[%s1892_s4 + $0x6d8] sm:$0xff] }
  0xe1   : > { %v540_v7 = vpack.c.bf16 %v396_v57, %v388_v56  ;;  %v419_v56 = vld [vmem:[%s1892_s4 + $0x790] sm:$0xff] }
  0xe2   : > { %v959_v62 = vpop.f32.mrf.mxu2  ;;  %v783_v1 = vpop.f32.mrf.mxu0  ;;  %v427_v57 = vld [vmem:[%s1892_s4 + $0x7d0] sm:$0xff] }
  0xe3   : > { %v960_v63 = vadd.f32 %v959_v62, %v871_v61  ;;  %v1048_v0 = vpop.f32.mrf.mxu3  ;;  %v784_v2 = vadd.f32 %v2102_v60, %v783_v1  ;;  %v872_v3 = vpop.f32.mrf.mxu1  ;;  %v537_v62 = vpack.c.bf16 %v393_v50, %v385_v49 }
  0xe5   : > { %v2204_v4 = vadd.f32 %v1048_v0, %v960_v63  ;;  %v873_v5 = vadd.f32 %v872_v3, %v784_v2  ;;  %v538_v2 = vpack.c.bf16 %v394_v53, %v386_v52  ;;  %v539_v3 = vpack.c.bf16 %v395_v55, %v387_v54  ;;  %v417_v52 = vld [vmem:[%s1892_s4 + $0x780] sm:$0xff]  ;;  %v418_v54 = vld [vmem:[%s1892_s4 + $0x788] sm:$0xff] }
  0xe6   : > { %v425_v53 = vld [vmem:[%s1892_s4 + $0x7c0] sm:$0xff]  ;;  %v426_v55 = vld [vmem:[%s1892_s4 + $0x7c8] sm:$0xff] }
  0xea   : > { %v961_v14 = vpop.f32.mrf.mxu2  ;;  %v786_v19 = vpop.f32.mrf.mxu0 }
  0xeb   : > { %v962_v17 = vadd.f32 %v961_v14, %v873_v5  ;;  %v1050_v18 = vpop.f32.mrf.mxu3  ;;  %v787_v22 = vadd.f32 %v2102_v60, %v786_v19  ;;  %v875_v23 = vpop.f32.mrf.mxu1  ;;  %v401_v19 = vld [vmem:[%s1892_s4 + $0x700] sm:$0xff] }
  0xed   : > { %v2215_v25 = vadd.f32 %v1050_v18, %v962_v17  ;;  %v876_v26 = vadd.f32 %v875_v23, %v787_v22  ;;  %825 = vmatmul.bf16.gmra.mxu0 %v529_v15  ;;  %v410_v22 = vld [vmem:[%s1892_s4 + $0x748] sm:$0xff]  ;;  %v403_v23 = vld [vmem:[%s1892_s4 + $0x710] sm:$0xff] }
  0xee   : > { %914 = vmatmul.bf16.gmra.mxu1 %v530_v20  ;;  %v409_v20 = vld [vmem:[%s1892_s4 + $0x740] sm:$0xff] }
  0xef   : > { %1003 = vmatmul.bf16.gmra.mxu2 %v531_v21  ;;  %v402_v21 = vld [vmem:[%s1892_s4 + $0x708] sm:$0xff]  ;;  %v545_v30 = vpack.c.bf16 %v409_v20, %v401_v19 }
  0xf0   : > { %1092 = vmatmul.bf16.gmra.mxu3 %v532_v24  ;;  %v411_v24 = vld [vmem:[%s1892_s4 + $0x750] sm:$0xff]  ;;  %v546_v35 = vpack.c.bf16 %v410_v22, %v402_v21 }
  0xf2   : > { %v964_v36 = vpop.f32.mrf.mxu2  ;;  %v788_v41 = vpop.f32.mrf.mxu0 }
  0xf3   : > { %v965_v39 = vadd.f32 %v964_v36, %v876_v26  ;;  %v1053_v40 = vpop.f32.mrf.mxu3  ;;  %v789_v42 = vadd.f32 %v2102_v60, %v788_v41  ;;  %v877_v43 = vpop.f32.mrf.mxu1  ;;  %v404_v26 = vld [vmem:[%s1892_s4 + $0x718] sm:$0xff]  ;;  %v547_v36 = vpack.c.bf16 %v411_v24, %v403_v23  ;;  %v181_v23 = vld [vmem:[%s1892_s4 + $0x20] sm:$0xff] }
  0xf4   : > { %v189_v24 = vld [vmem:[%s1892_s4 + $0x60] sm:$0xff] }
  0xf5   : > { %v2236_v44 = vadd.f32 %v1053_v40, %v965_v39  ;;  %v878_v47 = vadd.f32 %v877_v43, %v789_v42  ;;  %v548_v39 = vpack.c.bf16 %v412_v27, %v404_v26  ;;  %v182_v26 = vld [vmem:[%s1892_s4 + $0x28] sm:$0xff] }
  0xf6   : > { %v190_v27 = vld [vmem:[%s1892_s4 + $0x68] sm:$0xff] }
  0xfa   : > { %v966_v61 = vpop.f32.mrf.mxu2  ;;  %v791_v1 = vpop.f32.mrf.mxu0 }
  0xfb   : > { %v967_v63 = vadd.f32 %v966_v61, %v878_v47  ;;  %v1055_v0 = vpop.f32.mrf.mxu3  ;;  %v792_v5 = vadd.f32 %v2102_v60, %v791_v1  ;;  %v880_v6 = vpop.f32.mrf.mxu1  ;;  %v420_v61 = vld [vmem:[%s1892_s4 + $0x798] sm:$0xff] }
  0xfd   : > { %v2253_v8 = vadd.f32 %v1055_v0, %v967_v63  ;;  %v881_v9 = vadd.f32 %v880_v6, %v792_v5  ;;  %830 = vmatmul.bf16.gmra.mxu0 %v537_v62  ;;  %v428_v62 = vld [vmem:[%s1892_s4 + $0x7d8] sm:$0xff]  ;;  %v553_v0 = vpack.c.bf16 %v425_v53, %v417_v52  ;;  %v554_v5 = vpack.c.bf16 %v426_v55, %v418_v54 }
  0xfe   : > { %919 = vmatmul.bf16.gmra.mxu1 %v538_v2  ;;  %v555_v6 = vpack.c.bf16 %v427_v57, %v419_v56 }
  0xff   : > { %1008 = vmatmul.bf16.gmra.mxu2 %v539_v3 }
 0x100   : > { %1097 = vmatmul.bf16.gmra.mxu3 %v540_v7 }
 0x102   : > { %v969_v10 = vpop.f32.mrf.mxu2  ;;  %v793_v13 = vpop.f32.mrf.mxu0 }
 0x103   : > { %v970_v11 = vadd.f32 %v969_v10, %v881_v9  ;;  %v1058_v12 = vpop.f32.mrf.mxu3  ;;  %v794_v14 = vadd.f32 %v2102_v60, %v793_v13  ;;  %v882_v15 = vpop.f32.mrf.mxu1  ;;  %v556_v10 = vpack.c.bf16 %v428_v62, %v420_v61  ;;  %v197_v61 = vld [vmem:[%s1892_s4 + $0xa0] sm:$0xff] }
 0x104   : > { %v205_v62 = vld [vmem:[%s1892_s4 + $0xe0] sm:$0xff] }
 0x105   : > { %v2256_v17 = vadd.f32 %v1058_v12, %v970_v11  ;;  %v883_v18 = vadd.f32 %v882_v15, %v794_v14 }
 0x10a   : > { %v971_v29 = vpop.f32.mrf.mxu2  ;;  %v796_v33 = vpop.f32.mrf.mxu0 }
 0x10b   : > { %v972_v31 = vadd.f32 %v971_v29, %v883_v18  ;;  %v1060_v32 = vpop.f32.mrf.mxu3  ;;  %v797_v37 = vadd.f32 %v2102_v60, %v796_v33  ;;  %v885_v38 = vpop.f32.mrf.mxu1  ;;  %v183_v29 = vld [vmem:[%s1892_s4 + $0x30] sm:$0xff] }
 0x10d   : > { %v2267_v40 = vadd.f32 %v1060_v32, %v972_v31  ;;  %v886_v41 = vadd.f32 %v885_v38, %v797_v37  ;;  %835 = vmatmul.bf16.gmra.mxu0 %v545_v30  ;;  %v191_v30 = vld [vmem:[%s1892_s4 + $0x70] sm:$0xff]  ;;  %v184_v31 = vld [vmem:[%s1892_s4 + $0x38] sm:$0xff] }
 0x10e   : > { %924 = vmatmul.bf16.gmra.mxu1 %v546_v35  ;;  %v192_v32 = vld [vmem:[%s1892_s4 + $0x78] sm:$0xff]  ;;  %v437_v35 = vpack.c.bf16 %v189_v24, %v181_v23 }
 0x10f   : > { %1013 = vmatmul.bf16.gmra.mxu2 %v547_v36 }
 0x110   : > { %1102 = vmatmul.bf16.gmra.mxu3 %v548_v39  ;;  %v438_v39 = vpack.c.bf16 %v190_v27, %v182_v26 }
 0x112   : > { %v974_v42 = vpop.f32.mrf.mxu2  ;;  %v798_v46 = vpop.f32.mrf.mxu0 }
 0x113   : > { %v975_v43 = vadd.f32 %v974_v42, %v886_v41  ;;  %v1063_v45 = vpop.f32.mrf.mxu3  ;;  %v799_v47 = vadd.f32 %v2102_v60, %v798_v46  ;;  %v887_v48 = vpop.f32.mrf.mxu1  ;;  %v439_v41 = vpack.c.bf16 %v191_v30, %v183_v29 }
 0x115   : > { %v2270_v49 = vadd.f32 %v1063_v45, %v975_v43  ;;  %v888_v50 = vadd.f32 %v887_v48, %v799_v47  ;;  %v440_v45 = vpack.c.bf16 %v192_v32, %v184_v31 }
 0x11a   : > { %v976_v63 = vpop.f32.mrf.mxu2  ;;  %v801_v3 = vpop.f32.mrf.mxu0 }
 0x11b   : > { %v977_v1 = vadd.f32 %v976_v63, %v888_v50  ;;  %v1065_v2 = vpop.f32.mrf.mxu3  ;;  %v802_v7 = vadd.f32 %v2102_v60, %v801_v3  ;;  %v890_v9 = vpop.f32.mrf.mxu1  ;;  %v198_v63 = vld [vmem:[%s1892_s4 + $0xa8] sm:$0xff]  ;;  %v200_v3 = vld [vmem:[%s1892_s4 + $0xb8] sm:$0xff] }
 0x11d   : > { %v2281_v11 = vadd.f32 %v1065_v2, %v977_v1  ;;  %v891_v12 = vadd.f32 %v890_v9, %v802_v7  ;;  %840 = vmatmul.bf16.gmra.mxu0 %v553_v0  ;;  %v206_v0 = vld [vmem:[%s1892_s4 + $0xe8] sm:$0xff]  ;;  %v199_v1 = vld [vmem:[%s1892_s4 + $0xb0] sm:$0xff]  ;;  %v445_v7 = vpack.c.bf16 %v205_v62, %v197_v61 }
 0x11e   : > { %929 = vmatmul.bf16.gmra.mxu1 %v554_v5  ;;  %v207_v2 = vld [vmem:[%s1892_s4 + $0xf0] sm:$0xff]  ;;  %v208_v5 = vld [vmem:[%s1892_s4 + $0xf8] sm:$0xff] }
 0x11f   : > { %1018 = vmatmul.bf16.gmra.mxu2 %v555_v6 }
 0x120   : > { %1107 = vmatmul.bf16.gmra.mxu3 %v556_v10 }
 0x122   : > { %v979_v13 = vpop.f32.mrf.mxu2  ;;  %v803_v18 = vpop.f32.mrf.mxu0 }
 0x123   : > { %v980_v14 = vadd.f32 %v979_v13, %v891_v12  ;;  %v1068_v15 = vpop.f32.mrf.mxu3  ;;  %v804_v19 = vadd.f32 %v2102_v60, %v803_v18  ;;  %v892_v20 = vpop.f32.mrf.mxu1  ;;  %v446_v13 = vpack.c.bf16 %v206_v0, %v198_v63 }
 0x125   : > { %v2284_v21 = vadd.f32 %v1068_v15, %v980_v14  ;;  %v893_v22 = vadd.f32 %v892_v20, %v804_v19  ;;  %v447_v14 = vpack.c.bf16 %v207_v2, %v199_v1  ;;  %v448_v19 = vpack.c.bf16 %v208_v5, %v200_v3 }
 0x12a   : > { %v981_v33 = vpop.f32.mrf.mxu2  ;;  %v806_v38 = vpop.f32.mrf.mxu0 }
 0x12b   : > { %v982_v36 = vadd.f32 %v981_v33, %v893_v22  ;;  %v1070_v37 = vpop.f32.mrf.mxu3  ;;  %v807_v42 = vadd.f32 %v2102_v60, %v806_v38  ;;  %v895_v43 = vpop.f32.mrf.mxu1  ;;  %v213_v33 = vld [vmem:[%s1892_s4 + $0x120] sm:$0xff]  ;;  %v215_v38 = vld [vmem:[%s1892_s4 + $0x130] sm:$0xff] }
 0x12d   : > { %v2295_v46 = vadd.f32 %v1070_v37, %v982_v36  ;;  %v896_v47 = vadd.f32 %v895_v43, %v807_v42  ;;  %1121 = vmatmul.bf16.vlgmr.msrb.gmra.mxu0 %v437_v35  ;;  %v221_v35 = vld [vmem:[%s1892_s4 + $0x160] sm:$0xff]  ;;  %v214_v36 = vld [vmem:[%s1892_s4 + $0x128] sm:$0xff]  ;;  %v224_v42 = vld [vmem:[%s1892_s4 + $0x178] sm:$0xff] }
 0x12e   : > { %1210 = vmatmul.bf16.vlgmr.msrb.gmra.mxu1 %v438_v39  ;;  %v222_v37 = vld [vmem:[%s1892_s4 + $0x168] sm:$0xff]  ;;  %v223_v39 = vld [vmem:[%s1892_s4 + $0x170] sm:$0xff] }
 0x12f   : > { %1299 = vmatmul.bf16.vlgmr.msrb.gmra.mxu2 %v439_v41  ;;  %v216_v41 = vld [vmem:[%s1892_s4 + $0x138] sm:$0xff] }
 0x130   : > { %1388 = vmatmul.bf16.vlgmr.msrb.gmra.mxu3 %v440_v45  ;;  %v453_v45 = vpack.c.bf16 %v221_v35, %v213_v33 }
 0x132   : > { %v984_v48 = vpop.f32.mrf.mxu2  ;;  %v808_v53 = vpop.f32.mrf.mxu0 }
 0x133   : > { %v985_v50 = vadd.f32 %v984_v48, %v896_v47  ;;  %v1073_v52 = vpop.f32.mrf.mxu3  ;;  %v809_v54 = vadd.f32 %v2102_v60, %v808_v53  ;;  %v897_v55 = vpop.f32.mrf.mxu1  ;;  %v455_v53 = vpack.c.bf16 %v223_v39, %v215_v38 }
 0x135   : > { %v2298_v56 = vadd.f32 %v1073_v52, %v985_v50  ;;  %v898_v57 = vadd.f32 %v897_v55, %v809_v54  ;;  %v454_v52 = vpack.c.bf16 %v222_v37, %v214_v36 }
 0x13a   : > { %v986_v6 = vpop.f32.mrf.mxu2  ;;  %v811_v12 = vpop.f32.mrf.mxu0 }
 0x13b   : > { %v987_v9 = vadd.f32 %v986_v6, %v898_v57  ;;  %v1075_v10 = vpop.f32.mrf.mxu3  ;;  %v812_v15 = vadd.f32 %v2102_v60, %v811_v12  ;;  %v900_v18 = vpop.f32.mrf.mxu1  ;;  %v456_v57 = vpack.c.bf16 %v224_v42, %v216_v41  ;;  %v230_v12 = vld [vmem:[%s1892_s4 + $0x1a8] sm:$0xff] }
 0x13d   : > { %v2309_v20 = vadd.f32 %v1075_v10, %v987_v9  ;;  %v901_v22 = vadd.f32 %v900_v18, %v812_v15  ;;  %1126 = vmatmul.bf16.gmra.mxu0 %v445_v7  ;;  %v229_v9 = vld [vmem:[%s1892_s4 + $0x1a0] sm:$0xff]  ;;  %v239_v15 = vld [vmem:[%s1892_s4 + $0x1f0] sm:$0xff]  ;;  %v232_v18 = vld [vmem:[%s1892_s4 + $0x1b8] sm:$0xff] }
 0x13e   : > { %1215 = vmatmul.bf16.gmra.mxu1 %v446_v13  ;;  %v237_v10 = vld [vmem:[%s1892_s4 + $0x1e0] sm:$0xff]  ;;  %v238_v13 = vld [vmem:[%s1892_s4 + $0x1e8] sm:$0xff] }
 0x13f   : > { %1304 = vmatmul.bf16.gmra.mxu2 %v447_v14  ;;  %v231_v14 = vld [vmem:[%s1892_s4 + $0x1b0] sm:$0xff] }
 0x140   : > { %1393 = vmatmul.bf16.gmra.mxu3 %v448_v19  ;;  %v240_v19 = vld [vmem:[%s1892_s4 + $0x1f8] sm:$0xff] }
 0x141   : > { %v464_v35 = vpack.c.bf16 %v240_v19, %v232_v18 }
 0x142   : > { %v989_v23 = vpop.f32.mrf.mxu2  ;;  %v813_v27 = vpop.f32.mrf.mxu0 }
 0x143   : > { %v990_v24 = vadd.f32 %v989_v23, %v901_v22  ;;  %v1078_v26 = vpop.f32.mrf.mxu3  ;;  %v814_v29 = vadd.f32 %v2102_v60, %v813_v27  ;;  %v902_v30 = vpop.f32.mrf.mxu1  ;;  %v461_v23 = vpack.c.bf16 %v237_v10, %v229_v9 }
 0x145   : > { %v2312_v31 = vadd.f32 %v1078_v26, %v990_v24  ;;  %v903_v32 = vadd.f32 %v902_v30, %v814_v29  ;;  %v462_v29 = vpack.c.bf16 %v238_v13, %v230_v12  ;;  %v463_v30 = vpack.c.bf16 %v239_v15, %v231_v14 }
 0x14a   : > { %v991_v43 = vpop.f32.mrf.mxu2  ;;  %v816_v50 = vpop.f32.mrf.mxu0 }
 0x14b   : > { %v992_v47 = vadd.f32 %v991_v43, %v903_v32  ;;  %v1080_v48 = vpop.f32.mrf.mxu3  ;;  %v817_v54 = vadd.f32 %v2102_v60, %v816_v50  ;;  %v905_v55 = vpop.f32.mrf.mxu1  ;;  %v245_v50 = vld [vmem:[%s1892_s4 + $0x220] sm:$0xff] }
 0x14d   : > { %v2323_v61 = vadd.f32 %v1080_v48, %v992_v47  ;;  %v906_v62 = vadd.f32 %v905_v55, %v817_v54  ;;  %1131 = vmatmul.bf16.gmra.mxu0 %v453_v45  ;;  %v254_v54 = vld [vmem:[%s1892_s4 + $0x268] sm:$0xff]  ;;  %v247_v55 = vld [vmem:[%s1892_s4 + $0x230] sm:$0xff] }
 0x14e   : > { %1220 = vmatmul.bf16.gmra.mxu1 %v454_v52  ;;  %v253_v52 = vld [vmem:[%s1892_s4 + $0x260] sm:$0xff] }
 0x14f   : > { %1309 = vmatmul.bf16.gmra.mxu2 %v455_v53  ;;  %v246_v53 = vld [vmem:[%s1892_s4 + $0x228] sm:$0xff] }
 0x150   : > { %1398 = vmatmul.bf16.gmra.mxu3 %v456_v57  ;;  %v255_v57 = vld [vmem:[%s1892_s4 + $0x270] sm:$0xff] }
 0x151   : > { %v471_v9 = vpack.c.bf16 %v255_v57, %v247_v55 }
 0x152   : > { %v994_v63 = vpop.f32.mrf.mxu2  ;;  %v818_v2 = vpop.f32.mrf.mxu0 }
 0x153   : > { %v995_v0 = vadd.f32 %v994_v63, %v906_v62  ;;  %v1083_v1 = vpop.f32.mrf.mxu3  ;;  %v819_v3 = vadd.f32 %v2102_v60, %v818_v2  ;;  %v907_v5 = vpop.f32.mrf.mxu1  ;;  %v248_v62 = vld [vmem:[%s1892_s4 + $0x238] sm:$0xff] }
 0x154   : > { %v256_v63 = vld [vmem:[%s1892_s4 + $0x278] sm:$0xff] }
 0x155   : > { %v2326_v6 = vadd.f32 %v1083_v1, %v995_v0  ;;  %v908_v7 = vadd.f32 %v907_v5, %v819_v3  ;;  %v469_v1 = vpack.c.bf16 %v253_v52, %v245_v50  ;;  %v472_v13 = vpack.c.bf16 %v256_v63, %v248_v62 }
 0x15a   : > { %v996_v22 = vpop.f32.mrf.mxu2  ;;  %v821_v27 = vpop.f32.mrf.mxu0 }
 0x15b   : > { %v997_v24 = vadd.f32 %v996_v22, %v908_v7  ;;  %v1085_v26 = vpop.f32.mrf.mxu3  ;;  %v822_v32 = vadd.f32 %v2102_v60, %v821_v27  ;;  %v910_v33 = vpop.f32.mrf.mxu1  ;;  %v470_v7 = vpack.c.bf16 %v254_v54, %v246_v53 }
 0x15d   : > { %v2337_v36 = vadd.f32 %v1085_v26, %v997_v24  ;;  %v911_v37 = vadd.f32 %v910_v33, %v822_v32  ;;  %1136 = vmatmul.bf16.gmra.mxu0 %v461_v23  ;;  %v269_v32 = vld [vmem:[%s1892_s4 + $0x2e0] sm:$0xff]  ;;  %v262_v33 = vld [vmem:[%s1892_s4 + $0x2a8] sm:$0xff] }
 0x15e   : > { %1225 = vmatmul.bf16.gmra.mxu1 %v462_v29 }
 0x15f   : > { %1314 = vmatmul.bf16.gmra.mxu2 %v463_v30  ;;  %v261_v30 = vld [vmem:[%s1892_s4 + $0x2a0] sm:$0xff] }
 0x160   : > { %1403 = vmatmul.bf16.gmra.mxu3 %v464_v35  ;;  %v270_v35 = vld [vmem:[%s1892_s4 + $0x2e8] sm:$0xff] }
 0x161   : > { %v478_v52 = vpack.c.bf16 %v270_v35, %v262_v33 }
 0x162   : > { %v999_v38 = vpop.f32.mrf.mxu2  ;;  %v823_v42 = vpop.f32.mrf.mxu0 }
 0x163   : > { %v1000_v39 = vadd.f32 %v999_v38, %v911_v37  ;;  %v1088_v41 = vpop.f32.mrf.mxu3  ;;  %v824_v43 = vadd.f32 %v2102_v60, %v823_v42  ;;  %v912_v45 = vpop.f32.mrf.mxu1  ;;  %v263_v37 = vld [vmem:[%s1892_s4 + $0x2b0] sm:$0xff] }
 0x164   : > { %v271_v38 = vld [vmem:[%s1892_s4 + $0x2f0] sm:$0xff] }
 0x165   : > { %v2340_v47 = vadd.f32 %v1088_v41, %v1000_v39  ;;  %v913_v48 = vadd.f32 %v912_v45, %v824_v43  ;;  %v264_v39 = vld [vmem:[%s1892_s4 + $0x2b8] sm:$0xff]  ;;  %v477_v43 = vpack.c.bf16 %v269_v32, %v261_v30  ;;  %v479_v53 = vpack.c.bf16 %v271_v38, %v263_v37 }
 0x166   : > { %v272_v41 = vld [vmem:[%s1892_s4 + $0x2f8] sm:$0xff] }
 0x167   : > { %v480_v57 = vpack.c.bf16 %v272_v41, %v264_v39 }
 0x16a   : > { %v1001_v0 = vpop.f32.mrf.mxu2  ;;  %v826_v5 = vpop.f32.mrf.mxu0 }
 0x16b   : > { %v1002_v2 = vadd.f32 %v1001_v0, %v913_v48  ;;  %v1090_v3 = vpop.f32.mrf.mxu3  ;;  %v827_v10 = vadd.f32 %v2102_v60, %v826_v5  ;;  %v915_v12 = vpop.f32.mrf.mxu1 }
 0x16d   : > { %v2351_v14 = vadd.f32 %v1090_v3, %v1002_v2  ;;  %v916_v15 = vadd.f32 %v915_v12, %v827_v10  ;;  %1141 = vmatmul.bf16.gmra.mxu0 %v469_v1  ;;  %v277_v12 = vld [vmem:[%s1892_s4 + $0x320] sm:$0xff] }
 0x16e   : > { %1230 = vmatmul.bf16.gmra.mxu1 %v470_v7 }
 0x16f   : > { %1319 = vmatmul.bf16.gmra.mxu2 %v471_v9 }
 0x170   : > { %1408 = vmatmul.bf16.gmra.mxu3 %v472_v13  ;;  %v285_v13 = vld [vmem:[%s1892_s4 + $0x360] sm:$0xff] }
 0x172   : > { %v1004_v18 = vpop.f32.mrf.mxu2  ;;  %v828_v23 = vpop.f32.mrf.mxu0 }
 0x173   : > { %v1005_v19 = vadd.f32 %v1004_v18, %v916_v15  ;;  %v1093_v22 = vpop.f32.mrf.mxu3  ;;  %v829_v24 = vadd.f32 %v2102_v60, %v828_v23  ;;  %v917_v26 = vpop.f32.mrf.mxu1  ;;  %v278_v15 = vld [vmem:[%s1892_s4 + $0x328] sm:$0xff]  ;;  %v280_v23 = vld [vmem:[%s1892_s4 + $0x338] sm:$0xff] }
 0x174   : > { %v286_v18 = vld [vmem:[%s1892_s4 + $0x368] sm:$0xff] }
 0x175   : > { %v2354_v27 = vadd.f32 %v1093_v22, %v1005_v19  ;;  %v918_v29 = vadd.f32 %v917_v26, %v829_v24  ;;  %v279_v19 = vld [vmem:[%s1892_s4 + $0x330] sm:$0xff]  ;;  %v288_v24 = vld [vmem:[%s1892_s4 + $0x378] sm:$0xff]  ;;  %v486_v35 = vpack.c.bf16 %v286_v18, %v278_v15 }
 0x176   : > { %v287_v22 = vld [vmem:[%s1892_s4 + $0x370] sm:$0xff]  ;;  %v488_v41 = vpack.c.bf16 %v288_v24, %v280_v23 }
 0x177   : > { %v487_v37 = vpack.c.bf16 %v287_v22, %v279_v19 }
 0x17a   : > { %v1006_v42 = vpop.f32.mrf.mxu2  ;;  %v831_v50 = vpop.f32.mrf.mxu0 }
 0x17b   : > { %v1007_v45 = vadd.f32 %v1006_v42, %v918_v29  ;;  %v1095_v48 = vpop.f32.mrf.mxu3  ;;  %v832_v54 = vadd.f32 %v2102_v60, %v831_v50  ;;  %v920_v55 = vpop.f32.mrf.mxu1  ;;  %v485_v29 = vpack.c.bf16 %v285_v13, %v277_v12 }
 0x17d   : > { %v2365_v62 = vadd.f32 %v1095_v48, %v1007_v45  ;;  %v921_v63 = vadd.f32 %v920_v55, %v832_v54  ;;  %1146 = vmatmul.bf16.gmra.mxu0 %v477_v43 }
 0x17e   : > { %1235 = vmatmul.bf16.gmra.mxu1 %v478_v52  ;;  %v1675_v52 = vld [vmem:[%s2539_s2] ss:$0 sm:$0xff] }
 0x17f   : > { %1324 = vmatmul.bf16.gmra.mxu2 %v479_v53 }
 0x180   : > { %1413 = vmatmul.bf16.gmra.mxu3 %v480_v57 }
 0x182   : > { %v1009_v0 = vpop.f32.mrf.mxu2  ;;  %v833_v3 = vpop.f32.mrf.mxu0 }
 0x183   : > { %v1010_v1 = vadd.f32 %v1009_v0, %v921_v63  ;;  %v1098_v2 = vpop.f32.mrf.mxu3  ;;  %v834_v5 = vadd.f32 %v2102_v60, %v833_v3  ;;  %v922_v7 = vpop.f32.mrf.mxu1  ;;  %v293_v63 = vld [vmem:[%s1892_s4 + $0x3a0] sm:$0xff]  ;;  %v295_v3 = vld [vmem:[%s1892_s4 + $0x3b0] sm:$0xff] }
 0x184   : > { %v301_v0 = vld [vmem:[%s1892_s4 + $0x3e0] sm:$0xff] }
 0x185   : > { %v2368_v9 = vadd.f32 %v1098_v2, %v1010_v1  ;;  %v923_v10 = vadd.f32 %v922_v7, %v834_v5  ;;  %v294_v1 = vld [vmem:[%s1892_s4 + $0x3a8] sm:$0xff]  ;;  %v303_v5 = vld [vmem:[%s1892_s4 + $0x3f0] sm:$0xff]  ;;  %v296_v7 = vld [vmem:[%s1892_s4 + $0x3b8] sm:$0xff]  ;;  %v493_v13 = vpack.c.bf16 %v301_v0, %v293_v63 }
 0x186   : > { %v302_v2 = vld [vmem:[%s1892_s4 + $0x3e8] sm:$0xff]  ;;  %v495_v23 = vpack.c.bf16 %v303_v5, %v295_v3  ;;  %v312_v63 = vld [vmem:[%s1892_s4 + $0x438] sm:$0xff] }
 0x187   : > { %v494_v22 = vpack.c.bf16 %v302_v2, %v294_v1  ;;  %v320_v0 = vld [vmem:[%s1892_s4 + $0x478] sm:$0xff] }
 0x18a   : > { %v1011_v26 = vpop.f32.mrf.mxu2  ;;  %v836_v33 = vpop.f32.mrf.mxu0 }
 0x18b   : > { %v1012_v30 = vadd.f32 %v1011_v26, %v923_v10  ;;  %v1100_v32 = vpop.f32.mrf.mxu3  ;;  %v837_v38 = vadd.f32 %v2102_v60, %v836_v33  ;;  %v925_v39 = vpop.f32.mrf.mxu1  ;;  %v304_v10 = vld [vmem:[%s1892_s4 + $0x3f8] sm:$0xff] }
 0x18d   : > { %v2379_v42 = vadd.f32 %v1100_v32, %v1012_v30  ;;  %v926_v43 = vadd.f32 %v925_v39, %v837_v38  ;;  %1151 = vmatmul.bf16.gmra.mxu0 %v485_v29  ;;  %v496_v29 = vpack.c.bf16 %v304_v10, %v296_v7 }
 0x18e   : > { %1240 = vmatmul.bf16.gmra.mxu1 %v486_v35 }
 0x18f   : > { %1329 = vmatmul.bf16.gmra.mxu2 %v487_v37 }
 0x190   : > { %1418 = vmatmul.bf16.gmra.mxu3 %v488_v41 }
 0x192   : > { %v1014_v45 = vpop.f32.mrf.mxu2  ;;  %v838_v50 = vpop.f32.mrf.mxu0 }
 0x193   : > { %v1015_v48 = vadd.f32 %v1014_v45, %v926_v43  ;;  %v1103_v60 = vpop.f32.mrf.mxu3  ;;  %v839_v53 = vadd.f32 %v1675_v52, %v838_v50  ;;  %v927_v54 = vpop.f32.mrf.mxu1  ;;  %v310_v50 = vld [vmem:[%s1892_s4 + $0x428] sm:$0xff] }
 0x195   : > { %v2384_v55 = vadd.f32 %v1103_v60, %v1015_v48  ;;  %v928_v57 = vadd.f32 %v927_v54, %v839_v53  ;;  %v309_v48 = vld [vmem:[%s1892_s4 + $0x420] sm:$0xff]  ;;  %v318_v53 = vld [vmem:[%s1892_s4 + $0x468] sm:$0xff]  ;;  %v311_v54 = vld [vmem:[%s1892_s4 + $0x430] sm:$0xff] }
 0x196   : > { %v317_v60 = vld [vmem:[%s1892_s4 + $0x460] sm:$0xff]  ;;  %v502_v10 = vpack.c.bf16 %v318_v53, %v310_v50 }
 0x197   : > { %v501_v2 = vpack.c.bf16 %v317_v60, %v309_v48  ;;  %v328_v48 = vld [vmem:[%s1892_s4 + $0x4b8] sm:$0xff] }
 0x198   : > { %v336_v60 = vld [vmem:[%s1892_s4 + $0x4f8] sm:$0xff] }
 0x19a   : > { %v1016_v12 = vpop.f32.mrf.mxu2  ;;  %v841_v19 = vpop.f32.mrf.mxu0 }
 0x19b   : > { %v1017_v15 = vadd.f32 %v1016_v12, %v928_v57  ;;  %v1105_v18 = vpop.f32.mrf.mxu3  ;;  %v842_v24 = vadd.f32 %v1675_v52, %v841_v19  ;;  %v930_v26 = vpop.f32.mrf.mxu1  ;;  %v319_v57 = vld [vmem:[%s1892_s4 + $0x470] sm:$0xff] }
 0x19c   : > { %v503_v12 = vpack.c.bf16 %v319_v57, %v311_v54 }
 0x19d   : > { %v2394_v30 = vadd.f32 %v1105_v18, %v1017_v15  ;;  %v931_v32 = vadd.f32 %v930_v26, %v842_v24  ;;  %1156 = vmatmul.bf16.gmra.mxu0 %v493_v13  ;;  %v504_v13 = vpack.c.bf16 %v320_v0, %v312_v63 }
 0x19e   : > { %1245 = vmatmul.bf16.gmra.mxu1 %v494_v22 }
 0x19f   : > { %1334 = vmatmul.bf16.gmra.mxu2 %v495_v23 }
 0x1a0   : > { %1423 = vmatmul.bf16.gmra.mxu3 %v496_v29 }
 0x1a2   : > { %v1019_v33 = vpop.f32.mrf.mxu2  ;;  %v843_v38 = vpop.f32.mrf.mxu0 }
 0x1a3   : > { %v1020_v35 = vadd.f32 %v1019_v33, %v931_v32  ;;  %v1108_v37 = vpop.f32.mrf.mxu3  ;;  %v844_v39 = vadd.f32 %v1675_v52, %v843_v38  ;;  %v932_v41 = vpop.f32.mrf.mxu1  ;;  %v325_v33 = vld [vmem:[%s1892_s4 + $0x4a0] sm:$0xff]  ;;  %v334_v38 = vld [vmem:[%s1892_s4 + $0x4e8] sm:$0xff] }
 0x1a5   : > { %v2396_v43 = vadd.f32 %v1108_v37, %v1020_v35  ;;  %v933_v45 = vadd.f32 %v932_v41, %v844_v39  ;;  %v333_v35 = vld [vmem:[%s1892_s4 + $0x4e0] sm:$0xff]  ;;  %v326_v37 = vld [vmem:[%s1892_s4 + $0x4a8] sm:$0xff]  ;;  %v327_v39 = vld [vmem:[%s1892_s4 + $0x4b0] sm:$0xff] }
 0x1a6   : > { %v335_v41 = vld [vmem:[%s1892_s4 + $0x4f0] sm:$0xff]  ;;  %v509_v53 = vpack.c.bf16 %v333_v35, %v325_v33  ;;  %v510_v63 = vpack.c.bf16 %v334_v38, %v326_v37  ;;  %v344_v37 = vld [vmem:[%s1892_s4 + $0x538] sm:$0xff] }
 0x1a7   : > { %v511_v0 = vpack.c.bf16 %v335_v41, %v327_v39  ;;  %v351_v33 = vld [vmem:[%s1892_s4 + $0x570] sm:$0xff]  ;;  %v352_v38 = vld [vmem:[%s1892_s4 + $0x578] sm:$0xff] }
 0x1aa   : > { %v1021_v1 = vpop.f32.mrf.mxu2  ;;  %v1122_v7 = vpop.f32.mrf.mxu0 }
 0x1ab   : > { %v1022_v3 = vadd.f32 %v1021_v1, %v933_v45  ;;  %v1110_v5 = vpop.f32.mrf.mxu3  ;;  %v1211_v52 = vpop.f32.mrf.mxu1  ;;  %v1123_v18 = vadd.f32 %v1122_v7, %v2132_v28 }
 0x1ad   : > { %v2406_v15 = vadd.f32 %v1110_v5, %v1022_v3  ;;  %1161 = vmatmul.bf16.gmra.mxu0 %v501_v2  ;;  %v1212_v19 = vadd.f32 %v1211_v52, %v1123_v18  ;;  %v512_v2 = vpack.c.bf16 %v336_v60, %v328_v48 }
 0x1ae   : > { %1250 = vmatmul.bf16.gmra.mxu1 %v502_v10 }
 0x1af   : > { %1339 = vmatmul.bf16.gmra.mxu2 %v503_v12 }
 0x1b0   : > { %1428 = vmatmul.bf16.gmra.mxu3 %v504_v13 }
 0x1b2   : > { %v1300_v22 = vpop.f32.mrf.mxu2  ;;  %v1124_v26 = vpop.f32.mrf.mxu0 }
 0x1b3   : > { %v1301_v23 = vadd.f32 %v1300_v22, %v1212_v19  ;;  %v1389_v24 = vpop.f32.mrf.mxu3  ;;  %v1213_v29 = vpop.f32.mrf.mxu1  ;;  %v1125_v28 = vadd.f32 %v1124_v26, %v2149_v51  ;;  %v349_v26 = vld [vmem:[%s1892_s4 + $0x560] sm:$0xff] }
 0x1b5   : > { %v1390_v32 = vadd.f32 %v1389_v24, %v1301_v23  ;;  %v1214_v45 = vadd.f32 %v1213_v29, %v1125_v28  ;;  %v341_v24 = vld [vmem:[%s1892_s4 + $0x520] sm:$0xff]  ;;  %v342_v29 = vld [vmem:[%s1892_s4 + $0x528] sm:$0xff]  ;;  %v343_v28 = vld [vmem:[%s1892_s4 + $0x530] sm:$0xff] }
 0x1b6   : > { %v517_v41 = vpack.c.bf16 %v349_v26, %v341_v24  ;;  %v360_v24 = vld [vmem:[%s1892_s4 + $0x5b8] sm:$0xff] }
 0x1b7   : > { %1611 = vtanh.f32 %v1390_v32  ;;  %v350_v32 = vld [vmem:[%s1892_s4 + $0x568] sm:$0xff]  ;;  %v368_v26 = vld [vmem:[%s1892_s4 + $0x5f8] sm:$0xff] }
 0x1ba   : > { %v1302_v50 = vpop.f32.mrf.mxu2  ;;  %v1127_v57 = vpop.f32.mrf.mxu0 }
 0x1bb   : > { %v1303_v51 = vadd.f32 %v1302_v50, %v1214_v45  ;;  %v1391_v54 = vpop.f32.mrf.mxu3  ;;  %v1216_v1 = vpop.f32.mrf.mxu1  ;;  %v1128_v7 = vadd.f32 %v1127_v57, %v2152_v59  ;;  %v518_v50 = vpack.c.bf16 %v350_v32, %v342_v29 }
 0x1bd   : > { %v1612_v3 = vpop.eup %1611  ;;  %v1392_v5 = vadd.f32 %v1391_v54, %v1303_v51  ;;  %1166 = vmatmul.bf16.gmra.mxu0 %v509_v53  ;;  %v1217_v10 = vadd.f32 %v1216_v1, %v1128_v7  ;;  %v519_v53 = vpack.c.bf16 %v351_v33, %v343_v28  ;;  %v520_v51 = vpack.c.bf16 %v352_v38, %v344_v37 }
 0x1be   : > { %1501 = vst [vmem:[%s2422_s11] sm:$0xff] %v1612_v3  ;;  %1255 = vmatmul.bf16.gmra.mxu1 %v510_v63 }
 0x1bf   : > { %1613 = vtanh.f32 %v1392_v5  ;;  %1344 = vmatmul.bf16.gmra.mxu2 %v511_v0 }
 0x1c0   : > { %1433 = vmatmul.bf16.gmra.mxu3 %v512_v2 }
 0x1c2   : > { %v1305_v12 = vpop.f32.mrf.mxu2  ;;  %v1129_v59 = vpop.f32.mrf.mxu0 }
 0x1c3   : > { %v1306_v52 = vadd.f32 %v1305_v12, %v1217_v10  ;;  %v1394_v13 = vpop.f32.mrf.mxu3  ;;  %v1218_v18 = vpop.f32.mrf.mxu1  ;;  %v1130_v23 = vadd.f32 %v1129_v59, %v2163_v16  ;;  %v358_v59 = vld [vmem:[%s1892_s4 + $0x5a8] sm:$0xff] }
 0x1c5   : > { %v1614_v19 = vpop.eup %1613  ;;  %v1395_v22 = vadd.f32 %v1394_v13, %v1306_v52  ;;  %v1219_v35 = vadd.f32 %v1218_v18, %v1130_v23  ;;  %v357_v52 = vld [vmem:[%s1892_s4 + $0x5a0] sm:$0xff]  ;;  %v366_v18 = vld [vmem:[%s1892_s4 + $0x5e8] sm:$0xff] }
 0x1c6   : > { %1502 = vst [vmem:[%s2422_s11 + $0x8] sm:$0xff] %v1614_v19  ;;  %v365_v13 = vld [vmem:[%s1892_s4 + $0x5e0] sm:$0xff]  ;;  %v359_v19 = vld [vmem:[%s1892_s4 + $0x5b0] sm:$0xff]  ;;  %v526_v37 = vpack.c.bf16 %v366_v18, %v358_v59 }
 0x1c7   : > { %1615 = vtanh.f32 %v1395_v22  ;;  %v367_v22 = vld [vmem:[%s1892_s4 + $0x5f0] sm:$0xff]  ;;  %v525_v32 = vpack.c.bf16 %v365_v13, %v357_v52 }
 0x1c8   : > { %v527_v38 = vpack.c.bf16 %v367_v22, %v359_v19 }
 0x1ca   : > { %v1307_v39 = vpop.f32.mrf.mxu2  ;;  %v1132_v60 = vpop.f32.mrf.mxu0 }
 0x1cb   : > { %v1308_v45 = vadd.f32 %v1307_v39, %v1219_v35  ;;  %v1396_v48 = vpop.f32.mrf.mxu3  ;;  %v1221_v16 = vpop.f32.mrf.mxu1  ;;  %v1133_v63 = vadd.f32 %v1132_v60, %v2184_v34  ;;  %v528_v39 = vpack.c.bf16 %v368_v26, %v360_v24 }
 0x1cd   : > { %v1616_v54 = vpop.eup %1615  ;;  %v1397_v57 = vadd.f32 %v1396_v48, %v1308_v45  ;;  %1171 = vmatmul.bf16.gmra.mxu0 %v517_v41  ;;  %v1222_v0 = vadd.f32 %v1221_v16, %v1133_v63 }
 0x1ce   : > { %1503 = vst [vmem:[%s2422_s11 + $0x10] sm:$0xff] %v1616_v54  ;;  %1260 = vmatmul.bf16.gmra.mxu1 %v518_v50 }
 0x1cf   : > { %1617 = vtanh.f32 %v1397_v57  ;;  %1349 = vmatmul.bf16.gmra.mxu2 %v519_v53 }
 0x1d0   : > { %1438 = vmatmul.bf16.gmra.mxu3 %v520_v51 }
 0x1d2   : > { %v1310_v1 = vpop.f32.mrf.mxu2  ;;  %v1134_v34 = vpop.f32.mrf.mxu0 }
 0x1d3   : > { %v1311_v2 = vadd.f32 %v1310_v1, %v1222_v0  ;;  %v1399_v3 = vpop.f32.mrf.mxu3  ;;  %v1223_v5 = vpop.f32.mrf.mxu1  ;;  %v1135_v12 = vadd.f32 %v1134_v34, %v2201_v58  ;;  %v373_v0 = vld [vmem:[%s1892_s4 + $0x620] sm:$0xff]  ;;  %v375_v34 = vld [vmem:[%s1892_s4 + $0x630] sm:$0xff] }
 0x1d4   : > { %v381_v1 = vld [vmem:[%s1892_s4 + $0x660] sm:$0xff] }
 0x1d5   : > { %v1618_v7 = vpop.eup %1617  ;;  %v1400_v10 = vadd.f32 %v1399_v3, %v1311_v2  ;;  %v1224_v23 = vadd.f32 %v1223_v5, %v1135_v12  ;;  %v374_v2 = vld [vmem:[%s1892_s4 + $0x628] sm:$0xff]  ;;  %v383_v5 = vld [vmem:[%s1892_s4 + $0x670] sm:$0xff]  ;;  %v384_v12 = vld [vmem:[%s1892_s4 + $0x678] sm:$0xff]  ;;  %v533_v13 = vpack.c.bf16 %v381_v1, %v373_v0 }
 0x1d6   : > { %1504 = vst [vmem:[%s2422_s11 + $0x18] sm:$0xff] %v1618_v7  ;;  %v382_v3 = vld [vmem:[%s1892_s4 + $0x668] sm:$0xff] }
 0x1d7   : > { %1619 = vtanh.f32 %v1400_v10  ;;  %v376_v10 = vld [vmem:[%s1892_s4 + $0x638] sm:$0xff]  ;;  %v534_v22 = vpack.c.bf16 %v382_v3, %v374_v2 }
 0x1d8   : > { %v536_v24 = vpack.c.bf16 %v384_v12, %v376_v10 }
 0x1da   : > { %v1312_v29 = vpop.f32.mrf.mxu2  ;;  %v1137_v35 = vpop.f32.mrf.mxu0 }
 0x1db   : > { %v1313_v28 = vadd.f32 %v1312_v29, %v1224_v23  ;;  %v1401_v33 = vpop.f32.mrf.mxu3  ;;  %v1226_v58 = vpop.f32.mrf.mxu1  ;;  %v1138_v48 = vadd.f32 %v1137_v35, %v2204_v4  ;;  %v535_v23 = vpack.c.bf16 %v383_v5, %v375_v34 }
 0x1dd   : > { %v1620_v41 = vpop.eup %1619  ;;  %v1402_v45 = vadd.f32 %v1401_v33, %v1313_v28  ;;  %1176 = vmatmul.bf16.gmra.mxu0 %v525_v32  ;;  %v1227_v60 = vadd.f32 %v1226_v58, %v1138_v48  ;;  %v397_v48 = vld [vmem:[%s1892_s4 + $0x6e0] sm:$0xff] }
 0x1de   : > { %1505 = vst [vmem:[%s2422_s11 + $0x20] sm:$0xff] %v1620_v41  ;;  %1265 = vmatmul.bf16.gmra.mxu1 %v526_v37 }
 0x1df   : > { %1621 = vtanh.f32 %v1402_v45  ;;  %1354 = vmatmul.bf16.gmra.mxu2 %v527_v38  ;;  %v389_v45 = vld [vmem:[%s1892_s4 + $0x6a0] sm:$0xff] }
 0x1e0   : > { %1443 = vmatmul.bf16.gmra.mxu3 %v528_v39 }
 0x1e2   : > { %v1315_v50 = vpop.f32.mrf.mxu2  ;;  %v1139_v4 = vpop.f32.mrf.mxu0 }
 0x1e3   : > { %v1316_v53 = vadd.f32 %v1315_v50, %v1227_v60  ;;  %v1404_v16 = vpop.f32.mrf.mxu3  ;;  %v1228_v51 = vpop.f32.mrf.mxu1  ;;  %v1140_v63 = vadd.f32 %v1139_v4, %v2215_v25  ;;  %v390_v60 = vld [vmem:[%s1892_s4 + $0x6a8] sm:$0xff] }
 0x1e4   : > { %v398_v50 = vld [vmem:[%s1892_s4 + $0x6e8] sm:$0xff] }
 0x1e5   : > { %v1622_v54 = vpop.eup %1621  ;;  %v1405_v57 = vadd.f32 %v1404_v16, %v1316_v53  ;;  %v1229_v7 = vadd.f32 %v1228_v51, %v1140_v63  ;;  %v391_v53 = vld [vmem:[%s1892_s4 + $0x6b0] sm:$0xff]  ;;  %v392_v51 = vld [vmem:[%s1892_s4 + $0x6b8] sm:$0xff]  ;;  %v541_v63 = vpack.c.bf16 %v397_v48, %v389_v45  ;;  %v542_v3 = vpack.c.bf16 %v398_v50, %v390_v60 }
 0x1e6   : > { %1506 = vst [vmem:[%s2422_s11 + $0x28] sm:$0xff] %v1622_v54  ;;  %v399_v16 = vld [vmem:[%s1892_s4 + $0x6f0] sm:$0xff]  ;;  %v400_v54 = vld [vmem:[%s1892_s4 + $0x6f8] sm:$0xff] }
 0x1e7   : > { %1623 = vtanh.f32 %v1405_v57  ;;  %v543_v34 = vpack.c.bf16 %v399_v16, %v391_v53  ;;  %v544_v5 = vpack.c.bf16 %v400_v54, %v392_v51 }
 0x1ea   : > { %v1317_v52 = vpop.f32.mrf.mxu2  ;;  %v1142_v19 = vpop.f32.mrf.mxu0 }
 0x1eb   : > { %v1318_v59 = vadd.f32 %v1317_v52, %v1229_v7  ;;  %v1406_v18 = vpop.f32.mrf.mxu3  ;;  %v1231_v25 = vpop.f32.mrf.mxu1  ;;  %v1143_v32 = vadd.f32 %v1142_v19, %v2236_v44 }
 0x1ed   : > { %v1624_v26 = vpop.eup %1623  ;;  %v1407_v29 = vadd.f32 %v1406_v18, %v1318_v59  ;;  %1181 = vmatmul.bf16.gmra.mxu0 %v533_v13  ;;  %v1232_v28 = vadd.f32 %v1231_v25, %v1143_v32  ;;  %v414_v32 = vld [vmem:[%s1892_s4 + $0x768] sm:$0xff] }
 0x1ee   : > { %1507 = vst [vmem:[%s2422_s11 + $0x30] sm:$0xff] %v1624_v26  ;;  %1270 = vmatmul.bf16.gmra.mxu1 %v534_v22  ;;  %v413_v26 = vld [vmem:[%s1892_s4 + $0x760] sm:$0xff] }
 0x1ef   : > { %1625 = vtanh.f32 %v1407_v29  ;;  %1359 = vmatmul.bf16.gmra.mxu2 %v535_v23  ;;  %v406_v29 = vld [vmem:[%s1892_s4 + $0x728] sm:$0xff] }
 0x1f0   : > { %1448 = vmatmul.bf16.gmra.mxu3 %v536_v24  ;;  %v405_v24 = vld [vmem:[%s1892_s4 + $0x720] sm:$0xff]  ;;  %v550_v48 = vpack.c.bf16 %v414_v32, %v406_v29 }
 0x1f2   : > { %v1320_v33 = vpop.f32.mrf.mxu2  ;;  %v1144_v44 = vpop.f32.mrf.mxu0 }
 0x1f3   : > { %v1321_v35 = vadd.f32 %v1320_v33, %v1232_v28  ;;  %v1409_v37 = vpop.f32.mrf.mxu3  ;;  %v1233_v38 = vpop.f32.mrf.mxu1  ;;  %v1145_v41 = vadd.f32 %v1144_v44, %v2253_v8  ;;  %v407_v28 = vld [vmem:[%s1892_s4 + $0x730] sm:$0xff]  ;;  %v416_v44 = vld [vmem:[%s1892_s4 + $0x778] sm:$0xff] }
 0x1f4   : > { %v415_v33 = vld [vmem:[%s1892_s4 + $0x770] sm:$0xff] }
 0x1f5   : > { %v1626_v58 = vpop.eup %1625  ;;  %v1410_v39 = vadd.f32 %v1409_v37, %v1321_v35  ;;  %v1234_v4 = vadd.f32 %v1233_v38, %v1145_v41  ;;  %v408_v37 = vld [vmem:[%s1892_s4 + $0x738] sm:$0xff]  ;;  %v551_v60 = vpack.c.bf16 %v415_v33, %v407_v28 }
 0x1f6   : > { %1508 = vst [vmem:[%s2422_s11 + $0x38] sm:$0xff] %v1626_v58  ;;  %v549_v58 = vpack.c.bf16 %v413_v26, %v405_v24  ;;  %v552_v50 = vpack.c.bf16 %v416_v44, %v408_v37 }
 0x1f7   : > { %1627 = vtanh.f32 %v1410_v39 }
 0x1fa   : > { %v1322_v57 = vpop.f32.mrf.mxu2  ;;  %v1147_v2 = vpop.f32.mrf.mxu0 }
 0x1fb   : > { %v1323_v0 = vadd.f32 %v1322_v57, %v1234_v4  ;;  %v1411_v1 = vpop.f32.mrf.mxu3  ;;  %v1236_v8 = vpop.f32.mrf.mxu1  ;;  %v1148_v12 = vadd.f32 %v1147_v2, %v2256_v17 }
 0x1fd   : > { %v1628_v7 = vpop.eup %1627  ;;  %v1412_v10 = vadd.f32 %v1411_v1, %v1323_v0  ;;  %1186 = vmatmul.bf16.gmra.mxu0 %v541_v63  ;;  %v1237_v52 = vadd.f32 %v1236_v8, %v1148_v12  ;;  %v429_v8 = vld [vmem:[%s1892_s4 + $0x7e0] sm:$0xff]  ;;  %v431_v12 = vld [vmem:[%s1892_s4 + $0x7f0] sm:$0xff] }
 0x1fe   : > { %1509 = vst [vmem:[%s2422_s11 + $0x40] sm:$0xff] %v1628_v7  ;;  %1275 = vmatmul.bf16.gmra.mxu1 %v542_v3  ;;  %v430_v7 = vld [vmem:[%s1892_s4 + $0x7e8] sm:$0xff] }
 0x1ff   : > { %1629 = vtanh.f32 %v1412_v10  ;;  %1364 = vmatmul.bf16.gmra.mxu2 %v543_v34  ;;  %v421_v34 = vld [vmem:[%s1892_s4 + $0x7a0] sm:$0xff]  ;;  %v423_v10 = vld [vmem:[%s1892_s4 + $0x7b0] sm:$0xff] }
 0x200   : > { %1453 = vmatmul.bf16.gmra.mxu3 %v544_v5  ;;  %v422_v5 = vld [vmem:[%s1892_s4 + $0x7a8] sm:$0xff]  ;;  %v559_v24 = vpack.c.bf16 %v431_v12, %v423_v10 }
 0x202   : > { %v1325_v13 = vpop.f32.mrf.mxu2  ;;  %v1149_v17 = vpop.f32.mrf.mxu0 }
 0x203   : > { %v1326_v59 = vadd.f32 %v1325_v13, %v1237_v52  ;;  %v1414_v18 = vpop.f32.mrf.mxu3  ;;  %v1238_v19 = vpop.f32.mrf.mxu1  ;;  %v1150_v25 = vadd.f32 %v1149_v17, %v2267_v40  ;;  %v424_v13 = vld [vmem:[%s1892_s4 + $0x7b8] sm:$0xff]  ;;  %v557_v17 = vpack.c.bf16 %v429_v8, %v421_v34 }
 0x205   : > { %v1630_v22 = vpop.eup %1629  ;;  %v1415_v23 = vadd.f32 %v1414_v18, %v1326_v59  ;;  %v1239_v35 = vadd.f32 %v1238_v19, %v1150_v25  ;;  %v432_v59 = vld [vmem:[%s1892_s4 + $0x7f8] sm:$0xff]  ;;  %v558_v25 = vpack.c.bf16 %v430_v7, %v422_v5 }
 0x206   : > { %1510 = vst [vmem:[%s2422_s11 + $0x48] sm:$0xff] %v1630_v22  ;;  %v560_v26 = vpack.c.bf16 %v432_v59, %v424_v13 }
 0x207   : > { %1631 = vtanh.f32 %v1415_v23 }
 0x20a   : > { %v1327_v38 = vpop.f32.mrf.mxu2  ;;  %v1152_v45 = vpop.f32.mrf.mxu0 }
 0x20b   : > { %v1328_v39 = vadd.f32 %v1327_v38, %v1239_v35  ;;  %v1416_v41 = vpop.f32.mrf.mxu3  ;;  %v1241_v40 = vpop.f32.mrf.mxu1  ;;  %v1153_v4 = vadd.f32 %v1152_v45, %v2270_v49 }
 0x20d   : > { %v1632_v53 = vpop.eup %1631  ;;  %v1417_v16 = vadd.f32 %v1416_v41, %v1328_v39  ;;  %1191 = vmatmul.bf16.gmra.mxu0 %v549_v58  ;;  %v1242_v51 = vadd.f32 %v1241_v40, %v1153_v4 }
 0x20e   : > { %1511 = vst [vmem:[%s2422_s11 + $0x50] sm:$0xff] %v1632_v53  ;;  %1280 = vmatmul.bf16.gmra.mxu1 %v550_v48 }
 0x20f   : > { %1633 = vtanh.f32 %v1417_v16  ;;  %1369 = vmatmul.bf16.gmra.mxu2 %v551_v60 }
 0x210   : > { %1458 = vmatmul.bf16.gmra.mxu3 %v552_v50 }
 0x212   : > { %v1330_v54 = vpop.f32.mrf.mxu2  ;;  %v1154_v49 = vpop.f32.mrf.mxu0 }
 0x213   : > { %v1331_v57 = vadd.f32 %v1330_v54, %v1242_v51  ;;  %v1419_v63 = vpop.f32.mrf.mxu3  ;;  %v1243_v0 = vpop.f32.mrf.mxu1  ;;  %v1155_v3 = vadd.f32 %v1154_v49, %v2281_v11 }
 0x215   : > { %v1634_v1 = vpop.eup %1633  ;;  %v1420_v2 = vadd.f32 %v1419_v63, %v1331_v57  ;;  %v1244_v52 = vadd.f32 %v1243_v0, %v1155_v3 }
 0x216   : > { %1512 = vst [vmem:[%s2422_s11 + $0x58] sm:$0xff] %v1634_v1 }
 0x217   : > { %1635 = vtanh.f32 %v1420_v2 }
 0x21a   : > { %v1332_v18 = vpop.f32.mrf.mxu2  ;;  %v1157_v23 = vpop.f32.mrf.mxu0 }
 0x21b   : > { %v1333_v19 = vadd.f32 %v1332_v18, %v1244_v52  ;;  %v1421_v22 = vpop.f32.mrf.mxu3  ;;  %v1246_v11 = vpop.f32.mrf.mxu1  ;;  %v1158_v28 = vadd.f32 %v1157_v23, %v2284_v21 }
 0x21d   : > { %v1636_v29 = vpop.eup %1635  ;;  %v1422_v32 = vadd.f32 %v1421_v22, %v1333_v19  ;;  %1196 = vmatmul.bf16.gmra.mxu0 %v557_v17  ;;  %v1247_v33 = vadd.f32 %v1246_v11, %v1158_v28 }
 0x21e   : > { %1513 = vst [vmem:[%s2422_s11 + $0x60] sm:$0xff] %v1636_v29  ;;  %1285 = vmatmul.bf16.gmra.mxu1 %v558_v25 }
 0x21f   : > { %1637 = vtanh.f32 %v1422_v32  ;;  %1374 = vmatmul.bf16.gmra.mxu2 %v559_v24 }
 0x220   : > { %1463 = vmatmul.bf16.gmra.mxu3 %v560_v26 }
 0x222   : > { %v1335_v35 = vpop.f32.mrf.mxu2  ;;  %v1159_v38 = vpop.f32.mrf.mxu0 }
 0x223   : > { %v1336_v37 = vadd.f32 %v1335_v35, %v1247_v33  ;;  %v1424_v44 = vpop.f32.mrf.mxu3  ;;  %v1248_v58 = vpop.f32.mrf.mxu1  ;;  %v1160_v45 = vadd.f32 %v1159_v38, %v2295_v46 }
 0x225   : > { %v1638_v39 = vpop.eup %1637  ;;  %v1425_v41 = vadd.f32 %v1424_v44, %v1336_v37  ;;  %v1249_v21 = vadd.f32 %v1248_v58, %v1160_v45 }
 0x226   : > { %1514 = vst [vmem:[%s2422_s11 + $0x68] sm:$0xff] %v1638_v39 }
 0x227   : > { %1639 = vtanh.f32 %v1425_v41 }
 0x22a   : > { %v1337_v48 = vpop.f32.mrf.mxu2  ;;  %v1162_v50 = vpop.f32.mrf.mxu0 }
 0x22b   : > { %v1338_v60 = vadd.f32 %v1337_v48, %v1249_v21  ;;  %v1426_v40 = vpop.f32.mrf.mxu3  ;;  %v1251_v53 = vpop.f32.mrf.mxu1  ;;  %v1163_v51 = vadd.f32 %v1162_v50, %v2298_v56 }
 0x22d   : > { %v1640_v16 = vpop.eup %1639  ;;  %v1427_v4 = vadd.f32 %v1426_v40, %v1338_v60  ;;  %v1252_v54 = vadd.f32 %v1251_v53, %v1163_v51 }
 0x22e   : > { %1515 = vst [vmem:[%s2422_s11 + $0x70] sm:$0xff] %v1640_v16 }
 0x22f   : > { %1641 = vtanh.f32 %v1427_v4 }
 0x232   : > { %v1340_v57 = vpop.f32.mrf.mxu2  ;;  %v1164_v46 = vpop.f32.mrf.mxu0 }
 0x233   : > { %v1341_v63 = vadd.f32 %v1340_v57, %v1252_v54  ;;  %v1429_v49 = vpop.f32.mrf.mxu3  ;;  %v1253_v0 = vpop.f32.mrf.mxu1  ;;  %v1165_v3 = vadd.f32 %v1164_v46, %v2309_v20 }
 0x235   : > { %v1642_v1 = vpop.eup %1641  ;;  %v1430_v2 = vadd.f32 %v1429_v49, %v1341_v63  ;;  %v1254_v34 = vadd.f32 %v1253_v0, %v1165_v3 }
 0x236   : > { %1516 = vst [vmem:[%s2422_s11 + $0x78] sm:$0xff] %v1642_v1 }
 0x237   : > { %1643 = vtanh.f32 %v1430_v2 }
 0x23a   : > { %v1342_v8 = vpop.f32.mrf.mxu2  ;;  %v1167_v56 = vpop.f32.mrf.mxu0 }
 0x23b   : > { %v1343_v5 = vadd.f32 %v1342_v8, %v1254_v34  ;;  %v1431_v7 = vpop.f32.mrf.mxu3  ;;  %v1256_v10 = vpop.f32.mrf.mxu1  ;;  %v1168_v13 = vadd.f32 %v1167_v56, %v2312_v31 }
 0x23d   : > { %v1644_v12 = vpop.eup %1643  ;;  %v1432_v52 = vadd.f32 %v1431_v7, %v1343_v5  ;;  %v1257_v59 = vadd.f32 %v1256_v10, %v1168_v13 }
 0x23e   : > { %1517 = vst [vmem:[%s2422_s11 + $0x80] sm:$0xff] %v1644_v12 }
 0x23f   : > { %1645 = vtanh.f32 %v1432_v52 }
 0x242   : > { %v1345_v18 = vpop.f32.mrf.mxu2  ;;  %v1169_v20 = vpop.f32.mrf.mxu0 }
 0x243   : > { %v1346_v17 = vadd.f32 %v1345_v18, %v1257_v59  ;;  %v1434_v19 = vpop.f32.mrf.mxu3  ;;  %v1258_v22 = vpop.f32.mrf.mxu1  ;;  %v1170_v24 = vadd.f32 %v1169_v20, %v2323_v61 }
 0x245   : > { %v1646_v23 = vpop.eup %1645  ;;  %v1435_v25 = vadd.f32 %v1434_v19, %v1346_v17  ;;  %v1259_v11 = vadd.f32 %v1258_v22, %v1170_v24 }
 0x246   : > { %1518 = vst [vmem:[%s2422_s11 + $0x88] sm:$0xff] %v1646_v23 }
 0x247   : > { %1647 = vtanh.f32 %v1435_v25 }
 0x24a   : > { %v1347_v26 = vpop.f32.mrf.mxu2  ;;  %v1172_v31 = vpop.f32.mrf.mxu0 }
 0x24b   : > { %v1348_v29 = vadd.f32 %v1347_v26, %v1259_v11  ;;  %v1436_v32 = vpop.f32.mrf.mxu3  ;;  %v1261_v28 = vpop.f32.mrf.mxu1  ;;  %v1173_v37 = vadd.f32 %v1172_v31, %v2326_v6 }
 0x24d   : > { %v1648_v33 = vpop.eup %1647  ;;  %v1437_v35 = vadd.f32 %v1436_v32, %v1348_v29  ;;  %v1262_v44 = vadd.f32 %v1261_v28, %v1173_v37 }
 0x24e   : > { %1519 = vst [vmem:[%s2422_s11 + $0x90] sm:$0xff] %v1648_v33 }
 0x24f   : > { %1649 = vtanh.f32 %v1437_v35 }
 0x252   : > { %v1350_v38 = vpop.f32.mrf.mxu2  ;;  %v1174_v61 = vpop.f32.mrf.mxu0 }
 0x253   : > { %v1351_v58 = vadd.f32 %v1350_v38, %v1262_v44  ;;  %v1439_v39 = vpop.f32.mrf.mxu3  ;;  %v1263_v41 = vpop.f32.mrf.mxu1  ;;  %v1175_v48 = vadd.f32 %v1174_v61, %v2337_v36 }
 0x255   : > { %v1650_v45 = vpop.eup %1649  ;;  %v1440_v21 = vadd.f32 %v1439_v39, %v1351_v58  ;;  %v1264_v60 = vadd.f32 %v1263_v41, %v1175_v48 }
 0x256   : > { %1520 = vst [vmem:[%s2422_s11 + $0x98] sm:$0xff] %v1650_v45 }
 0x257   : > { %1651 = vtanh.f32 %v1440_v21 }
 0x25a   : > { %v1352_v40 = vpop.f32.mrf.mxu2  ;;  %v1177_v6 = vpop.f32.mrf.mxu0 }
 0x25b   : > { %v1353_v50 = vadd.f32 %v1352_v40, %v1264_v60  ;;  %v1441_v53 = vpop.f32.mrf.mxu3  ;;  %v1266_v16 = vpop.f32.mrf.mxu1  ;;  %v1178_v54 = vadd.f32 %v1177_v6, %v2340_v47 }
 0x25d   : > { %v1652_v4 = vpop.eup %1651  ;;  %v1442_v51 = vadd.f32 %v1441_v53, %v1353_v50  ;;  %v1267_v57 = vadd.f32 %v1266_v16, %v1178_v54 }
 0x25e   : > { %1521 = vst [vmem:[%s2422_s11 + $0xa0] sm:$0xff] %v1652_v4 }
 0x25f   : > { %1653 = vtanh.f32 %v1442_v51 }
 0x262   : > { %v1355_v63 = vpop.f32.mrf.mxu2  ;;  %v1179_v36 = vpop.f32.mrf.mxu0 }
 0x263   : > { %v1356_v49 = vadd.f32 %v1355_v63, %v1267_v57  ;;  %v1444_v46 = vpop.f32.mrf.mxu3  ;;  %v1268_v0 = vpop.f32.mrf.mxu1  ;;  %v1180_v3 = vadd.f32 %v1179_v36, %v2351_v14 }
 0x265   : > { %v1654_v1 = vpop.eup %1653  ;;  %v1445_v2 = vadd.f32 %v1444_v46, %v1356_v49  ;;  %v1269_v34 = vadd.f32 %v1268_v0, %v1180_v3 }
 0x266   : > { %1522 = vst [vmem:[%s2422_s11 + $0xa8] sm:$0xff] %v1654_v1 }
 0x267   : > { %1655 = vtanh.f32 %v1445_v2 }
 0x26a   : > { %v1357_v8 = vpop.f32.mrf.mxu2  ;;  %v1182_v47 = vpop.f32.mrf.mxu0 }
 0x26b   : > { %v1358_v5 = vadd.f32 %v1357_v8, %v1269_v34  ;;  %v1446_v7 = vpop.f32.mrf.mxu3  ;;  %v1271_v56 = vpop.f32.mrf.mxu1  ;;  %v1183_v52 = vadd.f32 %v1182_v47, %v2354_v27 }
 0x26d   : > { %v1656_v10 = vpop.eup %1655  ;;  %v1447_v12 = vadd.f32 %v1446_v7, %v1358_v5  ;;  %v1272_v13 = vadd.f32 %v1271_v56, %v1183_v52 }
 0x26e   : > { %1523 = vst [vmem:[%s2422_s11 + $0xb0] sm:$0xff] %v1656_v10 }
 0x26f   : > { %1657 = vtanh.f32 %v1447_v12 }
 0x272   : > { %v1360_v59 = vpop.f32.mrf.mxu2  ;;  %v1184_v14 = vpop.f32.mrf.mxu0 }
 0x273   : > { %v1361_v18 = vadd.f32 %v1360_v59, %v1272_v13  ;;  %v1449_v17 = vpop.f32.mrf.mxu3  ;;  %v1273_v19 = vpop.f32.mrf.mxu1  ;;  %v1185_v23 = vadd.f32 %v1184_v14, %v2365_v62 }
 0x275   : > { %v1658_v20 = vpop.eup %1657  ;;  %v1450_v22 = vadd.f32 %v1449_v17, %v1361_v18  ;;  %v1274_v25 = vadd.f32 %v1273_v19, %v1185_v23 }
 0x276   : > { %1524 = vst [vmem:[%s2422_s11 + $0xb8] sm:$0xff] %v1658_v20 }
 0x277   : > { %1659 = vtanh.f32 %v1450_v22 }
 0x27a   : > { %v1362_v24 = vpop.f32.mrf.mxu2  ;;  %v1187_v27 = vpop.f32.mrf.mxu0 }
 0x27b   : > { %v1363_v11 = vadd.f32 %v1362_v24, %v1274_v25  ;;  %v1451_v26 = vpop.f32.mrf.mxu3  ;;  %v1276_v29 = vpop.f32.mrf.mxu1  ;;  %v1188_v28 = vadd.f32 %v1187_v27, %v2368_v9 }
 0x27d   : > { %v1660_v32 = vpop.eup %1659  ;;  %v1452_v31 = vadd.f32 %v1451_v26, %v1363_v11  ;;  %v1277_v33 = vadd.f32 %v1276_v29, %v1188_v28 }
 0x27e   : > { %1525 = vst [vmem:[%s2422_s11 + $0xc0] sm:$0xff] %v1660_v32 }
 0x27f   : > { %1661 = vtanh.f32 %v1452_v31 }
 0x282   : > { %v1365_v35 = vpop.f32.mrf.mxu2  ;;  %v1189_v62 = vpop.f32.mrf.mxu0 }
 0x283   : > { %v1366_v37 = vadd.f32 %v1365_v35, %v1277_v33  ;;  %v1454_v44 = vpop.f32.mrf.mxu3  ;;  %v1278_v38 = vpop.f32.mrf.mxu1  ;;  %v1190_v61 = vadd.f32 %v1189_v62, %v2379_v42 }
 0x285   : > { %v1662_v58 = vpop.eup %1661  ;;  %v1455_v39 = vadd.f32 %v1454_v44, %v1366_v37  ;;  %v1279_v41 = vadd.f32 %v1278_v38, %v1190_v61 }
 0x286   : > { %1526 = vst [vmem:[%s2422_s11 + $0xc8] sm:$0xff] %v1662_v58 }
 0x287   : > { %1663 = vtanh.f32 %v1455_v39 }
 0x28a   : > { %v1367_v45 = vpop.f32.mrf.mxu2  ;;  %v1192_v9 = vpop.f32.mrf.mxu0 }
 0x28b   : > { %v1368_v21 = vadd.f32 %v1367_v45, %v1279_v41  ;;  %v1456_v48 = vpop.f32.mrf.mxu3  ;;  %v1281_v60 = vpop.f32.mrf.mxu1  ;;  %v1193_v53 = vadd.f32 %v1192_v9, %v2384_v55 }
 0x28d   : > { %v1664_v40 = vpop.eup %1663  ;;  %v1457_v50 = vadd.f32 %v1456_v48, %v1368_v21  ;;  %v1282_v6 = vadd.f32 %v1281_v60, %v1193_v53 }
 0x28e   : > { %1527 = vst [vmem:[%s2422_s11 + $0xd0] sm:$0xff] %v1664_v40 }
 0x28f   : > { %1665 = vtanh.f32 %v1457_v50 }
 0x292   : > { %v1370_v16 = vpop.f32.mrf.mxu2  ;;  %v1194_v42 = vpop.f32.mrf.mxu0 }
 0x293   : > { %v1371_v4 = vadd.f32 %v1370_v16, %v1282_v6  ;;  %v1459_v51 = vpop.f32.mrf.mxu3  ;;  %v1283_v54 = vpop.f32.mrf.mxu1  ;;  %v1195_v49 = vadd.f32 %v1194_v42, %v2394_v30 }
 0x295   : > { %v1666_v57 = vpop.eup %1665  ;;  %v1460_v63 = vadd.f32 %v1459_v51, %v1371_v4  ;;  %v1284_v46 = vadd.f32 %v1283_v54, %v1195_v49 }
 0x296   : > { %1528 = vst [vmem:[%s2422_s11 + $0xd8] sm:$0xff] %v1666_v57 }
 0x297   : > { %1667 = vtanh.f32 %v1460_v63 }
 0x29a   : > { %v1372_v36 = vpop.f32.mrf.mxu2  ;;  %v1197_v55 = vpop.f32.mrf.mxu0 }
 0x29b   : > { %v1373_v0 = vadd.f32 %v1372_v36, %v1284_v46  ;;  %v1461_v1 = vpop.f32.mrf.mxu3  ;;  %v1198_v34 = vadd.f32 %v1197_v55, %v2396_v43  ;;  %v1286_v8 = vpop.f32.mrf.mxu1 }
 0x29d   : > { %v1668_v2 = vpop.eup %1667  ;;  %v1462_v3 = vadd.f32 %v1461_v1, %v1373_v0  ;;  %v1287_v5 = vadd.f32 %v1286_v8, %v1198_v34 }
 0x29e   : > { %1529 = vst [vmem:[%s2422_s11 + $0xe0] sm:$0xff] %v1668_v2 }
 0x29f   : > { %1669 = vtanh.f32 %v1462_v3 }
 0x2a2   : > { %v1375_v7 = vpop.f32.mrf.mxu2  ;;  %v1199_v56 = vpop.f32.mrf.mxu0 }
 0x2a3   : > { %v1376_v47 = vadd.f32 %v1375_v7, %v1287_v5  ;;  %v1464_v30 = vpop.f32.mrf.mxu3  ;;  %v1200_v52 = vadd.f32 %v1199_v56, %v2406_v15  ;;  %v1288_v13 = vpop.f32.mrf.mxu1 }
 0x2a5   : > { %v1670_v10 = vpop.eup %1669  ;;  %v1465_v12 = vadd.f32 %v1464_v30, %v1376_v47  ;;  %v1289_v59 = vadd.f32 %v1288_v13, %v1200_v52 }
 0x2a6   : > { %1530 = vst [vmem:[%s2422_s11 + $0xe8] sm:$0xff] %v1670_v10 }
 0x2a7   : > { %1671 = vtanh.f32 %v1465_v12 }
 0x2aa   : > { %v1377_v18 = vpop.f32.mrf.mxu2 }
 0x2ab   : > { %v1378_v43 = vadd.f32 %v1377_v18, %v1289_v59  ;;  %v1466_v17 = vpop.f32.mrf.mxu3 }
 0x2ad   : > { %v1672_v14 = vpop.eup %1671  ;;  %v1467_v19 = vadd.f32 %v1466_v17, %v1378_v43 }
 0x2ae   : > { %1531 = vst [vmem:[%s2422_s11 + $0xf0] sm:$0xff] %v1672_v14 }
 0x2af   : > { %1673 = vtanh.f32 %v1467_v19 }
 0x2b5   : > { %v1674_v20 = vpop.eup %1673 }
 0x2b6   : > { %1532 = vst [vmem:[%s2422_s11 + $0xf8] sm:$0xff] %v1674_v20 }
 0x2b7 PF: > { %s13_s12 = sadd.s32 1, %s1682_s12  }
 0x2b8   : > { %p10_p4 = scmp.ge.s32.totalorder %s13_s12, 4  }
 0x2ba   :  { %12 = sbr.rel (!%p10_p4) target bundleno = 1 (0x1), region = 62 }

</bundles_post_ra>
